<compile_context>
chip_gen: v6e
topology: v6e:2x2x1
jax: 0.10.0
libtpu: 0.0.40
codegen_flags: <defaults>
</compile_context>

<pallas_src>
import jax
import jax.numpy as jnp
from jax.experimental import pallas as pl
from jax.experimental.pallas import tpu as pltpu


def _round_up(n, m):
    return (n + m - 1) // m * m


def _cdiv(a, b):
    return (a + b - 1) // b


def _vmem_capacity_bytes():
    try:
        return int(pltpu.get_tpu_info().vmem_capacity_bytes)
    except Exception:
        return 128 << 20  # conservative default (v5e/v6e)


def _has_two_tensorcores():
    # v7x has 2 TensorCores per chip; ensure the parallel batch axis can shard.
    try:
        kind = jax.devices()[0].device_kind.lower()
    except Exception:
        return False
    return ("v7" in kind) or ("7x" in kind)


def _make_dqn_kernel(n_layers, compute_dtype):
    """Fused MLP kernel for `n_layers` Linear layers (ReLU between all but last)."""

    def kernel(*refs):
        x_ref = refs[0]
        o_ref = refs[-1]
        h = x_ref[...]
        for li in range(n_layers):
            w_ref = refs[1 + 2 * li]
            b_ref = refs[2 + 2 * li]
            lhs = h.astype(compute_dtype)
            h = jnp.dot(lhs, w_ref[...], preferred_element_type=jnp.float32) + b_ref[...]
            if li < n_layers - 1:
                h = jnp.maximum(h, 0.0)
        o_ref[...] = h.astype(o_ref.dtype)

    return kernel


def dqn_forward(x, params, *, block_batch=1024, use_bf16=False):
    """Fused DQN MLP forward.

    x:      [batch, input_dim] float32
    params: list of (W, b) with W shaped [in, out], b shaped [1, out]
    Returns [batch, output_dim] float32.
    """
    batch, in_dim = x.shape
    out_dim = params[-1][0].shape[1]
    n_layers = len(params)

    w_dtype = jnp.bfloat16 if use_bf16 else jnp.float32
    compute_dtype = jnp.bfloat16 if use_bf16 else jnp.float32

    # ---- Pad only the N (output-feature) dims of weights/biases up to multiples of 128.
    # Layer-0 K stays at in_dim (block == full array dim => (8,128) rule satisfied), so x
    # needs NO wrapper-side feature padding / extra HBM pass. Zero rows/cols + zero bias
    # keep the padding mathematically inert.
    dims = [in_dim]
    padded_params = []
    for (w, b) in params:
        fi, fo = w.shape
        fi_pad = dims[-1]
        fo_pad = _round_up(fo, 128)
        w_p = jnp.zeros((fi_pad, fo_pad), w_dtype).at[:fi, :fo].set(w.astype(w_dtype))
        b_p = jnp.zeros((1, fo_pad), jnp.float32).at[:, :fo].set(b.astype(jnp.float32))
        padded_params.append((w_p, b_p))
        dims.append(fo_pad)
    out_pad = dims[-1]

    param_bytes = sum(
        int(w.size) * w.dtype.itemsize + int(b.size) * b.dtype.itemsize
        for w, b in padded_params)

    # ---- Batch tiling: right-size the tile to minimize padded-row waste; on 2-TC chips
    # (v7x) guarantee >=2 grid steps when batch > 128 so "parallel" shards across cores.
    n_steps = max(1, _cdiv(batch, block_batch))
    if _has_two_tensorcores() and batch > 128 and n_steps < 2:
        n_steps = 2
    tb = max(8, _round_up(_cdiv(batch, n_steps), 8))

    # ---- VMEM-capacity-aware budgeting: shrink the batch tile if the working set would
    # blow the budget (weights stay resident).
    def working_set(tb_, param_buffers):
        return (2 * tb_ * in_dim * 4            # double-buffered x tiles (f32)
                + 2 * tb_ * out_pad * 4         # double-buffered out tiles (f32)
                + param_buffers * param_bytes   # resident params
                + 2 * tb_ * max(dims) * 4)      # live intermediates (f32)

    vmem_cap = _vmem_capacity_bytes()
    budget = int(0.7 * min(vmem_cap, 128 << 20))
    while tb > 8 and working_set(tb, 1) > budget:
        tb = max(8, _round_up(tb // 2, 8))
    n_steps = _cdiv(batch, tb)
    batch_pad = n_steps * tb

    vmem_limit = int(min(max(2 * working_set(tb, 2), 8 << 20), max(budget, 16 << 20)))

    # ---- Pad only the batch dim (no-op copy when batch already divides). ----
    if batch_pad != batch or x.dtype != jnp.float32:
        x_p = jnp.zeros((batch_pad, in_dim), jnp.float32).at[:batch].set(
            x.astype(jnp.float32))
    else:
        x_p = x

    flat_args = [x_p]
    for w_p, b_p in padded_params:
        flat_args.extend([w_p, b_p])

    # ---- Cost estimate hint. ----
    flops = 2 * batch_pad * sum(dims[i] * dims[i + 1] for i in range(n_layers))
    bytes_accessed = (int(x_p.size) * x_p.dtype.itemsize + param_bytes
                      + batch_pad * out_pad * 4)

    def _single_buffered_const_spec(shape):
        # Constant-index blocks never change across the grid; drop the 2nd pipeline buffer.
        buffered = getattr(pl, "Buffered", None)
        if buffered is not None:
            try:
                return pl.BlockSpec(shape, lambda i: (0, 0), pipeline_mode=buffered(1))
            except TypeError:
                pass
        return pl.BlockSpec(shape, lambda i: (0, 0))

    def _plain_const_spec(shape):
        return pl.BlockSpec(shape, lambda i: (0, 0))

    def _run(const_spec_fn):
        in_specs = [pl.BlockSpec((tb, in_dim), lambda i: (i, 0))]
        for w_p, b_p in padded_params:
            in_specs.append(const_spec_fn(w_p.shape))
            in_specs.append(const_spec_fn(b_p.shape))
        out_spec = pl.BlockSpec((tb, out_pad), lambda i: (i, 0))
        return pl.pallas_call(
            _make_dqn_kernel(n_layers, compute_dtype),
            out_shape=jax.ShapeDtypeStruct((batch_pad, out_pad), jnp.float32),
            grid=(n_steps,),
            in_specs=in_specs,
            out_specs=out_spec,
            compiler_params=pltpu.CompilerParams(
                dimension_semantics=("parallel",),
                vmem_limit_bytes=vmem_limit,
            ),
            cost_estimate=pl.CostEstimate(
                flops=flops, transcendentals=0, bytes_accessed=bytes_accessed),
        )(*flat_args)

    try:
        out = _run(_single_buffered_const_spec)
    except Exception:
        # Fallback if single-buffered constant blocks are rejected by this jax version.
        out = _run(_plain_const_spec)

    # Strip batch / output-feature padding.
    return out[:batch, :out_dim]


def init_dqn_params(key, input_dim, output_dim, hidden_dims):
    """Deterministic PyTorch-style (Kaiming-uniform-ish) init for nn.Linear layers."""
    dims = [input_dim] + list(hidden_dims) + [output_dim]
    params = []
    for i in range(len(dims) - 1):
        fan_in, fan_out = dims[i], dims[i + 1]
        key, kw, kb = jax.random.split(key, 3)
        bound = 1.0 / (fan_in ** 0.5)
        w = jax.random.uniform(kw, (fan_in, fan_out), jnp.float32, -bound, bound)
        b = jax.random.uniform(kb, (1, fan_out), jnp.float32, -bound, bound)
        params.append((w, b))
    return params


def dqn_reference(x, params):
    """Pure-JAX reference of the same forward pass."""
    h = x
    for i, (w, b) in enumerate(params):
        h = h @ w + b
        if i < len(params) - 1:
            h = jnp.maximum(h, 0.0)
    return h


if __name__ == "__main__":
    # Shapes consistent with the module: DQN(input_dim=32, output_dim=8,
    # hidden_dims=[512, 512, 512]) — the module's default hidden widths, small batches.
    input_dim = 32
    output_dim = 8
    hidden_dims = [512, 512, 512]

    key = jax.random.PRNGKey(0)
    key, kp = jax.random.split(key)
    params = init_dqn_params(kp, input_dim, output_dim, hidden_dims)

    # Case 1: tiny batch (single tile, batch padded to 8 rows).
    key, kx = jax.random.split(key)
    x_small = jax.random.normal(kx, (8, input_dim), jnp.float32)
    out_small = jax.block_until_ready(dqn_forward(x_small, params))
    ref_small = dqn_reference(x_small, params)
    assert out_small.shape == (8, output_dim)
    assert jnp.allclose(out_small, ref_small, atol=1e-4, rtol=1e-4), "small-batch mismatch"

    # Case 2: multi-step batch grid with right-sized tiles (300 -> 2 x 152, not 2 x 256).
    key, kx2 = jax.random.split(key)
    x_big = jax.random.normal(kx2, (300, input_dim), jnp.float32)
    out_big = jax.block_until_ready(dqn_forward(x_big, params, block_batch=256))
    ref_big = dqn_reference(x_big, params)
    assert out_big.shape == (300, output_dim)
    assert jnp.allclose(out_big, ref_big, atol=1e-4, rtol=1e-4), "large-batch mismatch"

    # Case 3: optional bf16 weight/operand path (f32 MXU accumulation), loose tolerance.
    key, kx3 = jax.random.split(key)
    x_bf = jax.random.normal(kx3, (64, input_dim), jnp.float32)
    out_bf = jax.block_until_ready(dqn_forward(x_bf, params, use_bf16=True))
    ref_bf = dqn_reference(x_bf, params)
    assert out_bf.shape == (64, output_dim)
    assert bool(jnp.all(jnp.isfinite(out_bf)))
    assert float(jnp.max(jnp.abs(out_bf - ref_bf))) < 0.1, "bf16-path mismatch"

    print("KERNEL_OK")
</pallas_src>

<mosaic_0001>
module attributes {stable_mosaic.version = 11 : i64} {
  func.func @kernel(%arg0: i32, %arg1: memref<8x32xf32, #tpu.memory_space<vmem>>, %arg2: memref<32x512xf32, #tpu.memory_space<vmem>>, %arg3: memref<1x512xf32, #tpu.memory_space<vmem>>, %arg4: memref<512x512xf32, #tpu.memory_space<vmem>>, %arg5: memref<1x512xf32, #tpu.memory_space<vmem>>, %arg6: memref<512x512xf32, #tpu.memory_space<vmem>>, %arg7: memref<1x512xf32, #tpu.memory_space<vmem>>, %arg8: memref<512x128xf32, #tpu.memory_space<vmem>>, %arg9: memref<1x128xf32, #tpu.memory_space<vmem>>, %arg10: memref<8x128xf32, #tpu.memory_space<vmem>>) attributes {dimension_semantics = [#tpu.dimension_semantics<parallel>], iteration_bounds = array<i64: 1>, scalar_prefetch = 0 : i64, scratch_operands = 0 : i64, tpu.core_type = #tpu.core_type<tc>, window_params = [{transform_indices = @transform_0, window_bounds = array<i64: 8, 32>}, {pipeline_mode = #tpu.pipeline_mode<synchronous>, transform_indices = @transform_1, window_bounds = array<i64: 32, 512>}, {pipeline_mode = #tpu.pipeline_mode<synchronous>, transform_indices = @transform_2, window_bounds = array<i64: 1, 512>}, {pipeline_mode = #tpu.pipeline_mode<synchronous>, transform_indices = @transform_3, window_bounds = array<i64: 512, 512>}, {pipeline_mode = #tpu.pipeline_mode<synchronous>, transform_indices = @transform_4, window_bounds = array<i64: 1, 512>}, {pipeline_mode = #tpu.pipeline_mode<synchronous>, transform_indices = @transform_5, window_bounds = array<i64: 512, 512>}, {pipeline_mode = #tpu.pipeline_mode<synchronous>, transform_indices = @transform_6, window_bounds = array<i64: 1, 512>}, {pipeline_mode = #tpu.pipeline_mode<synchronous>, transform_indices = @transform_7, window_bounds = array<i64: 512, 128>}, {pipeline_mode = #tpu.pipeline_mode<synchronous>, transform_indices = @transform_8, window_bounds = array<i64: 1, 128>}, {transform_indices = @transform_9, window_bounds = array<i64: 8, 128>}]} {
    %c0 = arith.constant 0 : index
    %c0_0 = arith.constant 0 : index
    %0 = vector.load %arg1[%c0, %c0_0] : memref<8x32xf32, #tpu.memory_space<vmem>>, vector<8x32xf32>
    %c0_1 = arith.constant 0 : index
    %c0_2 = arith.constant 0 : index
    %1 = vector.load %arg2[%c0_1, %c0_2] : memref<32x512xf32, #tpu.memory_space<vmem>>, vector<32x512xf32>
    %cst = arith.constant dense<0.000000e+00> : vector<8x512xf32>
    %2 = tpu.matmul %0, %1, %cst {dimension_numbers = #tpu.dot_dimension_numbers<[1], [0], [0], [1], [0, 0, 1, 1], [], []>} : vector<8x32xf32>, vector<32x512xf32>, vector<8x512xf32> -> vector<8x512xf32>
    %c0_3 = arith.constant 0 : index
    %c0_4 = arith.constant 0 : index
    %3 = vector.load %arg3[%c0_3, %c0_4] : memref<1x512xf32, #tpu.memory_space<vmem>>, vector<1x512xf32>
    %4 = vector.broadcast %3 : vector<1x512xf32> to vector<8x512xf32>
    %5 = arith.addf %2, %4 : vector<8x512xf32>
    %cst_5 = arith.constant 0.000000e+00 : f32
    %6 = vector.broadcast %cst_5 : f32 to vector<8x512xf32>
    %7 = arith.maximumf %5, %6 : vector<8x512xf32>
    %c0_6 = arith.constant 0 : index
    %c0_7 = arith.constant 0 : index
    %8 = vector.load %arg4[%c0_6, %c0_7] : memref<512x512xf32, #tpu.memory_space<vmem>>, vector<512x512xf32>
    %cst_8 = arith.constant dense<0.000000e+00> : vector<8x512xf32>
    %9 = tpu.matmul %7, %8, %cst_8 {dimension_numbers = #tpu.dot_dimension_numbers<[1], [0], [0], [1], [0, 0, 1, 1], [], []>} : vector<8x512xf32>, vector<512x512xf32>, vector<8x512xf32> -> vector<8x512xf32>
    %c0_9 = arith.constant 0 : index
    %c0_10 = arith.constant 0 : index
    %10 = vector.load %arg5[%c0_9, %c0_10] : memref<1x512xf32, #tpu.memory_space<vmem>>, vector<1x512xf32>
    %11 = vector.broadcast %10 : vector<1x512xf32> to vector<8x512xf32>
    %12 = arith.addf %9, %11 : vector<8x512xf32>
    %cst_11 = arith.constant 0.000000e+00 : f32
    %13 = vector.broadcast %cst_11 : f32 to vector<8x512xf32>
    %14 = arith.maximumf %12, %13 : vector<8x512xf32>
    %c0_12 = arith.constant 0 : index
    %c0_13 = arith.constant 0 : index
    %15 = vector.load %arg6[%c0_12, %c0_13] : memref<512x512xf32, #tpu.memory_space<vmem>>, vector<512x512xf32>
    %cst_14 = arith.constant dense<0.000000e+00> : vector<8x512xf32>
    %16 = tpu.matmul %14, %15, %cst_14 {dimension_numbers = #tpu.dot_dimension_numbers<[1], [0], [0], [1], [0, 0, 1, 1], [], []>} : vector<8x512xf32>, vector<512x512xf32>, vector<8x512xf32> -> vector<8x512xf32>
    %c0_15 = arith.constant 0 : index
    %c0_16 = arith.constant 0 : index
    %17 = vector.load %arg7[%c0_15, %c0_16] : memref<1x512xf32, #tpu.memory_space<vmem>>, vector<1x512xf32>
    %18 = vector.broadcast %17 : vector<1x512xf32> to vector<8x512xf32>
    %19 = arith.addf %16, %18 : vector<8x512xf32>
    %cst_17 = arith.constant 0.000000e+00 : f32
    %20 = vector.broadcast %cst_17 : f32 to vector<8x512xf32>
    %21 = arith.maximumf %19, %20 : vector<8x512xf32>
    %c0_18 = arith.constant 0 : index
    %c0_19 = arith.constant 0 : index
    %22 = vector.load %arg8[%c0_18, %c0_19] : memref<512x128xf32, #tpu.memory_space<vmem>>, vector<512x128xf32>
    %cst_20 = arith.constant dense<0.000000e+00> : vector<8x128xf32>
    %23 = tpu.matmul %21, %22, %cst_20 {dimension_numbers = #tpu.dot_dimension_numbers<[1], [0], [0], [1], [0, 0, 1, 1], [], []>} : vector<8x512xf32>, vector<512x128xf32>, vector<8x128xf32> -> vector<8x128xf32>
    %c0_21 = arith.constant 0 : index
    %c0_22 = arith.constant 0 : index
    %24 = vector.load %arg9[%c0_21, %c0_22] : memref<1x128xf32, #tpu.memory_space<vmem>>, vector<1x128xf32>
    %25 = vector.broadcast %24 : vector<1x128xf32> to vector<8x128xf32>
    %26 = arith.addf %23, %25 : vector<8x128xf32>
    %c0_23 = arith.constant 0 : index
    %c0_24 = arith.constant 0 : index
    %27 = vector.load %arg10[%c0_23, %c0_24] : memref<8x128xf32, #tpu.memory_space<vmem>>, vector<8x128xf32>
    tpu.vector_store %arg10[%c0_23, %c0_24], %26 {strides = array<i32>} : memref<8x128xf32, #tpu.memory_space<vmem>>, vector<8x128xf32>,
    return
  }
  func.func @transform_0(%arg0: i32) -> (i32, i32) {
    %c0_i32 = arith.constant 0 : i32
    %c0_i32_0 = arith.constant 0 : i32
    return %arg0, %c0_i32 : i32, i32
  }
  func.func @transform_1(%arg0: i32) -> (i32, i32) {
    %c0_i32 = arith.constant 0 : i32
    %c0_i32_0 = arith.constant 0 : i32
    %c0_i32_1 = arith.constant 0 : i32
    return %c0_i32, %c0_i32_0 : i32, i32
  }
  func.func @transform_2(%arg0: i32) -> (i32, i32) {
    %c0_i32 = arith.constant 0 : i32
    %c0_i32_0 = arith.constant 0 : i32
    %c0_i32_1 = arith.constant 0 : i32
    return %c0_i32, %c0_i32_0 : i32, i32
  }
  func.func @transform_3(%arg0: i32) -> (i32, i32) {
    %c0_i32 = arith.constant 0 : i32
    %c0_i32_0 = arith.constant 0 : i32
    %c0_i32_1 = arith.constant 0 : i32
    return %c0_i32, %c0_i32_0 : i32, i32
  }
  func.func @transform_4(%arg0: i32) -> (i32, i32) {
    %c0_i32 = arith.constant 0 : i32
    %c0_i32_0 = arith.constant 0 : i32
    %c0_i32_1 = arith.constant 0 : i32
    return %c0_i32, %c0_i32_0 : i32, i32
  }
  func.func @transform_5(%arg0: i32) -> (i32, i32) {
    %c0_i32 = arith.constant 0 : i32
    %c0_i32_0 = arith.constant 0 : i32
    %c0_i32_1 = arith.constant 0 : i32
    return %c0_i32, %c0_i32_0 : i32, i32
  }
  func.func @transform_6(%arg0: i32) -> (i32, i32) {
    %c0_i32 = arith.constant 0 : i32
    %c0_i32_0 = arith.constant 0 : i32
    %c0_i32_1 = arith.constant 0 : i32
    return %c0_i32, %c0_i32_0 : i32, i32
  }
  func.func @transform_7(%arg0: i32) -> (i32, i32) {
    %c0_i32 = arith.constant 0 : i32
    %c0_i32_0 = arith.constant 0 : i32
    %c0_i32_1 = arith.constant 0 : i32
    return %c0_i32, %c0_i32_0 : i32, i32
  }
  func.func @transform_8(%arg0: i32) -> (i32, i32) {
    %c0_i32 = arith.constant 0 : i32
    %c0_i32_0 = arith.constant 0 : i32
    %c0_i32_1 = arith.constant 0 : i32
    return %c0_i32, %c0_i32_0 : i32, i32
  }
  func.func @transform_9(%arg0: i32) -> (i32, i32) {
    %c0_i32 = arith.constant 0 : i32
    %c0_i32_0 = arith.constant 0 : i32
    return %arg0, %c0_i32 : i32, i32
  }
}

module attributes {stable_mosaic.version = 11 : i64} {
  func.func @kernel(%arg0: i32, %arg1: memref<8x32xf32, #tpu.memory_space<vmem>>, %arg2: memref<32x512xf32, #tpu.memory_space<vmem>>, %arg3: memref<1x512xf32, #tpu.memory_space<vmem>>, %arg4: memref<512x512xf32, #tpu.memory_space<vmem>>, %arg5: memref<1x512xf32, #tpu.memory_space<vmem>>, %arg6: memref<512x512xf32, #tpu.memory_space<vmem>>, %arg7: memref<1x512xf32, #tpu.memory_space<vmem>>, %arg8: memref<512x128xf32, #tpu.memory_space<vmem>>, %arg9: memref<1x128xf32, #tpu.memory_space<vmem>>, %arg10: memref<8x128xf32, #tpu.memory_space<vmem>>) attributes {dimension_semantics = [#tpu.dimension_semantics<parallel>], iteration_bounds = array<i64: 1>, scalar_prefetch = 0 : i64, scratch_operands = 0 : i64, tpu.core_type = #tpu.core_type<tc>, window_params = [{transform_indices = @transform_0, window_bounds = array<i64: 8, 32>}, {pipeline_mode = #tpu.pipeline_mode<synchronous>, transform_indices = @transform_1, window_bounds = array<i64: 32, 512>}, {pipeline_mode = #tpu.pipeline_mode<synchronous>, transform_indices = @transform_2, window_bounds = array<i64: 1, 512>}, {pipeline_mode = #tpu.pipeline_mode<synchronous>, transform_indices = @transform_3, window_bounds = array<i64: 512, 512>}, {pipeline_mode = #tpu.pipeline_mode<synchronous>, transform_indices = @transform_4, window_bounds = array<i64: 1, 512>}, {pipeline_mode = #tpu.pipeline_mode<synchronous>, transform_indices = @transform_5, window_bounds = array<i64: 512, 512>}, {pipeline_mode = #tpu.pipeline_mode<synchronous>, transform_indices = @transform_6, window_bounds = array<i64: 1, 512>}, {pipeline_mode = #tpu.pipeline_mode<synchronous>, transform_indices = @transform_7, window_bounds = array<i64: 512, 128>}, {pipeline_mode = #tpu.pipeline_mode<synchronous>, transform_indices = @transform_8, window_bounds = array<i64: 1, 128>}, {transform_indices = @transform_9, window_bounds = array<i64: 8, 128>}]} {
    %c0 = arith.constant 0 : index
    %c0_0 = arith.constant 0 : index
    %0 = vector.load %arg1[%c0, %c0_0] : memref<8x32xf32, #tpu.memory_space<vmem>>, vector<8x32xf32>
    %c0_1 = arith.constant 0 : index
    %c0_2 = arith.constant 0 : index
    %1 = vector.load %arg2[%c0_1, %c0_2] : memref<32x512xf32, #tpu.memory_space<vmem>>, vector<32x512xf32>
    %cst = arith.constant dense<0.000000e+00> : vector<8x512xf32>
    %2 = tpu.matmul %0, %1, %cst {dimension_numbers = #tpu.dot_dimension_numbers<[1], [0], [0], [1], [0, 0, 1, 1], [], []>} : vector<8x32xf32>, vector<32x512xf32>, vector<8x512xf32> -> vector<8x512xf32>
    %c0_3 = arith.constant 0 : index
    %c0_4 = arith.constant 0 : index
    %3 = vector.load %arg3[%c0_3, %c0_4] : memref<1x512xf32, #tpu.memory_space<vmem>>, vector<1x512xf32>
    %4 = vector.broadcast %3 : vector<1x512xf32> to vector<8x512xf32>
    %5 = arith.addf %2, %4 : vector<8x512xf32>
    %cst_5 = arith.constant 0.000000e+00 : f32
    %6 = vector.broadcast %cst_5 : f32 to vector<8x512xf32>
    %7 = arith.maximumf %5, %6 : vector<8x512xf32>
    %c0_6 = arith.constant 0 : index
    %c0_7 = arith.constant 0 : index
    %8 = vector.load %arg4[%c0_6, %c0_7] : memref<512x512xf32, #tpu.memory_space<vmem>>, vector<512x512xf32>
    %cst_8 = arith.constant dense<0.000000e+00> : vector<8x512xf32>
    %9 = tpu.matmul %7, %8, %cst_8 {dimension_numbers = #tpu.dot_dimension_numbers<[1], [0], [0], [1], [0, 0, 1, 1], [], []>} : vector<8x512xf32>, vector<512x512xf32>, vector<8x512xf32> -> vector<8x512xf32>
    %c0_9 = arith.constant 0 : index
    %c0_10 = arith.constant 0 : index
    %10 = vector.load %arg5[%c0_9, %c0_10] : memref<1x512xf32, #tpu.memory_space<vmem>>, vector<1x512xf32>
    %11 = vector.broadcast %10 : vector<1x512xf32> to vector<8x512xf32>
    %12 = arith.addf %9, %11 : vector<8x512xf32>
    %cst_11 = arith.constant 0.000000e+00 : f32
    %13 = vector.broadcast %cst_11 : f32 to vector<8x512xf32>
    %14 = arith.maximumf %12, %13 : vector<8x512xf32>
    %c0_12 = arith.constant 0 : index
    %c0_13 = arith.constant 0 : index
    %15 = vector.load %arg6[%c0_12, %c0_13] : memref<512x512xf32, #tpu.memory_space<vmem>>, vector<512x512xf32>
    %cst_14 = arith.constant dense<0.000000e+00> : vector<8x512xf32>
    %16 = tpu.matmul %14, %15, %cst_14 {dimension_numbers = #tpu.dot_dimension_numbers<[1], [0], [0], [1], [0, 0, 1, 1], [], []>} : vector<8x512xf32>, vector<512x512xf32>, vector<8x512xf32> -> vector<8x512xf32>
    %c0_15 = arith.constant 0 : index
    %c0_16 = arith.constant 0 : index
    %17 = vector.load %arg7[%c0_15, %c0_16] : memref<1x512xf32, #tpu.memory_space<vmem>>, vector<1x512xf32>
    %18 = vector.broadcast %17 : vector<1x512xf32> to vector<8x512xf32>
    %19 = arith.addf %16, %18 : vector<8x512xf32>
    %cst_17 = arith.constant 0.000000e+00 : f32
    %20 = vector.broadcast %cst_17 : f32 to vector<8x512xf32>
    %21 = arith.maximumf %19, %20 : vector<8x512xf32>
    %c0_18 = arith.constant 0 : index
    %c0_19 = arith.constant 0 : index
    %22 = vector.load %arg8[%c0_18, %c0_19] : memref<512x128xf32, #tpu.memory_space<vmem>>, vector<512x128xf32>
    %cst_20 = arith.constant dense<0.000000e+00> : vector<8x128xf32>
    %23 = tpu.matmul %21, %22, %cst_20 {dimension_numbers = #tpu.dot_dimension_numbers<[1], [0], [0], [1], [0, 0, 1, 1], [], []>} : vector<8x512xf32>, vector<512x128xf32>, vector<8x128xf32> -> vector<8x128xf32>
    %c0_21 = arith.constant 0 : index
    %c0_22 = arith.constant 0 : index
    %24 = vector.load %arg9[%c0_21, %c0_22] : memref<1x128xf32, #tpu.memory_space<vmem>>, vector<1x128xf32>
    %25 = vector.broadcast %24 : vector<1x128xf32> to vector<8x128xf32>
    %26 = arith.addf %23, %25 : vector<8x128xf32>
    %c0_23 = arith.constant 0 : index
    %c0_24 = arith.constant 0 : index
    %27 = vector.load %arg10[%c0_23, %c0_24] : memref<8x128xf32, #tpu.memory_space<vmem>>, vector<8x128xf32>
    tpu.vector_store %arg10[%c0_23, %c0_24], %26 {strides = array<i32>} : memref<8x128xf32, #tpu.memory_space<vmem>>, vector<8x128xf32>,
    return
  }
  func.func @transform_0(%arg0: i32) -> (i32, i32) {
    %c0_i32 = arith.constant 0 : i32
    %c0_i32_0 = arith.constant 0 : i32
    return %arg0, %c0_i32 : i32, i32
  }
  func.func @transform_1(%arg0: i32) -> (i32, i32) {
    %c0_i32 = arith.constant 0 : i32
    %c0_i32_0 = arith.constant 0 : i32
    %c0_i32_1 = arith.constant 0 : i32
    return %c0_i32, %c0_i32_0 : i32, i32
  }
  func.func @transform_2(%arg0: i32) -> (i32, i32) {
    %c0_i32 = arith.constant 0 : i32
    %c0_i32_0 = arith.constant 0 : i32
    %c0_i32_1 = arith.constant 0 : i32
    return %c0_i32, %c0_i32_0 : i32, i32
  }
  func.func @transform_3(%arg0: i32) -> (i32, i32) {
    %c0_i32 = arith.constant 0 : i32
    %c0_i32_0 = arith.constant 0 : i32
    %c0_i32_1 = arith.constant 0 : i32
    return %c0_i32, %c0_i32_0 : i32, i32
  }
  func.func @transform_4(%arg0: i32) -> (i32, i32) {
    %c0_i32 = arith.constant 0 : i32
    %c0_i32_0 = arith.constant 0 : i32
    %c0_i32_1 = arith.constant 0 : i32
    return %c0_i32, %c0_i32_0 : i32, i32
  }
  func.func @transform_5(%arg0: i32) -> (i32, i32) {
    %c0_i32 = arith.constant 0 : i32
    %c0_i32_0 = arith.constant 0 : i32
    %c0_i32_1 = arith.constant 0 : i32
    return %c0_i32, %c0_i32_0 : i32, i32
  }
  func.func @transform_6(%arg0: i32) -> (i32, i32) {
    %c0_i32 = arith.constant 0 : i32
    %c0_i32_0 = arith.constant 0 : i32
    %c0_i32_1 = arith.constant 0 : i32
    return %c0_i32, %c0_i32_0 : i32, i32
  }
  func.func @transform_7(%arg0: i32) -> (i32, i32) {
    %c0_i32 = arith.constant 0 : i32
    %c0_i32_0 = arith.constant 0 : i32
    %c0_i32_1 = arith.constant 0 : i32
    return %c0_i32, %c0_i32_0 : i32, i32
  }
  func.func @transform_8(%arg0: i32) -> (i32, i32) {
    %c0_i32 = arith.constant 0 : i32
    %c0_i32_0 = arith.constant 0 : i32
    %c0_i32_1 = arith.constant 0 : i32
    return %c0_i32, %c0_i32_0 : i32, i32
  }
  func.func @transform_9(%arg0: i32) -> (i32, i32) {
    %c0_i32 = arith.constant 0 : i32
    %c0_i32_0 = arith.constant 0 : i32
    return %arg0, %c0_i32 : i32, i32
  }
}

</mosaic_0001>

<bundles_post_ra>
// kernel: tpu_custom_call.1
= control target key start
LH: loop header
LB: loop body
LE: loop exit
PB: predicated region body
PF: predicated region fallthrough
CT: control target
= control target key end

     0   :  { %14 = vsyncpa [#allocation3], 0  ;;  %s2052_s0 = inlined_call_operand.hbm [shape: f32[8,32], index: 0, kind: input, shape index: {}]   ;;  %s2053_s1 = inlined_call_operand.hbm [shape: f32[32,512], index: 1, kind: input, shape index: {}]   ;;  %s2054_s2 = inlined_call_operand.hbm [shape: f32[1,512], index: 2, kind: input, shape index: {}]   ;;  %s2055_s3 = inlined_call_operand.hbm [shape: f32[512,512], index: 3, kind: input, shape index: {}]   ;;  %s2056_s4 = inlined_call_operand.vmem [shape: f32[1,512], index: 4, kind: input, shape index: {}]   ;;  %s2057_s5 = inlined_call_operand.hbm [shape: f32[512,512], index: 5, kind: input, shape index: {}]   ;;  %s2058_s6 = inlined_call_operand.vmem [shape: f32[1,512], index: 6, kind: input, shape index: {}]   ;;  %s2059_s7 = inlined_call_operand.hbm [shape: f32[512,128], index: 7, kind: input, shape index: {}]   ;;  %s2060_s8 = inlined_call_operand.vmem [shape: f32[1,128], index: 8, kind: input, shape index: {}]   ;;  %s2061_s9 = inlined_call_operand.hbm [shape: f32[8,128], index: 9, kind: output, shape index: {}]  }
   0x1   :  { %15 = vsyncpa [#allocation6], 0 }
   0x2   :  { %16 = vsyncpa [#allocation9], 0 }
   0x3   :  { %17 = vsyncpa [#allocation12], 0 }
   0x4   :  { %18 = vsyncpa [#allocation4], 0  ;;  %s1897_s30 = smov [#allocation5]  }
   0x5   :  { %s34_s10 = sshll.u32 %s1897_s30, 4  ;;  %s35_s10 = int_to_ptr.vmem [resolvable:$true] %s34_s10 }
   0x6   :  { %s1755_s11 = scalar_lea.vmem %s35_s10, 2048  ;;  %p1760_p1 = scmp.lt.s32.totalorder %s35_s10, %s35_s10 }
   0x7   :  { %p1756_p0 = scmp.ne.s32.totalorder %s35_s10, %s1755_s11  ;;  %p1761_p2 = scmp.lt.s32.totalorder %s1755_s11, %s1755_s11 }
   0x9   :  { %p1762_p3 = por %p1761_p2, %p1760_p1 }
   0xb   :  { %p1763_p4 = pnand %p1762_p3, %p1756_p0 }
   0xd   :  { %1766 = shalt.err (!%p1763_p4)
}
   0xe   :  { %s1898_s12 = smov 512   ;;  %s1899_s13 = smov 32  }
   0xf   :  { %40 = dma.hbm_to_vmem [thread:$0]  %s2053_s1, 2048, %s35_s10, [#allocation6], %s1898_s12, %s1898_s12, %s1899_s13  }
  0x10   :  { %s1900_s16 = smov [#allocation8]   ;;  %s1901_s18 = smov [#allocation2]  }
  0x11   :  { %s56_s17 = sshll.u32 %s1900_s16, 4  ;;  %s25_s19 = sshll.u32 %s1901_s18, 4  ;;  %s57_s17 = int_to_ptr.vmem [resolvable:$true] %s56_s17  ;;  %s26_s19 = int_to_ptr.vmem [resolvable:$true] %s25_s19 }
  0x12   :  { %s1775_s20 = scalar_lea.vmem %s57_s17, 32768  ;;  %p1780_p6 = scmp.lt.s32.totalorder %s57_s17, %s57_s17 }
  0x13   :  { %p1776_p5 = scmp.ne.s32.totalorder %s57_s17, %s1775_s20  ;;  %p1781_p7 = scmp.lt.s32.totalorder %s1775_s20, %s1775_s20 }
  0x15   :  { %p1782_p8 = por %p1781_p7, %p1780_p6 }
  0x17   :  { %p1783_p9 = pnand %p1782_p8, %p1776_p5 }
  0x19   :  { %1786 = shalt.err (!%p1783_p9)
}
  0x1a   :  { %62 = dma.hbm_to_vmem [thread:$0]  %s2055_s3, 32768, %s57_s17, [#allocation9], %s1898_s12, %s1898_s12, %s1899_s13  }
  0x1b   :  { %s1795_s1 = scalar_lea.vmem %s26_s19, 128  ;;  %p1800_p11 = scmp.lt.s32.totalorder %s26_s19, %s26_s19 }
  0x1c   :  { %p1796_p10 = scmp.ne.s32.totalorder %s26_s19, %s1795_s1  ;;  %p1801_p12 = scmp.lt.s32.totalorder %s1795_s1, %s1795_s1 }
  0x1e   :  { %p1802_p13 = por %p1801_p12, %p1800_p11 }
  0x20   :  { %p1803_p0 = pnand %p1802_p13, %p1796_p10 }
  0x22   :  { %1806 = shalt.err (!%p1803_p0)
}
  0x23   :  { %28 = dma.hbm_to_vmem [thread:$0]  %s2052_s0, 128, %s26_s19, [#allocation3]  }
  0x24   :  { %s1902_s25 = smov [#allocation7]   ;;  %s1903_s27 = smov [#allocation10]  }
  0x25   :  { %s47_s26 = sshll.u32 %s1902_s25, 4  ;;  %s70_s28 = sshll.u32 %s1903_s27, 4  ;;  %s48_s26 = int_to_ptr.vmem [resolvable:$true] %s47_s26  ;;  %s71_s28 = int_to_ptr.vmem [resolvable:$true] %s70_s28 }
  0x26   :  { %s1815_s29 = scalar_lea.vmem %s48_s26, 64  ;;  %p1820_p2 = scmp.lt.s32.totalorder %s48_s26, %s48_s26 }
  0x27   :  { %p1816_p1 = scmp.ne.s32.totalorder %s48_s26, %s1815_s29  ;;  %p1821_p3 = scmp.lt.s32.totalorder %s1815_s29, %s1815_s29 }
  0x29   :  { %p1822_p4 = por %p1821_p3, %p1820_p2 }
  0x2b   :  { %p1823_p5 = pnand %p1822_p4, %p1816_p1 }
  0x2d   :  { %1826 = shalt.err (!%p1823_p5)
}
  0x2e   :  { %50 = dma.hbm_to_vmem [thread:$0]  %s2054_s2, 64, %s48_s26, [#allocation6]  }
  0x2f   :  { %s1835_s10 = scalar_lea.vmem %s71_s28, 32768  ;;  %p1840_p7 = scmp.lt.s32.totalorder %s71_s28, %s71_s28 }
  0x30   :  { %p1836_p6 = scmp.ne.s32.totalorder %s71_s28, %s1835_s10  ;;  %p1841_p8 = scmp.lt.s32.totalorder %s1835_s10, %s1835_s10 }
  0x32   :  { %p1842_p9 = por %p1841_p8, %p1840_p7 }
  0x34   :  { %p1843_p10 = pnand %p1842_p9, %p1836_p6 }
  0x36   :  { %1846 = shalt.err (!%p1843_p10)
}
  0x37   :  { %76 = dma.hbm_to_vmem [thread:$0]  %s2057_s5, 32768, %s71_s28, [#allocation9], %s1898_s12, %s1898_s12, %s1899_s13  }
  0x38   :  { %s1904_s14 = smov [#allocation11]  }
  0x39   :  { %s84_s15 = sshll.u32 %s1904_s14, 4  ;;  %s85_s15 = int_to_ptr.vmem [resolvable:$true] %s84_s15 }
  0x3a   :  { %s1855_s16 = scalar_lea.vmem %s85_s15, 8192  ;;  %p1860_p12 = scmp.lt.s32.totalorder %s85_s15, %s85_s15 }
  0x3b   :  { %p1856_p11 = scmp.ne.s32.totalorder %s85_s15, %s1855_s16  ;;  %p1861_p13 = scmp.lt.s32.totalorder %s1855_s16, %s1855_s16 }
  0x3d   :  { %p1862_p0 = por %p1861_p13, %p1860_p12 }
  0x3f   :  { %p1863_p1 = pnand %p1862_p0, %p1856_p11 }
  0x41   :  { %1866 = shalt.err (!%p1863_p1)
}
  0x42   :  { %s1905_s2 = smov 128   ;;  %s1906_s17 = smov 8  }
  0x43   :  { %90 = dma.hbm_to_vmem [thread:$0]  %s2059_s7, 8192, %s85_s15, [#allocation12], %s1905_s2, %s1905_s2, %s1906_s17  }
  0x44   :  { %1887 = dma.done.wait [#allocation3], 128  }
  0x45   :  { %1888 = vsyncadd [#allocation3], 4294967168 }
  0x46   :  { %1889 = dma.done.wait [#allocation6], 2112  }
  0x47   :  { %1890 = vsyncadd [#allocation6], 4294965184 }
  0x48   :  { %1891 = dma.done.wait [#allocation9], 65536  }
  0x49   :  { %1892 = vsyncadd [#allocation9], 4294901760 }
  0x4a   :  { %1893 = dma.done.wait [#allocation12], 8192  }
  0x4b   :  { %1894 = vsyncadd [#allocation12], 4294959104  ;;  %v1907_v0 = vmov 0.0   ;;  %v125_v1 = vld [vmem:[#allocation5 + $0x68] sm:$0xff]  ;;  %v127_v2 = vld [vmem:[#allocation5 + $0x78] sm:$0xff]  ;;  %vm150_vm0 = vcmask 261120  }
  0x4c   :  { %218 = vmatprep.mubr.f32.mxu0 %v1907_v0  ;;  %289 = vmatprep.mubr.f32.mxu1 %v1907_v0  ;;  %v124_v3 = vld [vmem:[#allocation5 + $0x60] sm:$0xff]  ;;  %v126_v4 = vld [vmem:[#allocation5 + $0x70] sm:$0xff]  ;;  %v121_v5 = vld [vmem:[#allocation5 + $0x48] sm:$0xff]  ;;  %s1908_s20 = smov [#allocation13]  }
  0x4d   :  { %178 = vmatprep.subr.mxu0 %v125_v1  ;;  %249 = vmatprep.subr.mxu1 %v127_v2  ;;  %v123_v6 = vld [vmem:[#allocation5 + $0x58] sm:$0xff]  ;;  %v120_v7 = vld [vmem:[#allocation5 + $0x40] sm:$0xff]  ;;  %v122_v8 = vld [vmem:[#allocation5 + $0x50] sm:$0xff]  ;;  %s1650_s21 = sshll.u32 %s1908_s20, 4  ;;  %s1651_s21 = int_to_ptr.vmem [resolvable:$true] %s1650_s21 }
  0x4e   :  { %179 = vmatpush1.msra.mxu0 %v124_v3  ;;  %250 = vmatpush1.msra.mxu1 %v126_v4  ;;  %v117_v9 = vld [vmem:[#allocation5 + $0x28] sm:$0xff]  ;;  %v119_v10 = vld [vmem:[#allocation5 + $0x38] sm:$0xff]  ;;  %v116_v11 = vld [vmem:[#allocation5 + $0x20] sm:$0xff]  ;;  %s1867_s22 = scalar_lea.vmem %s1651_s21, 128  ;;  %p1872_p3 = scmp.lt.s32.totalorder %s1651_s21, %s1651_s21 }
  0x4f   :  { %180 = vmatprep.subr.mxu0 %v121_v5  ;;  %251 = vmatprep.subr.mxu1 %v123_v6  ;;  %v118_v12 = vld [vmem:[#allocation5 + $0x30] sm:$0xff]  ;;  %v113_v13 = vld [vmem:[#allocation5 + $0x8] sm:$0xff]  ;;  %v115_v14 = vld [vmem:[#allocation5 + $0x18] sm:$0xff]  ;;  %p1868_p2 = scmp.ne.s32.totalorder %s1651_s21, %s1867_s22  ;;  %p1873_p4 = scmp.lt.s32.totalorder %s1867_s22, %s1867_s22 }
  0x50   :  { %181 = vmatpush1.msra.mxu0 %v120_v7  ;;  %252 = vmatpush1.msra.mxu1 %v122_v8  ;;  %v112_v15 = vld [vmem:[#allocation5] sm:$0xff]  ;;  %v114_v16 = vld [vmem:[#allocation5 + $0x10] sm:$0xff]  ;;  %v111_v17 = vld [vmem:[#allocation2] sm:$0xff] }
  0x51   :  { %182 = vmatprep.subr.mxu0 %v117_v9  ;;  %253 = vmatprep.subr.mxu1 %v119_v10  ;;  %v361_v18 = vld [vmem:[#allocation8 + $0x1e8] sm:$0xff]  ;;  %v360_v20 = vld [vmem:[#allocation8 + $0x1e0] sm:$0xff]  ;;  %p1874_p5 = por %p1873_p4, %p1872_p3 }
  0x52   :  { %183 = vmatpush1.msra.mxu0 %v116_v11  ;;  %254 = vmatpush1.msra.mxu1 %v118_v12  ;;  %v489_v19 = vld [vmem:[#allocation8 + $0x5e8] sm:$0xff]  ;;  %v488_v21 = vld [vmem:[#allocation8 + $0x5e0] sm:$0xff] }
  0x53   :  { %184 = vmatprep.subr.mxu0 %v113_v13  ;;  %255 = vmatprep.subr.mxu1 %v115_v14  ;;  %v357_v22 = vld [vmem:[#allocation8 + $0x1c8] sm:$0xff]  ;;  %v356_v24 = vld [vmem:[#allocation8 + $0x1c0] sm:$0xff]  ;;  %p1875_p6 = pnand %p1874_p5, %p1868_p2 }
  0x54   :  { %185 = vmatpush1.msra.mxu0 %v112_v15  ;;  %256 = vmatpush1.msra.mxu1 %v114_v16  ;;  %v485_v23 = vld [vmem:[#allocation8 + $0x5c8] sm:$0xff]  ;;  %v484_v25 = vld [vmem:[#allocation8 + $0x5c0] sm:$0xff] }
  0x55   :  { %1662 = vmatmul.mubr.msk.f32.vlgmr.msra.gmra.mxu0 %vm150_vm0, %v111_v17  ;;  %1663 = vmatmul.mubr.msk.f32.vlgmr.msra.gmra.mxu1 %vm150_vm0, %v111_v17  ;;  %v353_v26 = vld [vmem:[#allocation8 + $0x1a8] sm:$0xff]  ;;  %v352_v28 = vld [vmem:[#allocation8 + $0x1a0] sm:$0xff] }
  0x56   :  { %578 = vmatprep.subr.mxu0 %v361_v18  ;;  %649 = vmatprep.subr.mxu1 %v489_v19  ;;  %v481_v27 = vld [vmem:[#allocation8 + $0x5a8] sm:$0xff]  ;;  %v480_v29 = vld [vmem:[#allocation8 + $0x5a0] sm:$0xff] }
  0x57   :  { %579 = vmatpush1.msra.mxu0 %v360_v20  ;;  %650 = vmatpush1.msra.mxu1 %v488_v21  ;;  %v349_v30 = vld [vmem:[#allocation8 + $0x188] sm:$0xff]  ;;  %v348_v32 = vld [vmem:[#allocation8 + $0x180] sm:$0xff] }
  0x58   :  { %580 = vmatprep.subr.mxu0 %v357_v22  ;;  %651 = vmatprep.subr.mxu1 %v485_v23  ;;  %v477_v31 = vld [vmem:[#allocation8 + $0x588] sm:$0xff]  ;;  %v476_v33 = vld [vmem:[#allocation8 + $0x580] sm:$0xff] }
  0x59   :  { %581 = vmatpush1.msra.mxu0 %v356_v24  ;;  %652 = vmatpush1.msra.mxu1 %v484_v25  ;;  %v345_v34 = vld [vmem:[#allocation8 + $0x168] sm:$0xff]  ;;  %v344_v36 = vld [vmem:[#allocation8 + $0x160] sm:$0xff] }
  0x5a   :  { %582 = vmatprep.subr.mxu0 %v353_v26  ;;  %653 = vmatprep.subr.mxu1 %v481_v27  ;;  %v473_v35 = vld [vmem:[#allocation8 + $0x568] sm:$0xff]  ;;  %v472_v37 = vld [vmem:[#allocation8 + $0x560] sm:$0xff] }
  0x5b   :  { %583 = vmatpush1.msra.mxu0 %v352_v28  ;;  %654 = vmatpush1.msra.mxu1 %v480_v29  ;;  %v341_v38 = vld [vmem:[#allocation8 + $0x148] sm:$0xff]  ;;  %v340_v40 = vld [vmem:[#allocation8 + $0x140] sm:$0xff] }
  0x5c   :  { %584 = vmatprep.subr.mxu0 %v349_v30  ;;  %655 = vmatprep.subr.mxu1 %v477_v31  ;;  %v469_v39 = vld [vmem:[#allocation8 + $0x548] sm:$0xff]  ;;  %v468_v41 = vld [vmem:[#allocation8 + $0x540] sm:$0xff] }
  0x5d   :  { %585 = vmatpush1.msra.mxu0 %v348_v32  ;;  %656 = vmatpush1.msra.mxu1 %v476_v33  ;;  %v337_v42 = vld [vmem:[#allocation8 + $0x128] sm:$0xff]  ;;  %v336_v44 = vld [vmem:[#allocation8 + $0x120] sm:$0xff] }
  0x5e   :  { %586 = vmatprep.subr.mxu0 %v345_v34  ;;  %657 = vmatprep.subr.mxu1 %v473_v35  ;;  %v465_v43 = vld [vmem:[#allocation8 + $0x528] sm:$0xff]  ;;  %v464_v45 = vld [vmem:[#allocation8 + $0x520] sm:$0xff] }
  0x5f   :  { %587 = vmatpush1.msra.mxu0 %v344_v36  ;;  %658 = vmatpush1.msra.mxu1 %v472_v37  ;;  %v333_v46 = vld [vmem:[#allocation8 + $0x108] sm:$0xff]  ;;  %v332_v48 = vld [vmem:[#allocation8 + $0x100] sm:$0xff] }
  0x60   :  { %588 = vmatprep.subr.mxu0 %v341_v38  ;;  %659 = vmatprep.subr.mxu1 %v469_v39  ;;  %v461_v47 = vld [vmem:[#allocation8 + $0x508] sm:$0xff]  ;;  %v460_v49 = vld [vmem:[#allocation8 + $0x500] sm:$0xff] }
  0x61   :  { %589 = vmatpush1.msra.mxu0 %v340_v40  ;;  %660 = vmatpush1.msra.mxu1 %v468_v41  ;;  %v329_v50 = vld [vmem:[#allocation8 + $0xe8] sm:$0xff]  ;;  %v328_v52 = vld [vmem:[#allocation8 + $0xe0] sm:$0xff] }
  0x62   :  { %590 = vmatprep.subr.mxu0 %v337_v42  ;;  %661 = vmatprep.subr.mxu1 %v465_v43  ;;  %v457_v51 = vld [vmem:[#allocation8 + $0x4e8] sm:$0xff]  ;;  %v456_v53 = vld [vmem:[#allocation8 + $0x4e0] sm:$0xff] }
  0x63   :  { %591 = vmatpush1.msra.mxu0 %v336_v44  ;;  %662 = vmatpush1.msra.mxu1 %v464_v45  ;;  %v325_v54 = vld [vmem:[#allocation8 + $0xc8] sm:$0xff]  ;;  %v324_v56 = vld [vmem:[#allocation8 + $0xc0] sm:$0xff] }
  0x64   :  { %592 = vmatprep.subr.mxu0 %v333_v46  ;;  %663 = vmatprep.subr.mxu1 %v461_v47  ;;  %v453_v55 = vld [vmem:[#allocation8 + $0x4c8] sm:$0xff]  ;;  %v452_v57 = vld [vmem:[#allocation8 + $0x4c0] sm:$0xff] }
  0x65   :  { %593 = vmatpush1.msra.mxu0 %v332_v48  ;;  %664 = vmatpush1.msra.mxu1 %v460_v49  ;;  %v321_v58 = vld [vmem:[#allocation8 + $0xa8] sm:$0xff]  ;;  %v320_v60 = vld [vmem:[#allocation8 + $0xa0] sm:$0xff] }
  0x66   :  { %594 = vmatprep.subr.mxu0 %v329_v50  ;;  %665 = vmatprep.subr.mxu1 %v457_v51  ;;  %v449_v59 = vld [vmem:[#allocation8 + $0x4a8] sm:$0xff]  ;;  %v448_v61 = vld [vmem:[#allocation8 + $0x4a0] sm:$0xff] }
  0x67   :  { %595 = vmatpush1.msra.mxu0 %v328_v52  ;;  %666 = vmatpush1.msra.mxu1 %v456_v53  ;;  %v317_v62 = vld [vmem:[#allocation8 + $0x88] sm:$0xff]  ;;  %v316_v0 = vld [vmem:[#allocation8 + $0x80] sm:$0xff] }
  0x68   :  { %596 = vmatprep.subr.mxu0 %v325_v54  ;;  %667 = vmatprep.subr.mxu1 %v453_v55  ;;  %v445_v63 = vld [vmem:[#allocation8 + $0x488] sm:$0xff]  ;;  %v444_v1 = vld [vmem:[#allocation8 + $0x480] sm:$0xff] }
  0x69   :  { %597 = vmatpush1.msra.mxu0 %v324_v56  ;;  %668 = vmatpush1.msra.mxu1 %v452_v57  ;;  %v313_v2 = vld [vmem:[#allocation8 + $0x68] sm:$0xff]  ;;  %v312_v4 = vld [vmem:[#allocation8 + $0x60] sm:$0xff] }
  0x6a   :  { %598 = vmatprep.subr.mxu0 %v321_v58  ;;  %669 = vmatprep.subr.mxu1 %v449_v59  ;;  %v441_v3 = vld [vmem:[#allocation8 + $0x468] sm:$0xff]  ;;  %v440_v5 = vld [vmem:[#allocation8 + $0x460] sm:$0xff] }
  0x6b   :  { %599 = vmatpush1.msra.mxu0 %v320_v60  ;;  %670 = vmatpush1.msra.mxu1 %v448_v61  ;;  %v309_v6 = vld [vmem:[#allocation8 + $0x48] sm:$0xff]  ;;  %v308_v8 = vld [vmem:[#allocation8 + $0x40] sm:$0xff] }
  0x6c   :  { %600 = vmatprep.subr.mxu0 %v317_v62  ;;  %671 = vmatprep.subr.mxu1 %v445_v63  ;;  %v437_v7 = vld [vmem:[#allocation8 + $0x448] sm:$0xff]  ;;  %v436_v9 = vld [vmem:[#allocation8 + $0x440] sm:$0xff] }
  0x6d   :  { %601 = vmatpush1.msra.mxu0 %v316_v0  ;;  %672 = vmatpush1.msra.mxu1 %v444_v1  ;;  %v305_v10 = vld [vmem:[#allocation8 + $0x28] sm:$0xff]  ;;  %v304_v12 = vld [vmem:[#allocation8 + $0x20] sm:$0xff] }
  0x6e   :  { %602 = vmatprep.subr.mxu0 %v313_v2  ;;  %673 = vmatprep.subr.mxu1 %v441_v3  ;;  %v433_v11 = vld [vmem:[#allocation8 + $0x428] sm:$0xff]  ;;  %v432_v13 = vld [vmem:[#allocation8 + $0x420] sm:$0xff] }
  0x6f   :  { %603 = vmatpush1.msra.mxu0 %v312_v4  ;;  %674 = vmatpush1.msra.mxu1 %v440_v5  ;;  %v301_v14 = vld [vmem:[#allocation8 + $0x8] sm:$0xff]  ;;  %v300_v16 = vld [vmem:[#allocation8] sm:$0xff] }
  0x70   :  { %604 = vmatprep.subr.mxu0 %v309_v6  ;;  %675 = vmatprep.subr.mxu1 %v437_v7  ;;  %v429_v15 = vld [vmem:[#allocation8 + $0x408] sm:$0xff]  ;;  %v428_v17 = vld [vmem:[#allocation8 + $0x400] sm:$0xff] }
  0x71   :  { %605 = vmatpush1.msra.mxu0 %v308_v8  ;;  %676 = vmatpush1.msra.mxu1 %v436_v9  ;;  %v425_v18 = vld [vmem:[#allocation8 + $0x3e8] sm:$0xff]  ;;  %v424_v20 = vld [vmem:[#allocation8 + $0x3e0] sm:$0xff] }
  0x72   :  { %606 = vmatprep.subr.mxu0 %v305_v10  ;;  %677 = vmatprep.subr.mxu1 %v433_v11  ;;  %v553_v19 = vld [vmem:[#allocation8 + $0x7e8] sm:$0xff]  ;;  %v552_v21 = vld [vmem:[#allocation8 + $0x7e0] sm:$0xff] }
  0x73   :  { %607 = vmatpush1.msra.mxu0 %v304_v12  ;;  %678 = vmatpush1.msra.mxu1 %v432_v13  ;;  %v421_v22 = vld [vmem:[#allocation8 + $0x3c8] sm:$0xff]  ;;  %v420_v24 = vld [vmem:[#allocation8 + $0x3c0] sm:$0xff] }
  0x74   :  { %608 = vmatprep.subr.mxu0 %v301_v14  ;;  %679 = vmatprep.subr.mxu1 %v429_v15  ;;  %v549_v23 = vld [vmem:[#allocation8 + $0x7c8] sm:$0xff]  ;;  %v548_v25 = vld [vmem:[#allocation8 + $0x7c0] sm:$0xff] }
  0x75   :  { %609 = vmatpush1.msra.mxu0 %v300_v16  ;;  %680 = vmatpush1.msra.mxu1 %v428_v17  ;;  %v417_v26 = vld [vmem:[#allocation8 + $0x3a8] sm:$0xff]  ;;  %v416_v28 = vld [vmem:[#allocation8 + $0x3a0] sm:$0xff] }
  0x76   :  { %610 = vmatprep.subr.mxu0 %v425_v18  ;;  %681 = vmatprep.subr.mxu1 %v553_v19  ;;  %v545_v27 = vld [vmem:[#allocation8 + $0x7a8] sm:$0xff]  ;;  %v544_v29 = vld [vmem:[#allocation8 + $0x7a0] sm:$0xff]  ;;  %v363_v18 = vld [vmem:[#allocation8 + $0x1f8] sm:$0xff] }
  0x77   :  { %611 = vmatpush2.msra.mxu0 %v424_v20  ;;  %682 = vmatpush2.msra.mxu1 %v552_v21  ;;  %v413_v30 = vld [vmem:[#allocation8 + $0x388] sm:$0xff]  ;;  %v412_v32 = vld [vmem:[#allocation8 + $0x380] sm:$0xff]  ;;  %v491_v19 = vld [vmem:[#allocation8 + $0x5f8] sm:$0xff]  ;;  %v130_v20 = vlaneseq }
  0x78   :  { %612 = vmatprep.subr.mxu0 %v421_v22  ;;  %683 = vmatprep.subr.mxu1 %v549_v23  ;;  %v541_v31 = vld [vmem:[#allocation8 + $0x788] sm:$0xff]  ;;  %v540_v33 = vld [vmem:[#allocation8 + $0x780] sm:$0xff] }
  0x79   :  { %613 = vmatpush2.msra.mxu0 %v420_v24  ;;  %684 = vmatpush2.msra.mxu1 %v548_v25  ;;  %v409_v34 = vld [vmem:[#allocation8 + $0x368] sm:$0xff]  ;;  %v408_v36 = vld [vmem:[#allocation8 + $0x360] sm:$0xff]  ;;  %v131_v21 = vshrl.u32 %v130_v20, 7  ;;  %v128_v24 = vld [vmem:[#allocation7] sm:$0xf] }
  0x7a   :  { %614 = vmatprep.subr.mxu0 %v417_v26  ;;  %685 = vmatprep.subr.mxu1 %v545_v27  ;;  %v537_v35 = vld [vmem:[#allocation8 + $0x768] sm:$0xff]  ;;  %v536_v37 = vld [vmem:[#allocation8 + $0x760] sm:$0xff]  ;;  %v450_v20 = vld [vmem:[#allocation8 + $0x4b0] sm:$0xff] }
  0x7b   :  { %615 = vmatpush2.msra.mxu0 %v416_v28  ;;  %686 = vmatpush2.msra.mxu1 %v544_v29  ;;  %v405_v38 = vld [vmem:[#allocation8 + $0x348] sm:$0xff]  ;;  %v404_v40 = vld [vmem:[#allocation8 + $0x340] sm:$0xff]  ;;  %v1986_v22 = vsub.s32 2, %v131_v21  ;;  %v1988_v23 = vsub.s32 0, %v131_v21  ;;  %v1990_v25 = vsub.s32 1, %v131_v21  ;;  %v1992_v26 = vsub.s32 3, %v131_v21 }
  0x7c   :  { %616 = vmatprep.subr.mxu0 %v413_v30  ;;  %687 = vmatprep.subr.mxu1 %v541_v31  ;;  %v533_v39 = vld [vmem:[#allocation8 + $0x748] sm:$0xff]  ;;  %v532_v41 = vld [vmem:[#allocation8 + $0x740] sm:$0xff]  ;;  %v319_v21 = vld [vmem:[#allocation8 + $0x98] sm:$0xff] }
  0x7d   :  { %617 = vmatpush2.msra.mxu0 %v412_v32  ;;  %688 = vmatpush2.msra.mxu1 %v540_v33  ;;  %v401_v42 = vld [vmem:[#allocation8 + $0x328] sm:$0xff]  ;;  %v400_v44 = vld [vmem:[#allocation8 + $0x320] sm:$0xff]  ;;  %v141_v27 = vrot.slane %v128_v24, %v1986_v22  ;;  %v133_v28 = vrot.slane %v128_v24, %v1988_v23  ;;  %v137_v29 = vrot.slane %v128_v24, %v1990_v25 }
  0x7e   :  { %618 = vmatprep.subr.mxu0 %v409_v34  ;;  %689 = vmatprep.subr.mxu1 %v537_v35  ;;  %v529_v43 = vld [vmem:[#allocation8 + $0x728] sm:$0xff]  ;;  %v528_v45 = vld [vmem:[#allocation8 + $0x720] sm:$0xff]  ;;  %v145_v30 = vrot.slane %v128_v24, %v1992_v26  ;;  %v447_v24 = vld [vmem:[#allocation8 + $0x498] sm:$0xff] }
  0x7f   :  { %619 = vmatpush2.msra.mxu0 %v408_v36  ;;  %690 = vmatpush2.msra.mxu1 %v536_v37  ;;  %v397_v46 = vld [vmem:[#allocation8 + $0x308] sm:$0xff]  ;;  %v396_v48 = vld [vmem:[#allocation8 + $0x300] sm:$0xff] }
  0x80   :  { %620 = vmatprep.subr.mxu0 %v405_v38  ;;  %691 = vmatprep.subr.mxu1 %v533_v39  ;;  %v525_v47 = vld [vmem:[#allocation8 + $0x708] sm:$0xff]  ;;  %v524_v49 = vld [vmem:[#allocation8 + $0x700] sm:$0xff] }
  0x81   :  { %621 = vmatpush2.msra.mxu0 %v404_v40  ;;  %692 = vmatpush2.msra.mxu1 %v532_v41  ;;  %v393_v50 = vld [vmem:[#allocation8 + $0x2e8] sm:$0xff]  ;;  %v392_v52 = vld [vmem:[#allocation8 + $0x2e0] sm:$0xff] }
  0x82   :  { %622 = vmatprep.subr.mxu0 %v401_v42  ;;  %693 = vmatprep.subr.mxu1 %v529_v43  ;;  %v521_v51 = vld [vmem:[#allocation8 + $0x6e8] sm:$0xff]  ;;  %v520_v53 = vld [vmem:[#allocation8 + $0x6e0] sm:$0xff]  ;;  %v362_v43 = vld [vmem:[#allocation8 + $0x1f0] sm:$0xff] }
  0x83   :  { %623 = vmatpush2.msra.mxu0 %v400_v44  ;;  %694 = vmatpush2.msra.mxu1 %v528_v45  ;;  %v389_v54 = vld [vmem:[#allocation8 + $0x2c8] sm:$0xff]  ;;  %v388_v56 = vld [vmem:[#allocation8 + $0x2c0] sm:$0xff]  ;;  %v490_v44 = vld [vmem:[#allocation8 + $0x5f0] sm:$0xff] }
  0x84   :  { %624 = vmatprep.subr.mxu0 %v397_v46  ;;  %695 = vmatprep.subr.mxu1 %v525_v47  ;;  %v517_v55 = vld [vmem:[#allocation8 + $0x6c8] sm:$0xff]  ;;  %v516_v57 = vld [vmem:[#allocation8 + $0x6c0] sm:$0xff]  ;;  %v359_v45 = vld [vmem:[#allocation8 + $0x1d8] sm:$0xff] }
  0x85   :  { %625 = vmatpush2.msra.mxu0 %v396_v48  ;;  %696 = vmatpush2.msra.mxu1 %v524_v49  ;;  %v385_v58 = vld [vmem:[#allocation8 + $0x2a8] sm:$0xff]  ;;  %v384_v60 = vld [vmem:[#allocation8 + $0x2a0] sm:$0xff]  ;;  %v487_v46 = vld [vmem:[#allocation8 + $0x5d8] sm:$0xff] }
  0x86   :  { %626 = vmatprep.subr.mxu0 %v393_v50  ;;  %697 = vmatprep.subr.mxu1 %v521_v51  ;;  %v513_v59 = vld [vmem:[#allocation8 + $0x6a8] sm:$0xff]  ;;  %v512_v61 = vld [vmem:[#allocation8 + $0x6a0] sm:$0xff]  ;;  %v358_v47 = vld [vmem:[#allocation8 + $0x1d0] sm:$0xff] }
  0x87   :  { %627 = vmatpush2.msra.mxu0 %v392_v52  ;;  %698 = vmatpush2.msra.mxu1 %v520_v53  ;;  %v381_v62 = vld [vmem:[#allocation8 + $0x288] sm:$0xff]  ;;  %v380_v0 = vld [vmem:[#allocation8 + $0x280] sm:$0xff]  ;;  %v486_v48 = vld [vmem:[#allocation8 + $0x5d0] sm:$0xff] }
  0x88   :  { %628 = vmatprep.subr.mxu0 %v389_v54  ;;  %699 = vmatprep.subr.mxu1 %v517_v55  ;;  %v509_v63 = vld [vmem:[#allocation8 + $0x688] sm:$0xff]  ;;  %v508_v1 = vld [vmem:[#allocation8 + $0x680] sm:$0xff]  ;;  %v355_v49 = vld [vmem:[#allocation8 + $0x1b8] sm:$0xff] }
  0x89   :  { %629 = vmatpush2.msra.mxu0 %v388_v56  ;;  %700 = vmatpush2.msra.mxu1 %v516_v57  ;;  %v377_v2 = vld [vmem:[#allocation8 + $0x268] sm:$0xff]  ;;  %v376_v4 = vld [vmem:[#allocation8 + $0x260] sm:$0xff]  ;;  %v483_v50 = vld [vmem:[#allocation8 + $0x5b8] sm:$0xff] }
  0x8a   :  { %630 = vmatprep.subr.mxu0 %v385_v58  ;;  %701 = vmatprep.subr.mxu1 %v513_v59  ;;  %v505_v3 = vld [vmem:[#allocation8 + $0x668] sm:$0xff]  ;;  %v504_v5 = vld [vmem:[#allocation8 + $0x660] sm:$0xff]  ;;  %v354_v51 = vld [vmem:[#allocation8 + $0x1b0] sm:$0xff] }
  0x8b   :  { %631 = vmatpush2.msra.mxu0 %v384_v60  ;;  %702 = vmatpush2.msra.mxu1 %v512_v61  ;;  %v373_v6 = vld [vmem:[#allocation8 + $0x248] sm:$0xff]  ;;  %v372_v8 = vld [vmem:[#allocation8 + $0x240] sm:$0xff]  ;;  %v482_v52 = vld [vmem:[#allocation8 + $0x5b0] sm:$0xff] }
  0x8c   :  { %632 = vmatprep.subr.mxu0 %v381_v62  ;;  %703 = vmatprep.subr.mxu1 %v509_v63  ;;  %v501_v7 = vld [vmem:[#allocation8 + $0x648] sm:$0xff]  ;;  %v500_v9 = vld [vmem:[#allocation8 + $0x640] sm:$0xff]  ;;  %v351_v53 = vld [vmem:[#allocation8 + $0x198] sm:$0xff] }
  0x8d   :  { %633 = vmatpush2.msra.mxu0 %v380_v0  ;;  %704 = vmatpush2.msra.mxu1 %v508_v1  ;;  %v369_v10 = vld [vmem:[#allocation8 + $0x228] sm:$0xff]  ;;  %v368_v12 = vld [vmem:[#allocation8 + $0x220] sm:$0xff]  ;;  %v479_v54 = vld [vmem:[#allocation8 + $0x598] sm:$0xff] }
  0x8e   :  { %634 = vmatprep.subr.mxu0 %v377_v2  ;;  %705 = vmatprep.subr.mxu1 %v505_v3  ;;  %v497_v11 = vld [vmem:[#allocation8 + $0x628] sm:$0xff]  ;;  %v496_v13 = vld [vmem:[#allocation8 + $0x620] sm:$0xff]  ;;  %v350_v55 = vld [vmem:[#allocation8 + $0x190] sm:$0xff] }
  0x8f   :  { %635 = vmatpush2.msra.mxu0 %v376_v4  ;;  %706 = vmatpush2.msra.mxu1 %v504_v5  ;;  %v365_v14 = vld [vmem:[#allocation8 + $0x208] sm:$0xff]  ;;  %v364_v16 = vld [vmem:[#allocation8 + $0x200] sm:$0xff]  ;;  %v478_v56 = vld [vmem:[#allocation8 + $0x590] sm:$0xff] }
  0x90   :  { %636 = vmatprep.subr.mxu0 %v373_v6  ;;  %707 = vmatprep.subr.mxu1 %v501_v7  ;;  %v493_v15 = vld [vmem:[#allocation8 + $0x608] sm:$0xff]  ;;  %v492_v17 = vld [vmem:[#allocation8 + $0x600] sm:$0xff]  ;;  %v347_v57 = vld [vmem:[#allocation8 + $0x178] sm:$0xff] }
  0x91   :  { %637 = vmatpush2.msra.mxu0 %v372_v8  ;;  %708 = vmatpush2.msra.mxu1 %v500_v9  ;;  %v475_v58 = vld [vmem:[#allocation8 + $0x578] sm:$0xff]  ;;  %v346_v59 = vld [vmem:[#allocation8 + $0x170] sm:$0xff] }
  0x92   :  { %638 = vmatprep.subr.mxu0 %v369_v10  ;;  %709 = vmatprep.subr.mxu1 %v497_v11  ;;  %v474_v60 = vld [vmem:[#allocation8 + $0x570] sm:$0xff]  ;;  %v343_v61 = vld [vmem:[#allocation8 + $0x158] sm:$0xff] }
  0x93   :  { %639 = vmatpush2.msra.mxu0 %v368_v12  ;;  %710 = vmatpush2.msra.mxu1 %v496_v13  ;;  %v471_v62 = vld [vmem:[#allocation8 + $0x558] sm:$0xff]  ;;  %v342_v63 = vld [vmem:[#allocation8 + $0x150] sm:$0xff] }
  0x94   :  { %640 = vmatprep.subr.mxu0 %v365_v14  ;;  %711 = vmatprep.subr.mxu1 %v493_v15  ;;  %v470_v0 = vld [vmem:[#allocation8 + $0x550] sm:$0xff]  ;;  %v339_v1 = vld [vmem:[#allocation8 + $0x138] sm:$0xff] }
  0x95   :  { %641 = vmatpush2.msra.mxu0 %v364_v16  ;;  %712 = vmatpush2.msra.mxu1 %v492_v17  ;;  %v467_v2 = vld [vmem:[#allocation8 + $0x538] sm:$0xff]  ;;  %v338_v3 = vld [vmem:[#allocation8 + $0x130] sm:$0xff] }
  0x96   :  { %720 = vmatprep.subr.mxu0 %v363_v18  ;;  %791 = vmatprep.subr.mxu1 %v491_v19  ;;  %v466_v4 = vld [vmem:[#allocation8 + $0x530] sm:$0xff]  ;;  %v335_v5 = vld [vmem:[#allocation8 + $0x118] sm:$0xff] }
  0x97   :  { %v463_v6 = vld [vmem:[#allocation8 + $0x518] sm:$0xff]  ;;  %v334_v7 = vld [vmem:[#allocation8 + $0x110] sm:$0xff] }
  0x98   :  { %v462_v8 = vld [vmem:[#allocation8 + $0x510] sm:$0xff]  ;;  %v331_v9 = vld [vmem:[#allocation8 + $0xf8] sm:$0xff] }
  0x99   :  { %v459_v10 = vld [vmem:[#allocation8 + $0x4f8] sm:$0xff]  ;;  %v330_v11 = vld [vmem:[#allocation8 + $0xf0] sm:$0xff] }
  0x9a   :  { %v458_v12 = vld [vmem:[#allocation8 + $0x4f0] sm:$0xff]  ;;  %v327_v13 = vld [vmem:[#allocation8 + $0xd8] sm:$0xff] }
  0x9b   :  { %v455_v14 = vld [vmem:[#allocation8 + $0x4d8] sm:$0xff]  ;;  %v326_v15 = vld [vmem:[#allocation8 + $0xd0] sm:$0xff] }
  0x9c   :  { %v454_v16 = vld [vmem:[#allocation8 + $0x4d0] sm:$0xff]  ;;  %v323_v17 = vld [vmem:[#allocation8 + $0xb8] sm:$0xff] }
  0x9d   :  { %v451_v18 = vld [vmem:[#allocation8 + $0x4b8] sm:$0xff]  ;;  %v322_v19 = vld [vmem:[#allocation8 + $0xb0] sm:$0xff] }
 0x115   :  { %v220_v31 = vpop.f32.mrf.mxu0  ;;  %v291_v32 = vpop.f32.mrf.mxu1 }
 0x116   :  { %v1998_v33 = vadd.f32 %v291_v32, %v141_v27  ;;  %v2000_v34 = vadd.f32 %v220_v31, %v133_v28  ;;  %v318_v27 = vld [vmem:[#allocation8 + $0x90] sm:$0xff] }
 0x117   :  { %v222_v35 = vpop.f32.mrf.mxu0  ;;  %v293_v36 = vpop.f32.mrf.mxu1  ;;  %v446_v28 = vld [vmem:[#allocation8 + $0x490] sm:$0xff] }
 0x118   :  { %v223_v37 = vadd.f32 %v222_v35, %v137_v29  ;;  %v294_v38 = vadd.f32 %v293_v36, %v145_v30  ;;  %v298_v39 = vmax.f32 %v1998_v33, 0.0  ;;  %v296_v42 = vmax.f32 %v2000_v34, 0.0  ;;  %v315_v29 = vld [vmem:[#allocation8 + $0x78] sm:$0xff]  ;;  %v314_v31 = vld [vmem:[#allocation8 + $0x70] sm:$0xff]  ;;  %v1055_v34 = vld [vmem:[#allocation10 + $0x5e8] sm:$0xff] }
 0x119   :  { %v443_v30 = vld [vmem:[#allocation8 + $0x478] sm:$0xff]  ;;  %v442_v32 = vld [vmem:[#allocation8 + $0x470] sm:$0xff]  ;;  %v1054_v33 = vld [vmem:[#allocation10 + $0x5e0] sm:$0xff] }
 0x11a   :  { %v297_v40 = vmax.f32 %v223_v37, 0.0  ;;  %v299_v41 = vmax.f32 %v294_v38, 0.0  ;;  %v311_v35 = vld [vmem:[#allocation8 + $0x58] sm:$0xff]  ;;  %v310_v37 = vld [vmem:[#allocation8 + $0x50] sm:$0xff] }
 0x11b   :  { %v439_v36 = vld [vmem:[#allocation8 + $0x458] sm:$0xff]  ;;  %v438_v38 = vld [vmem:[#allocation8 + $0x450] sm:$0xff] }
 0x11c   :  { %642 = vmatprep.mubr.f32.mxu0 %v297_v40  ;;  %713 = vmatprep.mubr.f32.mxu1 %v299_v41 }
 0x11d   :  { %643 = vmatmul.mubr.f32.vlgmr.msra.gmra.mxu0 %v296_v42  ;;  %714 = vmatmul.mubr.f32.vlgmr.msra.gmra.mxu1 %v298_v39 }
 0x11e   :  { %721 = vmatpush1.msra.mxu0 %v362_v43  ;;  %792 = vmatpush1.msra.mxu1 %v490_v44  ;;  %v306_v43 = vld [vmem:[#allocation8 + $0x30] sm:$0xff] }
 0x11f   :  { %722 = vmatprep.subr.mxu0 %v359_v45  ;;  %784 = vmatprep.mubr.f32.mxu0 %v297_v40  ;;  %v307_v40 = vld [vmem:[#allocation8 + $0x38] sm:$0xff]  ;;  %v434_v44 = vld [vmem:[#allocation8 + $0x430] sm:$0xff] }
 0x120   :  { %793 = vmatprep.subr.mxu1 %v487_v46  ;;  %855 = vmatprep.mubr.f32.mxu1 %v299_v41  ;;  %v435_v41 = vld [vmem:[#allocation8 + $0x438] sm:$0xff] }
 0x121   :  { %723 = vmatpush1.msra.mxu0 %v358_v47  ;;  %794 = vmatpush1.msra.mxu1 %v486_v48  ;;  %v303_v45 = vld [vmem:[#allocation8 + $0x18] sm:$0xff]  ;;  %v302_v47 = vld [vmem:[#allocation8 + $0x10] sm:$0xff] }
 0x122   :  { %724 = vmatprep.subr.mxu0 %v355_v49  ;;  %795 = vmatprep.subr.mxu1 %v483_v50  ;;  %v431_v46 = vld [vmem:[#allocation8 + $0x418] sm:$0xff]  ;;  %v430_v48 = vld [vmem:[#allocation8 + $0x410] sm:$0xff] }
 0x123   :  { %725 = vmatpush1.msra.mxu0 %v354_v51  ;;  %796 = vmatpush1.msra.mxu1 %v482_v52  ;;  %v427_v49 = vld [vmem:[#allocation8 + $0x3f8] sm:$0xff]  ;;  %v426_v51 = vld [vmem:[#allocation8 + $0x3f0] sm:$0xff] }
 0x124   :  { %726 = vmatprep.subr.mxu0 %v351_v53  ;;  %797 = vmatprep.subr.mxu1 %v479_v54  ;;  %v555_v50 = vld [vmem:[#allocation8 + $0x7f8] sm:$0xff]  ;;  %v554_v52 = vld [vmem:[#allocation8 + $0x7f0] sm:$0xff] }
 0x125   :  { %727 = vmatpush1.msra.mxu0 %v350_v55  ;;  %798 = vmatpush1.msra.mxu1 %v478_v56  ;;  %v423_v53 = vld [vmem:[#allocation8 + $0x3d8] sm:$0xff]  ;;  %v422_v55 = vld [vmem:[#allocation8 + $0x3d0] sm:$0xff] }
 0x126   :  { %728 = vmatprep.subr.mxu0 %v347_v57  ;;  %799 = vmatprep.subr.mxu1 %v475_v58  ;;  %v551_v54 = vld [vmem:[#allocation8 + $0x7d8] sm:$0xff]  ;;  %v550_v56 = vld [vmem:[#allocation8 + $0x7d0] sm:$0xff] }
 0x127   :  { %729 = vmatpush1.msra.mxu0 %v346_v59  ;;  %800 = vmatpush1.msra.mxu1 %v474_v60  ;;  %v419_v57 = vld [vmem:[#allocation8 + $0x3b8] sm:$0xff]  ;;  %v418_v59 = vld [vmem:[#allocation8 + $0x3b0] sm:$0xff] }
 0x128   :  { %730 = vmatprep.subr.mxu0 %v343_v61  ;;  %801 = vmatprep.subr.mxu1 %v471_v62  ;;  %v547_v58 = vld [vmem:[#allocation8 + $0x7b8] sm:$0xff]  ;;  %v546_v60 = vld [vmem:[#allocation8 + $0x7b0] sm:$0xff] }
 0x129   :  { %731 = vmatpush1.msra.mxu0 %v342_v63  ;;  %802 = vmatpush1.msra.mxu1 %v470_v0  ;;  %v415_v61 = vld [vmem:[#allocation8 + $0x398] sm:$0xff]  ;;  %v414_v63 = vld [vmem:[#allocation8 + $0x390] sm:$0xff] }
 0x12a   :  { %732 = vmatprep.subr.mxu0 %v339_v1  ;;  %803 = vmatprep.subr.mxu1 %v467_v2  ;;  %v543_v62 = vld [vmem:[#allocation8 + $0x798] sm:$0xff]  ;;  %v542_v0 = vld [vmem:[#allocation8 + $0x790] sm:$0xff] }
 0x12b   :  { %733 = vmatpush1.msra.mxu0 %v338_v3  ;;  %804 = vmatpush1.msra.mxu1 %v466_v4  ;;  %v411_v1 = vld [vmem:[#allocation8 + $0x378] sm:$0xff]  ;;  %v410_v3 = vld [vmem:[#allocation8 + $0x370] sm:$0xff] }
 0x12c   :  { %734 = vmatprep.subr.mxu0 %v335_v5  ;;  %805 = vmatprep.subr.mxu1 %v463_v6  ;;  %v539_v2 = vld [vmem:[#allocation8 + $0x778] sm:$0xff]  ;;  %v538_v4 = vld [vmem:[#allocation8 + $0x770] sm:$0xff] }
 0x12d   :  { %735 = vmatpush1.msra.mxu0 %v334_v7  ;;  %806 = vmatpush1.msra.mxu1 %v462_v8  ;;  %v407_v5 = vld [vmem:[#allocation8 + $0x358] sm:$0xff]  ;;  %v406_v7 = vld [vmem:[#allocation8 + $0x350] sm:$0xff] }
 0x12e   :  { %736 = vmatprep.subr.mxu0 %v331_v9  ;;  %807 = vmatprep.subr.mxu1 %v459_v10  ;;  %v535_v6 = vld [vmem:[#allocation8 + $0x758] sm:$0xff]  ;;  %v534_v8 = vld [vmem:[#allocation8 + $0x750] sm:$0xff] }
 0x12f   :  { %737 = vmatpush1.msra.mxu0 %v330_v11  ;;  %808 = vmatpush1.msra.mxu1 %v458_v12  ;;  %v403_v9 = vld [vmem:[#allocation8 + $0x338] sm:$0xff]  ;;  %v402_v11 = vld [vmem:[#allocation8 + $0x330] sm:$0xff] }
 0x130   :  { %738 = vmatprep.subr.mxu0 %v327_v13  ;;  %809 = vmatprep.subr.mxu1 %v455_v14  ;;  %v531_v10 = vld [vmem:[#allocation8 + $0x738] sm:$0xff]  ;;  %v530_v12 = vld [vmem:[#allocation8 + $0x730] sm:$0xff] }
 0x131   :  { %739 = vmatpush1.msra.mxu0 %v326_v15  ;;  %810 = vmatpush1.msra.mxu1 %v454_v16  ;;  %v399_v13 = vld [vmem:[#allocation8 + $0x318] sm:$0xff]  ;;  %v398_v15 = vld [vmem:[#allocation8 + $0x310] sm:$0xff] }
 0x132   :  { %740 = vmatprep.subr.mxu0 %v323_v17  ;;  %811 = vmatprep.subr.mxu1 %v451_v18  ;;  %v527_v14 = vld [vmem:[#allocation8 + $0x718] sm:$0xff]  ;;  %v526_v16 = vld [vmem:[#allocation8 + $0x710] sm:$0xff] }
 0x133   :  { %741 = vmatpush1.msra.mxu0 %v322_v19  ;;  %812 = vmatpush1.msra.mxu1 %v450_v20  ;;  %v395_v17 = vld [vmem:[#allocation8 + $0x2f8] sm:$0xff]  ;;  %v394_v19 = vld [vmem:[#allocation8 + $0x2f0] sm:$0xff] }
 0x134   :  { %742 = vmatprep.subr.mxu0 %v319_v21  ;;  %813 = vmatprep.subr.mxu1 %v447_v24  ;;  %v523_v18 = vld [vmem:[#allocation8 + $0x6f8] sm:$0xff]  ;;  %v522_v20 = vld [vmem:[#allocation8 + $0x6f0] sm:$0xff] }
 0x135   :  { %743 = vmatpush1.msra.mxu0 %v318_v27  ;;  %814 = vmatpush1.msra.mxu1 %v446_v28  ;;  %v391_v21 = vld [vmem:[#allocation8 + $0x2d8] sm:$0xff]  ;;  %v390_v27 = vld [vmem:[#allocation8 + $0x2d0] sm:$0xff] }
 0x136   :  { %744 = vmatprep.subr.mxu0 %v315_v29  ;;  %815 = vmatprep.subr.mxu1 %v443_v30  ;;  %v519_v24 = vld [vmem:[#allocation8 + $0x6d8] sm:$0xff]  ;;  %v518_v28 = vld [vmem:[#allocation8 + $0x6d0] sm:$0xff] }
 0x137   :  { %745 = vmatpush1.msra.mxu0 %v314_v31  ;;  %816 = vmatpush1.msra.mxu1 %v442_v32  ;;  %v387_v29 = vld [vmem:[#allocation8 + $0x2b8] sm:$0xff]  ;;  %v386_v31 = vld [vmem:[#allocation8 + $0x2b0] sm:$0xff] }
 0x138   :  { %746 = vmatprep.subr.mxu0 %v311_v35  ;;  %817 = vmatprep.subr.mxu1 %v439_v36  ;;  %v515_v30 = vld [vmem:[#allocation8 + $0x6b8] sm:$0xff]  ;;  %v514_v32 = vld [vmem:[#allocation8 + $0x6b0] sm:$0xff] }
 0x139   :  { %747 = vmatpush1.msra.mxu0 %v310_v37  ;;  %818 = vmatpush1.msra.mxu1 %v438_v38  ;;  %v383_v35 = vld [vmem:[#allocation8 + $0x298] sm:$0xff]  ;;  %v382_v37 = vld [vmem:[#allocation8 + $0x290] sm:$0xff] }
 0x13a   :  { %748 = vmatprep.subr.mxu0 %v307_v40  ;;  %819 = vmatprep.subr.mxu1 %v435_v41  ;;  %v511_v36 = vld [vmem:[#allocation8 + $0x698] sm:$0xff]  ;;  %v510_v38 = vld [vmem:[#allocation8 + $0x690] sm:$0xff] }
 0x13b   :  { %749 = vmatpush1.msra.mxu0 %v306_v43  ;;  %820 = vmatpush1.msra.mxu1 %v434_v44  ;;  %v379_v40 = vld [vmem:[#allocation8 + $0x278] sm:$0xff]  ;;  %v378_v43 = vld [vmem:[#allocation8 + $0x270] sm:$0xff] }
 0x13c   :  { %750 = vmatprep.subr.mxu0 %v303_v45  ;;  %821 = vmatprep.subr.mxu1 %v431_v46  ;;  %v507_v41 = vld [vmem:[#allocation8 + $0x678] sm:$0xff]  ;;  %v506_v44 = vld [vmem:[#allocation8 + $0x670] sm:$0xff] }
 0x13d   :  { %751 = vmatpush1.msra.mxu0 %v302_v47  ;;  %822 = vmatpush1.msra.mxu1 %v430_v48  ;;  %v375_v45 = vld [vmem:[#allocation8 + $0x258] sm:$0xff]  ;;  %v374_v47 = vld [vmem:[#allocation8 + $0x250] sm:$0xff] }
 0x13e   :  { %752 = vmatprep.subr.mxu0 %v427_v49  ;;  %823 = vmatprep.subr.mxu1 %v555_v50  ;;  %v503_v46 = vld [vmem:[#allocation8 + $0x658] sm:$0xff]  ;;  %v502_v48 = vld [vmem:[#allocation8 + $0x650] sm:$0xff] }
 0x13f   :  { %753 = vmatpush2.msra.mxu0 %v426_v51  ;;  %824 = vmatpush2.msra.mxu1 %v554_v52  ;;  %v371_v49 = vld [vmem:[#allocation8 + $0x238] sm:$0xff]  ;;  %v370_v51 = vld [vmem:[#allocation8 + $0x230] sm:$0xff] }
 0x140   :  { %754 = vmatprep.subr.mxu0 %v423_v53  ;;  %825 = vmatprep.subr.mxu1 %v551_v54  ;;  %v499_v50 = vld [vmem:[#allocation8 + $0x638] sm:$0xff]  ;;  %v498_v52 = vld [vmem:[#allocation8 + $0x630] sm:$0xff] }
 0x141   :  { %755 = vmatpush2.msra.mxu0 %v422_v55  ;;  %826 = vmatpush2.msra.mxu1 %v550_v56  ;;  %v367_v53 = vld [vmem:[#allocation8 + $0x218] sm:$0xff]  ;;  %v366_v55 = vld [vmem:[#allocation8 + $0x210] sm:$0xff] }
 0x142   :  { %756 = vmatprep.subr.mxu0 %v419_v57  ;;  %827 = vmatprep.subr.mxu1 %v547_v58  ;;  %v495_v54 = vld [vmem:[#allocation8 + $0x618] sm:$0xff]  ;;  %v494_v56 = vld [vmem:[#allocation8 + $0x610] sm:$0xff]  ;;  %v927_v57 = vld [vmem:[#allocation10 + $0x1e8] sm:$0xff] }
 0x143   :  { %757 = vmatpush2.msra.mxu0 %v418_v59  ;;  %828 = vmatpush2.msra.mxu1 %v546_v60  ;;  %v926_v58 = vld [vmem:[#allocation10 + $0x1e0] sm:$0xff]  ;;  %v923_v59 = vld [vmem:[#allocation10 + $0x1c8] sm:$0xff] }
 0x144   :  { %758 = vmatprep.subr.mxu0 %v415_v61  ;;  %829 = vmatprep.subr.mxu1 %v543_v62  ;;  %v922_v60 = vld [vmem:[#allocation10 + $0x1c0] sm:$0xff]  ;;  %v919_v61 = vld [vmem:[#allocation10 + $0x1a8] sm:$0xff] }
 0x145   :  { %759 = vmatpush2.msra.mxu0 %v414_v63  ;;  %830 = vmatpush2.msra.mxu1 %v542_v0  ;;  %v918_v62 = vld [vmem:[#allocation10 + $0x1a0] sm:$0xff]  ;;  %v915_v63 = vld [vmem:[#allocation10 + $0x188] sm:$0xff] }
 0x146   :  { %760 = vmatprep.subr.mxu0 %v411_v1  ;;  %831 = vmatprep.subr.mxu1 %v539_v2  ;;  %v914_v0 = vld [vmem:[#allocation10 + $0x180] sm:$0xff]  ;;  %v911_v1 = vld [vmem:[#allocation10 + $0x168] sm:$0xff] }
 0x147   :  { %761 = vmatpush2.msra.mxu0 %v410_v3  ;;  %832 = vmatpush2.msra.mxu1 %v538_v4  ;;  %v910_v2 = vld [vmem:[#allocation10 + $0x160] sm:$0xff]  ;;  %v1051_v3 = vld [vmem:[#allocation10 + $0x5c8] sm:$0xff] }
 0x148   :  { %762 = vmatprep.subr.mxu0 %v407_v5  ;;  %833 = vmatprep.subr.mxu1 %v535_v6  ;;  %v903_v4 = vld [vmem:[#allocation10 + $0x128] sm:$0xff]  ;;  %v1050_v5 = vld [vmem:[#allocation10 + $0x5c0] sm:$0xff] }
 0x149   :  { %763 = vmatpush2.msra.mxu0 %v406_v7  ;;  %834 = vmatpush2.msra.mxu1 %v534_v8  ;;  %v902_v6 = vld [vmem:[#allocation10 + $0x120] sm:$0xff]  ;;  %v1047_v7 = vld [vmem:[#allocation10 + $0x5a8] sm:$0xff] }
 0x14a   :  { %764 = vmatprep.subr.mxu0 %v403_v9  ;;  %835 = vmatprep.subr.mxu1 %v531_v10  ;;  %v899_v8 = vld [vmem:[#allocation10 + $0x108] sm:$0xff]  ;;  %v1046_v9 = vld [vmem:[#allocation10 + $0x5a0] sm:$0xff] }
 0x14b   :  { %765 = vmatpush2.msra.mxu0 %v402_v11  ;;  %836 = vmatpush2.msra.mxu1 %v530_v12  ;;  %v898_v10 = vld [vmem:[#allocation10 + $0x100] sm:$0xff]  ;;  %v1043_v11 = vld [vmem:[#allocation10 + $0x588] sm:$0xff] }
 0x14c   :  { %766 = vmatprep.subr.mxu0 %v399_v13  ;;  %837 = vmatprep.subr.mxu1 %v527_v14  ;;  %v895_v12 = vld [vmem:[#allocation10 + $0xe8] sm:$0xff]  ;;  %v1042_v13 = vld [vmem:[#allocation10 + $0x580] sm:$0xff] }
 0x14d   :  { %767 = vmatpush2.msra.mxu0 %v398_v15  ;;  %838 = vmatpush2.msra.mxu1 %v526_v16  ;;  %v894_v14 = vld [vmem:[#allocation10 + $0xe0] sm:$0xff]  ;;  %v1039_v15 = vld [vmem:[#allocation10 + $0x568] sm:$0xff] }
 0x14e   :  { %768 = vmatprep.subr.mxu0 %v395_v17  ;;  %839 = vmatprep.subr.mxu1 %v523_v18  ;;  %v891_v16 = vld [vmem:[#allocation10 + $0xc8] sm:$0xff]  ;;  %v1038_v17 = vld [vmem:[#allocation10 + $0x560] sm:$0xff] }
 0x14f   :  { %769 = vmatpush2.msra.mxu0 %v394_v19  ;;  %840 = vmatpush2.msra.mxu1 %v522_v20  ;;  %v890_v18 = vld [vmem:[#allocation10 + $0xc0] sm:$0xff]  ;;  %v1035_v19 = vld [vmem:[#allocation10 + $0x548] sm:$0xff] }
 0x150   :  { %770 = vmatprep.subr.mxu0 %v391_v21  ;;  %841 = vmatprep.subr.mxu1 %v519_v24  ;;  %v887_v20 = vld [vmem:[#allocation10 + $0xa8] sm:$0xff]  ;;  %v1034_v21 = vld [vmem:[#allocation10 + $0x540] sm:$0xff] }
 0x151   :  { %771 = vmatpush2.msra.mxu0 %v390_v27  ;;  %842 = vmatpush2.msra.mxu1 %v518_v28  ;;  %v886_v24 = vld [vmem:[#allocation10 + $0xa0] sm:$0xff]  ;;  %v1031_v27 = vld [vmem:[#allocation10 + $0x528] sm:$0xff] }
 0x152   :  { %772 = vmatprep.subr.mxu0 %v387_v29  ;;  %843 = vmatprep.subr.mxu1 %v515_v30  ;;  %v883_v28 = vld [vmem:[#allocation10 + $0x88] sm:$0xff]  ;;  %v1030_v29 = vld [vmem:[#allocation10 + $0x520] sm:$0xff] }
 0x153   :  { %773 = vmatpush2.msra.mxu0 %v386_v31  ;;  %844 = vmatpush2.msra.mxu1 %v514_v32  ;;  %v882_v30 = vld [vmem:[#allocation10 + $0x80] sm:$0xff]  ;;  %v1027_v31 = vld [vmem:[#allocation10 + $0x508] sm:$0xff] }
 0x154   :  { %774 = vmatprep.subr.mxu0 %v383_v35  ;;  %845 = vmatprep.subr.mxu1 %v511_v36  ;;  %v879_v32 = vld [vmem:[#allocation10 + $0x68] sm:$0xff]  ;;  %v1026_v35 = vld [vmem:[#allocation10 + $0x500] sm:$0xff] }
 0x155   :  { %775 = vmatpush2.msra.mxu0 %v382_v37  ;;  %846 = vmatpush2.msra.mxu1 %v510_v38  ;;  %v878_v36 = vld [vmem:[#allocation10 + $0x60] sm:$0xff]  ;;  %v1023_v37 = vld [vmem:[#allocation10 + $0x4e8] sm:$0xff] }
 0x156   :  { %776 = vmatprep.subr.mxu0 %v379_v40  ;;  %847 = vmatprep.subr.mxu1 %v507_v41  ;;  %v875_v38 = vld [vmem:[#allocation10 + $0x48] sm:$0xff]  ;;  %v1022_v40 = vld [vmem:[#allocation10 + $0x4e0] sm:$0xff] }
 0x157   :  { %777 = vmatpush2.msra.mxu0 %v378_v43  ;;  %848 = vmatpush2.msra.mxu1 %v506_v44  ;;  %v874_v41 = vld [vmem:[#allocation10 + $0x40] sm:$0xff]  ;;  %v1019_v43 = vld [vmem:[#allocation10 + $0x4c8] sm:$0xff] }
 0x158   :  { %778 = vmatprep.subr.mxu0 %v375_v45  ;;  %849 = vmatprep.subr.mxu1 %v503_v46  ;;  %v871_v44 = vld [vmem:[#allocation10 + $0x28] sm:$0xff]  ;;  %v1018_v45 = vld [vmem:[#allocation10 + $0x4c0] sm:$0xff] }
 0x159   :  { %779 = vmatpush2.msra.mxu0 %v374_v47  ;;  %850 = vmatpush2.msra.mxu1 %v502_v48  ;;  %v870_v46 = vld [vmem:[#allocation10 + $0x20] sm:$0xff]  ;;  %v1015_v47 = vld [vmem:[#allocation10 + $0x4a8] sm:$0xff] }
 0x15a   :  { %780 = vmatprep.subr.mxu0 %v371_v49  ;;  %851 = vmatprep.subr.mxu1 %v499_v50  ;;  %v867_v48 = vld [vmem:[#allocation10 + $0x8] sm:$0xff]  ;;  %v1014_v49 = vld [vmem:[#allocation10 + $0x4a0] sm:$0xff] }
 0x15b   :  { %781 = vmatpush2.msra.mxu0 %v370_v51  ;;  %852 = vmatpush2.msra.mxu1 %v498_v52  ;;  %v866_v50 = vld [vmem:[#allocation10] sm:$0xff]  ;;  %v1011_v51 = vld [vmem:[#allocation10 + $0x488] sm:$0xff] }
 0x15c   :  { %782 = vmatprep.subr.mxu0 %v367_v53  ;;  %853 = vmatprep.subr.mxu1 %v495_v54  ;;  %v991_v52 = vld [vmem:[#allocation10 + $0x3e8] sm:$0xff]  ;;  %v1010_v53 = vld [vmem:[#allocation10 + $0x480] sm:$0xff] }
 0x15d   :  { %783 = vmatpush2.msra.mxu0 %v366_v55  ;;  %854 = vmatpush2.msra.mxu1 %v494_v56  ;;  %v990_v54 = vld [vmem:[#allocation10 + $0x3e0] sm:$0xff]  ;;  %v1007_v55 = vld [vmem:[#allocation10 + $0x468] sm:$0xff] }
 0x15e   :  { %785 = vmatmul.mubr.f32.vlgmr.msra.gmra.mxu0 %v296_v42  ;;  %856 = vmatmul.mubr.f32.vlgmr.msra.gmra.mxu1 %v298_v39  ;;  %v907_v42 = vld [vmem:[#allocation10 + $0x148] sm:$0xff]  ;;  %v906_v39 = vld [vmem:[#allocation10 + $0x140] sm:$0xff] }
 0x15f   :  { %1144 = vmatprep.subr.mxu0 %v927_v57  ;;  %1215 = vmatprep.subr.mxu1 %v1055_v34  ;;  %v987_v56 = vld [vmem:[#allocation10 + $0x3c8] sm:$0xff]  ;;  %v1006_v57 = vld [vmem:[#allocation10 + $0x460] sm:$0xff] }
 0x160   :  { %1145 = vmatpush1.msra.mxu0 %v926_v58  ;;  %1216 = vmatpush1.msra.mxu1 %v1054_v33  ;;  %v986_v58 = vld [vmem:[#allocation10 + $0x3c0] sm:$0xff]  ;;  %v995_v34 = vld [vmem:[#allocation10 + $0x408] sm:$0xff] }
 0x161   :  { %1146 = vmatprep.subr.mxu0 %v923_v59  ;;  %1217 = vmatprep.subr.mxu1 %v1051_v3  ;;  %v1003_v59 = vld [vmem:[#allocation10 + $0x448] sm:$0xff]  ;;  %v994_v33 = vld [vmem:[#allocation10 + $0x400] sm:$0xff] }
 0x162   :  { %1147 = vmatpush1.msra.mxu0 %v922_v60  ;;  %1218 = vmatpush1.msra.mxu1 %v1050_v5  ;;  %v983_v60 = vld [vmem:[#allocation10 + $0x3a8] sm:$0xff]  ;;  %v1118_v5 = vld [vmem:[#allocation10 + $0x7e0] sm:$0xff] }
 0x163   :  { %1148 = vmatprep.subr.mxu0 %v919_v61  ;;  %1219 = vmatprep.subr.mxu1 %v1047_v7  ;;  %v1002_v61 = vld [vmem:[#allocation10 + $0x440] sm:$0xff]  ;;  %v1119_v3 = vld [vmem:[#allocation10 + $0x7e8] sm:$0xff] }
 0x164   :  { %1149 = vmatpush1.msra.mxu0 %v918_v62  ;;  %1220 = vmatpush1.msra.mxu1 %v1046_v9  ;;  %v982_v62 = vld [vmem:[#allocation10 + $0x3a0] sm:$0xff]  ;;  %v1115_v7 = vld [vmem:[#allocation10 + $0x7c8] sm:$0xff] }
 0x165   :  { %1150 = vmatprep.subr.mxu0 %v915_v63  ;;  %1221 = vmatprep.subr.mxu1 %v1043_v11  ;;  %v999_v63 = vld [vmem:[#allocation10 + $0x428] sm:$0xff]  ;;  %v1114_v9 = vld [vmem:[#allocation10 + $0x7c0] sm:$0xff] }
 0x166   :  { %1151 = vmatpush1.msra.mxu0 %v914_v0  ;;  %1222 = vmatpush1.msra.mxu1 %v1042_v13  ;;  %v979_v0 = vld [vmem:[#allocation10 + $0x388] sm:$0xff]  ;;  %v1110_v13 = vld [vmem:[#allocation10 + $0x7a0] sm:$0xff] }
 0x167   :  { %1152 = vmatprep.subr.mxu0 %v911_v1  ;;  %1223 = vmatprep.subr.mxu1 %v1039_v15  ;;  %v998_v1 = vld [vmem:[#allocation10 + $0x420] sm:$0xff]  ;;  %v1111_v11 = vld [vmem:[#allocation10 + $0x7a8] sm:$0xff] }
 0x168   :  { %1153 = vmatpush1.msra.mxu0 %v910_v2  ;;  %1224 = vmatpush1.msra.mxu1 %v1038_v17  ;;  %v978_v2 = vld [vmem:[#allocation10 + $0x380] sm:$0xff]  ;;  %v1107_v15 = vld [vmem:[#allocation10 + $0x788] sm:$0xff] }
 0x169   :  { %1154 = vmatprep.subr.mxu0 %v907_v42  ;;  %1225 = vmatprep.subr.mxu1 %v1035_v19  ;;  %v975_v42 = vld [vmem:[#allocation10 + $0x368] sm:$0xff]  ;;  %v1106_v17 = vld [vmem:[#allocation10 + $0x780] sm:$0xff] }
 0x16a   :  { %1155 = vmatpush1.msra.mxu0 %v906_v39  ;;  %1226 = vmatpush1.msra.mxu1 %v1034_v21  ;;  %v974_v39 = vld [vmem:[#allocation10 + $0x360] sm:$0xff]  ;;  %v1103_v19 = vld [vmem:[#allocation10 + $0x768] sm:$0xff] }
 0x16b   :  { %1156 = vmatprep.subr.mxu0 %v903_v4  ;;  %1227 = vmatprep.subr.mxu1 %v1031_v27  ;;  %v971_v4 = vld [vmem:[#allocation10 + $0x348] sm:$0xff]  ;;  %v1102_v21 = vld [vmem:[#allocation10 + $0x760] sm:$0xff] }
 0x16c   :  { %1157 = vmatpush1.msra.mxu0 %v902_v6  ;;  %1228 = vmatpush1.msra.mxu1 %v1030_v29  ;;  %v970_v6 = vld [vmem:[#allocation10 + $0x340] sm:$0xff]  ;;  %v1099_v27 = vld [vmem:[#allocation10 + $0x748] sm:$0xff] }
 0x16d   :  { %1158 = vmatprep.subr.mxu0 %v899_v8  ;;  %1229 = vmatprep.subr.mxu1 %v1027_v31  ;;  %v967_v8 = vld [vmem:[#allocation10 + $0x328] sm:$0xff]  ;;  %v1098_v29 = vld [vmem:[#allocation10 + $0x740] sm:$0xff] }
 0x16e   :  { %1159 = vmatpush1.msra.mxu0 %v898_v10  ;;  %1230 = vmatpush1.msra.mxu1 %v1026_v35  ;;  %v966_v10 = vld [vmem:[#allocation10 + $0x320] sm:$0xff]  ;;  %v1095_v31 = vld [vmem:[#allocation10 + $0x728] sm:$0xff] }
 0x16f   :  { %1160 = vmatprep.subr.mxu0 %v895_v12  ;;  %1231 = vmatprep.subr.mxu1 %v1023_v37  ;;  %v963_v12 = vld [vmem:[#allocation10 + $0x308] sm:$0xff]  ;;  %v1094_v35 = vld [vmem:[#allocation10 + $0x720] sm:$0xff] }
 0x170   :  { %1161 = vmatpush1.msra.mxu0 %v894_v14  ;;  %1232 = vmatpush1.msra.mxu1 %v1022_v40  ;;  %v962_v14 = vld [vmem:[#allocation10 + $0x300] sm:$0xff]  ;;  %v1091_v37 = vld [vmem:[#allocation10 + $0x708] sm:$0xff] }
 0x171   :  { %1162 = vmatprep.subr.mxu0 %v891_v16  ;;  %1233 = vmatprep.subr.mxu1 %v1019_v43  ;;  %v959_v16 = vld [vmem:[#allocation10 + $0x2e8] sm:$0xff]  ;;  %v1090_v40 = vld [vmem:[#allocation10 + $0x700] sm:$0xff] }
 0x172   :  { %1163 = vmatpush1.msra.mxu0 %v890_v18  ;;  %1234 = vmatpush1.msra.mxu1 %v1018_v45  ;;  %v958_v18 = vld [vmem:[#allocation10 + $0x2e0] sm:$0xff]  ;;  %v1087_v43 = vld [vmem:[#allocation10 + $0x6e8] sm:$0xff] }
 0x173   :  { %1164 = vmatprep.subr.mxu0 %v887_v20  ;;  %1235 = vmatprep.subr.mxu1 %v1015_v47  ;;  %v955_v20 = vld [vmem:[#allocation10 + $0x2c8] sm:$0xff]  ;;  %v1086_v45 = vld [vmem:[#allocation10 + $0x6e0] sm:$0xff] }
 0x174   :  { %1165 = vmatpush1.msra.mxu0 %v886_v24  ;;  %1236 = vmatpush1.msra.mxu1 %v1014_v49  ;;  %v954_v24 = vld [vmem:[#allocation10 + $0x2c0] sm:$0xff]  ;;  %v1083_v47 = vld [vmem:[#allocation10 + $0x6c8] sm:$0xff] }
 0x175   :  { %1166 = vmatprep.subr.mxu0 %v883_v28  ;;  %1237 = vmatprep.subr.mxu1 %v1011_v51  ;;  %v951_v28 = vld [vmem:[#allocation10 + $0x2a8] sm:$0xff]  ;;  %v1082_v49 = vld [vmem:[#allocation10 + $0x6c0] sm:$0xff] }
 0x176   :  { %1167 = vmatpush1.msra.mxu0 %v882_v30  ;;  %1238 = vmatpush1.msra.mxu1 %v1010_v53  ;;  %v950_v30 = vld [vmem:[#allocation10 + $0x2a0] sm:$0xff]  ;;  %v1079_v51 = vld [vmem:[#allocation10 + $0x6a8] sm:$0xff] }
 0x177   :  { %1168 = vmatprep.subr.mxu0 %v879_v32  ;;  %1239 = vmatprep.subr.mxu1 %v1007_v55  ;;  %v947_v32 = vld [vmem:[#allocation10 + $0x288] sm:$0xff]  ;;  %v1078_v53 = vld [vmem:[#allocation10 + $0x6a0] sm:$0xff] }
 0x178   :  { %1169 = vmatpush1.msra.mxu0 %v878_v36  ;;  %1240 = vmatpush1.msra.mxu1 %v1006_v57  ;;  %v946_v36 = vld [vmem:[#allocation10 + $0x280] sm:$0xff]  ;;  %v1075_v55 = vld [vmem:[#allocation10 + $0x688] sm:$0xff] }
 0x179   :  { %1170 = vmatprep.subr.mxu0 %v875_v38  ;;  %1241 = vmatprep.subr.mxu1 %v1003_v59  ;;  %v943_v38 = vld [vmem:[#allocation10 + $0x268] sm:$0xff]  ;;  %v1074_v57 = vld [vmem:[#allocation10 + $0x680] sm:$0xff] }
 0x17a   :  { %1171 = vmatpush1.msra.mxu0 %v874_v41  ;;  %1242 = vmatpush1.msra.mxu1 %v1002_v61  ;;  %v942_v41 = vld [vmem:[#allocation10 + $0x260] sm:$0xff] }
 0x17b   :  { %1172 = vmatprep.subr.mxu0 %v871_v44  ;;  %1243 = vmatprep.subr.mxu1 %v999_v63  ;;  %v939_v44 = vld [vmem:[#allocation10 + $0x248] sm:$0xff]  ;;  %v1070_v59 = vld [vmem:[#allocation10 + $0x660] sm:$0xff] }
 0x17c   :  { %1173 = vmatpush1.msra.mxu0 %v870_v46  ;;  %1244 = vmatpush1.msra.mxu1 %v998_v1  ;;  %v938_v46 = vld [vmem:[#allocation10 + $0x240] sm:$0xff] }
 0x17d   :  { %1174 = vmatprep.subr.mxu0 %v867_v48  ;;  %1245 = vmatprep.subr.mxu1 %v995_v34  ;;  %v935_v48 = vld [vmem:[#allocation10 + $0x228] sm:$0xff]  ;;  %v1066_v61 = vld [vmem:[#allocation10 + $0x640] sm:$0xff]  ;;  %v2015_v34 = vld [vmem:[%s2056_s4] sm:$0xf] }
 0x17e   :  { %1175 = vmatpush1.msra.mxu0 %v866_v50  ;;  %1246 = vmatpush1.msra.mxu1 %v994_v33  ;;  %v934_v50 = vld [vmem:[#allocation10 + $0x220] sm:$0xff]  ;;  %v565_v33 = vrot.slane %v2015_v34, %v1990_v25 }
 0x17f   :  { %1176 = vmatprep.subr.mxu0 %v991_v52  ;;  %1247 = vmatprep.subr.mxu1 %v1119_v3  ;;  %v931_v52 = vld [vmem:[#allocation10 + $0x208] sm:$0xff]  ;;  %v1062_v63 = vld [vmem:[#allocation10 + $0x620] sm:$0xff] }
 0x180   :  { %1177 = vmatpush2.msra.mxu0 %v990_v54  ;;  %1248 = vmatpush2.msra.mxu1 %v1118_v5  ;;  %v930_v54 = vld [vmem:[#allocation10 + $0x200] sm:$0xff] }
 0x181   :  { %1178 = vmatprep.subr.mxu0 %v987_v56  ;;  %1249 = vmatprep.subr.mxu1 %v1115_v7  ;;  %v929_v56 = vld [vmem:[#allocation10 + $0x1f8] sm:$0xff]  ;;  %v1058_v1 = vld [vmem:[#allocation10 + $0x600] sm:$0xff] }
 0x182   :  { %1179 = vmatpush2.msra.mxu0 %v986_v58  ;;  %1250 = vmatpush2.msra.mxu1 %v1114_v9  ;;  %v1071_v58 = vld [vmem:[#allocation10 + $0x668] sm:$0xff] }
 0x183   :  { %1180 = vmatprep.subr.mxu0 %v983_v60  ;;  %1251 = vmatprep.subr.mxu1 %v1111_v11  ;;  %v1067_v60 = vld [vmem:[#allocation10 + $0x648] sm:$0xff] }
 0x184   :  { %1181 = vmatpush2.msra.mxu0 %v982_v62  ;;  %1252 = vmatpush2.msra.mxu1 %v1110_v13  ;;  %v1063_v62 = vld [vmem:[#allocation10 + $0x628] sm:$0xff]  ;;  %v925_v13 = vld [vmem:[#allocation10 + $0x1d8] sm:$0xff] }
 0x185   :  { %1182 = vmatprep.subr.mxu0 %v979_v0  ;;  %1253 = vmatprep.subr.mxu1 %v1107_v15  ;;  %v1059_v0 = vld [vmem:[#allocation10 + $0x608] sm:$0xff]  ;;  %v921_v15 = vld [vmem:[#allocation10 + $0x1b8] sm:$0xff] }
 0x186   :  { %1183 = vmatpush2.msra.mxu0 %v978_v2  ;;  %1254 = vmatpush2.msra.mxu1 %v1106_v17  ;;  %v1057_v2 = vld [vmem:[#allocation10 + $0x5f8] sm:$0xff] }
 0x187   :  { %1184 = vmatprep.subr.mxu0 %v975_v42  ;;  %1255 = vmatprep.subr.mxu1 %v1103_v19  ;;  %v561_v42 = vrot.slane %v2015_v34, %v1988_v23  ;;  %v917_v17 = vld [vmem:[#allocation10 + $0x198] sm:$0xff] }
 0x188   :  { %1185 = vmatpush2.msra.mxu0 %v974_v39  ;;  %1256 = vmatpush2.msra.mxu1 %v1102_v21  ;;  %v913_v19 = vld [vmem:[#allocation10 + $0x178] sm:$0xff] }
 0x189   :  { %1186 = vmatprep.subr.mxu0 %v971_v4  ;;  %1257 = vmatprep.subr.mxu1 %v1099_v27  ;;  %v909_v21 = vld [vmem:[#allocation10 + $0x158] sm:$0xff] }
 0x18a   :  { %1187 = vmatpush2.msra.mxu0 %v970_v6  ;;  %1258 = vmatpush2.msra.mxu1 %v1098_v29  ;;  %v905_v27 = vld [vmem:[#allocation10 + $0x138] sm:$0xff] }
 0x18b   :  { %1188 = vmatprep.subr.mxu0 %v967_v8  ;;  %1259 = vmatprep.subr.mxu1 %v1095_v31  ;;  %v901_v29 = vld [vmem:[#allocation10 + $0x118] sm:$0xff] }
 0x18c   :  { %1189 = vmatpush2.msra.mxu0 %v966_v10  ;;  %1260 = vmatpush2.msra.mxu1 %v1094_v35  ;;  %v897_v31 = vld [vmem:[#allocation10 + $0xf8] sm:$0xff] }
 0x18d   :  { %1190 = vmatprep.subr.mxu0 %v963_v12  ;;  %1261 = vmatprep.subr.mxu1 %v1091_v37  ;;  %v928_v12 = vld [vmem:[#allocation10 + $0x1f0] sm:$0xff]  ;;  %v893_v35 = vld [vmem:[#allocation10 + $0xd8] sm:$0xff] }
 0x18e   :  { %1191 = vmatpush2.msra.mxu0 %v962_v14  ;;  %1262 = vmatpush2.msra.mxu1 %v1090_v40  ;;  %v924_v14 = vld [vmem:[#allocation10 + $0x1d0] sm:$0xff]  ;;  %v889_v37 = vld [vmem:[#allocation10 + $0xb8] sm:$0xff] }
 0x18f   :  { %1192 = vmatprep.subr.mxu0 %v959_v16  ;;  %1263 = vmatprep.subr.mxu1 %v1087_v43  ;;  %v920_v16 = vld [vmem:[#allocation10 + $0x1b0] sm:$0xff]  ;;  %v885_v40 = vld [vmem:[#allocation10 + $0x98] sm:$0xff] }
 0x190   :  { %1193 = vmatpush2.msra.mxu0 %v958_v18  ;;  %1264 = vmatpush2.msra.mxu1 %v1086_v45  ;;  %v916_v18 = vld [vmem:[#allocation10 + $0x190] sm:$0xff]  ;;  %v881_v43 = vld [vmem:[#allocation10 + $0x78] sm:$0xff] }
 0x191   :  { %1194 = vmatprep.subr.mxu0 %v955_v20  ;;  %1265 = vmatprep.subr.mxu1 %v1083_v47  ;;  %v912_v20 = vld [vmem:[#allocation10 + $0x170] sm:$0xff]  ;;  %v877_v45 = vld [vmem:[#allocation10 + $0x58] sm:$0xff] }
 0x192   :  { %1195 = vmatpush2.msra.mxu0 %v954_v24  ;;  %1266 = vmatpush2.msra.mxu1 %v1082_v49  ;;  %v908_v24 = vld [vmem:[#allocation10 + $0x150] sm:$0xff]  ;;  %v873_v47 = vld [vmem:[#allocation10 + $0x38] sm:$0xff] }
 0x193   :  { %1196 = vmatprep.subr.mxu0 %v951_v28  ;;  %1267 = vmatprep.subr.mxu1 %v1079_v51  ;;  %v904_v28 = vld [vmem:[#allocation10 + $0x130] sm:$0xff]  ;;  %v869_v49 = vld [vmem:[#allocation10 + $0x18] sm:$0xff] }
 0x194   :  { %1197 = vmatpush2.msra.mxu0 %v950_v30  ;;  %1268 = vmatpush2.msra.mxu1 %v1078_v53  ;;  %v900_v30 = vld [vmem:[#allocation10 + $0x110] sm:$0xff]  ;;  %v993_v51 = vld [vmem:[#allocation10 + $0x3f8] sm:$0xff] }
 0x195   :  { %1198 = vmatprep.subr.mxu0 %v947_v32  ;;  %1269 = vmatprep.subr.mxu1 %v1075_v55  ;;  %v896_v32 = vld [vmem:[#allocation10 + $0xf0] sm:$0xff]  ;;  %v989_v53 = vld [vmem:[#allocation10 + $0x3d8] sm:$0xff] }
 0x196   :  { %1199 = vmatpush2.msra.mxu0 %v946_v36  ;;  %1270 = vmatpush2.msra.mxu1 %v1074_v57  ;;  %v892_v36 = vld [vmem:[#allocation10 + $0xd0] sm:$0xff]  ;;  %v985_v55 = vld [vmem:[#allocation10 + $0x3b8] sm:$0xff] }
 0x197   :  { %1200 = vmatprep.subr.mxu0 %v943_v38  ;;  %1271 = vmatprep.subr.mxu1 %v1071_v58  ;;  %v888_v38 = vld [vmem:[#allocation10 + $0xb0] sm:$0xff]  ;;  %v981_v57 = vld [vmem:[#allocation10 + $0x398] sm:$0xff] }
 0x198   :  { %1201 = vmatpush2.msra.mxu0 %v942_v41  ;;  %1272 = vmatpush2.msra.mxu1 %v1070_v59  ;;  %v884_v41 = vld [vmem:[#allocation10 + $0x90] sm:$0xff]  ;;  %v977_v59 = vld [vmem:[#allocation10 + $0x378] sm:$0xff] }
 0x199   :  { %1202 = vmatprep.subr.mxu0 %v939_v44  ;;  %1273 = vmatprep.subr.mxu1 %v1067_v60  ;;  %v880_v44 = vld [vmem:[#allocation10 + $0x70] sm:$0xff] }
 0x19a   :  { %1203 = vmatpush2.msra.mxu0 %v938_v46  ;;  %1274 = vmatpush2.msra.mxu1 %v1066_v61  ;;  %v876_v46 = vld [vmem:[#allocation10 + $0x50] sm:$0xff]  ;;  %v973_v61 = vld [vmem:[#allocation10 + $0x358] sm:$0xff] }
 0x19b   :  { %1204 = vmatprep.subr.mxu0 %v935_v48  ;;  %1275 = vmatprep.subr.mxu1 %v1063_v62  ;;  %v872_v48 = vld [vmem:[#allocation10 + $0x30] sm:$0xff] }
 0x19c   :  { %1205 = vmatpush2.msra.mxu0 %v934_v50  ;;  %1276 = vmatpush2.msra.mxu1 %v1062_v63  ;;  %v868_v50 = vld [vmem:[#allocation10 + $0x10] sm:$0xff]  ;;  %v969_v63 = vld [vmem:[#allocation10 + $0x338] sm:$0xff] }
 0x19d   :  { %1206 = vmatprep.subr.mxu0 %v931_v52  ;;  %1277 = vmatprep.subr.mxu1 %v1059_v0  ;;  %v992_v52 = vld [vmem:[#allocation10 + $0x3f0] sm:$0xff] }
 0x19e   :  { %1207 = vmatpush2.msra.mxu0 %v930_v54  ;;  %1278 = vmatpush2.msra.mxu1 %v1058_v1  ;;  %v988_v54 = vld [vmem:[#allocation10 + $0x3d0] sm:$0xff]  ;;  %v965_v1 = vld [vmem:[#allocation10 + $0x318] sm:$0xff] }
 0x19f   :  { %1286 = vmatprep.subr.mxu0 %v929_v56  ;;  %1357 = vmatprep.subr.mxu1 %v1057_v2  ;;  %v984_v56 = vld [vmem:[#allocation10 + $0x3b0] sm:$0xff] }
 0x1a0   :  { %v980_v58 = vld [vmem:[#allocation10 + $0x390] sm:$0xff] }
 0x1a1   :  { %v976_v60 = vld [vmem:[#allocation10 + $0x370] sm:$0xff] }
 0x1a2   :  { %v972_v62 = vld [vmem:[#allocation10 + $0x350] sm:$0xff] }
 0x1a3   :  { %v968_v0 = vld [vmem:[#allocation10 + $0x330] sm:$0xff] }
 0x1a4   :  { %v964_v2 = vld [vmem:[#allocation10 + $0x310] sm:$0xff] }
 0x1dd   :  { %v644_v39 = vpop.f32.mrf.mxu0  ;;  %v715_v3 = vpop.f32.mrf.mxu1 }
 0x1de   :  { %v645_v4 = vadd.f32 %v644_v39, %v561_v42  ;;  %v961_v42 = vld [vmem:[#allocation10 + $0x2f8] sm:$0xff] }
 0x1df   :  { %v646_v5 = vpop.f32.mrf.mxu0  ;;  %v717_v8 = vpop.f32.mrf.mxu1  ;;  %v957_v39 = vld [vmem:[#allocation10 + $0x2d8] sm:$0xff] }
 0x1e0   :  { %v647_v6 = vadd.f32 %v646_v5, %v565_v33  ;;  %v2021_v7 = vadd.f32 %v715_v3, %v645_v4  ;;  %v960_v33 = vld [vmem:[#allocation10 + $0x2f0] sm:$0xff]  ;;  %v953_v4 = vld [vmem:[#allocation10 + $0x2b8] sm:$0xff] }
 0x1e1   :  { %v956_v3 = vld [vmem:[#allocation10 + $0x2d0] sm:$0xff] }
 0x1e2   :  { %v718_v9 = vadd.f32 %v717_v8, %v647_v6  ;;  %v862_v11 = vmax.f32 %v2021_v7, 0.0  ;;  %v952_v5 = vld [vmem:[#allocation10 + $0x2b0] sm:$0xff]  ;;  %v949_v6 = vld [vmem:[#allocation10 + $0x298] sm:$0xff]  ;;  %v569_v8 = vrot.slane %v2015_v34, %v1986_v22 }
 0x1e3   :  { %v1044_v7 = vld [vmem:[#allocation10 + $0x590] sm:$0xff] }
 0x1e4   :  { %v863_v10 = vmax.f32 %v718_v9, 0.0  ;;  %v948_v9 = vld [vmem:[#allocation10 + $0x290] sm:$0xff] }
 0x1e6   :  { %1208 = vmatprep.mubr.f32.mxu0 %v863_v10 }
 0x1e7   :  { %1209 = vmatmul.mubr.f32.vlgmr.msra.gmra.mxu0 %v862_v11 }
 0x1e8   :  { %1287 = vmatpush1.msra.mxu0 %v928_v12  ;;  %1350 = vmatprep.mubr.f32.mxu0 %v863_v10  ;;  %v945_v10 = vld [vmem:[#allocation10 + $0x278] sm:$0xff]  ;;  %v573_v12 = vrot.slane %v2015_v34, %v1992_v26 }
 0x1e9   :  { %1288 = vmatprep.subr.mxu0 %v925_v13  ;;  %v944_v13 = vld [vmem:[#allocation10 + $0x270] sm:$0xff] }
 0x1ea   :  { %1289 = vmatpush1.msra.mxu0 %v924_v14 }
 0x1eb   :  { %1290 = vmatprep.subr.mxu0 %v921_v15 }
 0x1ec   :  { %1291 = vmatpush1.msra.mxu0 %v920_v16  ;;  %v941_v16 = vld [vmem:[#allocation10 + $0x258] sm:$0xff] }
 0x1ed   :  { %1292 = vmatprep.subr.mxu0 %v917_v17 }
 0x1ee   :  { %1293 = vmatpush1.msra.mxu0 %v916_v18  ;;  %v940_v18 = vld [vmem:[#allocation10 + $0x250] sm:$0xff] }
 0x1ef   :  { %1294 = vmatprep.subr.mxu0 %v913_v19 }
 0x1f0   :  { %1295 = vmatpush1.msra.mxu0 %v912_v20  ;;  %v937_v20 = vld [vmem:[#allocation10 + $0x238] sm:$0xff] }
 0x1f1   :  { %1296 = vmatprep.subr.mxu0 %v909_v21 }
 0x1f2   :  { %1297 = vmatpush1.msra.mxu0 %v908_v24  ;;  %v936_v24 = vld [vmem:[#allocation10 + $0x230] sm:$0xff] }
 0x1f3   :  { %1298 = vmatprep.subr.mxu0 %v905_v27 }
 0x1f4   :  { %1299 = vmatpush1.msra.mxu0 %v904_v28 }
 0x1f5   :  { %1300 = vmatprep.subr.mxu0 %v901_v29  ;;  %v933_v29 = vld [vmem:[#allocation10 + $0x218] sm:$0xff] }
 0x1f6   :  { %1301 = vmatpush1.msra.mxu0 %v900_v30  ;;  %v932_v30 = vld [vmem:[#allocation10 + $0x210] sm:$0xff] }
 0x1f7   :  { %1302 = vmatprep.subr.mxu0 %v897_v31 }
 0x1f8   :  { %1303 = vmatpush1.msra.mxu0 %v896_v32 }
 0x1f9   :  { %1304 = vmatprep.subr.mxu0 %v893_v35  ;;  %v1056_v35 = vld [vmem:[#allocation10 + $0x5f0] sm:$0xff] }
 0x1fa   :  { %1305 = vmatpush1.msra.mxu0 %v892_v36  ;;  %v1053_v36 = vld [vmem:[#allocation10 + $0x5d8] sm:$0xff] }
 0x1fb   :  { %1306 = vmatprep.subr.mxu0 %v889_v37  ;;  %v1052_v37 = vld [vmem:[#allocation10 + $0x5d0] sm:$0xff] }
 0x1fc   :  { %1307 = vmatpush1.msra.mxu0 %v888_v38  ;;  %v1049_v38 = vld [vmem:[#allocation10 + $0x5b8] sm:$0xff] }
 0x1fd   :  { %1308 = vmatprep.subr.mxu0 %v885_v40  ;;  %v1048_v40 = vld [vmem:[#allocation10 + $0x5b0] sm:$0xff] }
 0x1fe   :  { %1309 = vmatpush1.msra.mxu0 %v884_v41  ;;  %v1463_v41 = vld [vmem:[#allocation11 + $0xf8] sm:$0xff] }
 0x1ff   :  { %1310 = vmatprep.subr.mxu0 %v881_v43  ;;  %v1447_v43 = vld [vmem:[#allocation11 + $0x78] sm:$0xff] }
 0x200   :  { %1311 = vmatpush1.msra.mxu0 %v880_v44  ;;  %v1462_v44 = vld [vmem:[#allocation11 + $0xf0] sm:$0xff] }
 0x201   :  { %1312 = vmatprep.subr.mxu0 %v877_v45  ;;  %v1045_v45 = vld [vmem:[#allocation10 + $0x598] sm:$0xff] }
 0x202   :  { %1313 = vmatpush1.msra.mxu0 %v876_v46  ;;  %v1446_v46 = vld [vmem:[#allocation11 + $0x70] sm:$0xff] }
 0x203   :  { %1314 = vmatprep.subr.mxu0 %v873_v47  ;;  %v1041_v47 = vld [vmem:[#allocation10 + $0x578] sm:$0xff] }
 0x204   :  { %1315 = vmatpush1.msra.mxu0 %v872_v48  ;;  %v1445_v48 = vld [vmem:[#allocation11 + $0x68] sm:$0xff] }
 0x205   :  { %1316 = vmatprep.subr.mxu0 %v869_v49  ;;  %v1040_v49 = vld [vmem:[#allocation10 + $0x570] sm:$0xff] }
 0x206   :  { %1317 = vmatpush1.msra.mxu0 %v868_v50  ;;  %v1460_v50 = vld [vmem:[#allocation11 + $0xe0] sm:$0xff] }
 0x207   :  { %1318 = vmatprep.subr.mxu0 %v993_v51  ;;  %v1037_v51 = vld [vmem:[#allocation10 + $0x558] sm:$0xff] }
 0x208   :  { %1319 = vmatpush2.msra.mxu0 %v992_v52  ;;  %v1444_v52 = vld [vmem:[#allocation11 + $0x60] sm:$0xff] }
 0x209   :  { %1320 = vmatprep.subr.mxu0 %v989_v53  ;;  %v1036_v53 = vld [vmem:[#allocation10 + $0x550] sm:$0xff] }
 0x20a   :  { %1321 = vmatpush2.msra.mxu0 %v988_v54  ;;  %v1459_v54 = vld [vmem:[#allocation11 + $0xd8] sm:$0xff] }
 0x20b   :  { %1322 = vmatprep.subr.mxu0 %v985_v55  ;;  %v1033_v55 = vld [vmem:[#allocation10 + $0x538] sm:$0xff] }
 0x20c   :  { %1323 = vmatpush2.msra.mxu0 %v984_v56  ;;  %v1443_v56 = vld [vmem:[#allocation11 + $0x58] sm:$0xff] }
 0x20d   :  { %1324 = vmatprep.subr.mxu0 %v981_v57  ;;  %v1032_v57 = vld [vmem:[#allocation10 + $0x530] sm:$0xff] }
 0x20e   :  { %1325 = vmatpush2.msra.mxu0 %v980_v58  ;;  %v1458_v58 = vld [vmem:[#allocation11 + $0xd0] sm:$0xff] }
 0x20f   :  { %1326 = vmatprep.subr.mxu0 %v977_v59  ;;  %v1029_v59 = vld [vmem:[#allocation10 + $0x518] sm:$0xff] }
 0x210   :  { %1327 = vmatpush2.msra.mxu0 %v976_v60  ;;  %v1442_v60 = vld [vmem:[#allocation11 + $0x50] sm:$0xff] }
 0x211   :  { %1328 = vmatprep.subr.mxu0 %v973_v61  ;;  %v1028_v61 = vld [vmem:[#allocation10 + $0x510] sm:$0xff] }
 0x212   :  { %1329 = vmatpush2.msra.mxu0 %v972_v62  ;;  %v1457_v62 = vld [vmem:[#allocation11 + $0xc8] sm:$0xff] }
 0x213   :  { %1330 = vmatprep.subr.mxu0 %v969_v63  ;;  %v1025_v63 = vld [vmem:[#allocation10 + $0x4f8] sm:$0xff] }
 0x214   :  { %1331 = vmatpush2.msra.mxu0 %v968_v0  ;;  %v1441_v0 = vld [vmem:[#allocation11 + $0x48] sm:$0xff] }
 0x215   :  { %1332 = vmatprep.subr.mxu0 %v965_v1  ;;  %v1024_v1 = vld [vmem:[#allocation10 + $0x4f0] sm:$0xff] }
 0x216   :  { %1333 = vmatpush2.msra.mxu0 %v964_v2  ;;  %v1456_v2 = vld [vmem:[#allocation11 + $0xc0] sm:$0xff] }
 0x217   :  { %1334 = vmatprep.subr.mxu0 %v961_v42  ;;  %v1021_v42 = vld [vmem:[#allocation10 + $0x4d8] sm:$0xff] }
 0x218   :  { %1335 = vmatpush2.msra.mxu0 %v960_v33  ;;  %v1440_v33 = vld [vmem:[#allocation11 + $0x40] sm:$0xff] }
 0x219   :  { %1336 = vmatprep.subr.mxu0 %v957_v39  ;;  %v1020_v39 = vld [vmem:[#allocation10 + $0x4d0] sm:$0xff] }
 0x21a   :  { %1337 = vmatpush2.msra.mxu0 %v956_v3  ;;  %v1455_v3 = vld [vmem:[#allocation11 + $0xb8] sm:$0xff] }
 0x21b   :  { %1338 = vmatprep.subr.mxu0 %v953_v4  ;;  %v1017_v4 = vld [vmem:[#allocation10 + $0x4b8] sm:$0xff] }
 0x21c   :  { %1339 = vmatpush2.msra.mxu0 %v952_v5  ;;  %v1439_v5 = vld [vmem:[#allocation11 + $0x38] sm:$0xff] }
 0x21d   :  { %1340 = vmatprep.subr.mxu0 %v949_v6  ;;  %v1016_v6 = vld [vmem:[#allocation10 + $0x4b0] sm:$0xff] }
 0x21e   :  { %v786_v14 = vpop.f32.mrf.mxu0  ;;  %v857_v15 = vpop.f32.mrf.mxu1  ;;  %1341 = vmatpush2.msra.mxu0 %v948_v9  ;;  %v1013_v9 = vld [vmem:[#allocation10 + $0x498] sm:$0xff] }
 0x21f   :  { %v787_v17 = vadd.f32 %v786_v14, %v569_v8  ;;  %1342 = vmatprep.subr.mxu0 %v945_v10  ;;  %v1454_v8 = vld [vmem:[#allocation11 + $0xb0] sm:$0xff]  ;;  %v1009_v14 = vld [vmem:[#allocation10 + $0x478] sm:$0xff] }
 0x220   :  { %v788_v19 = vpop.f32.mrf.mxu0  ;;  %1343 = vmatpush2.msra.mxu0 %v944_v13  ;;  %v859_v28 = vpop.f32.mrf.mxu1  ;;  %v1438_v10 = vld [vmem:[#allocation11 + $0x30] sm:$0xff]  ;;  %v1453_v13 = vld [vmem:[#allocation11 + $0xa8] sm:$0xff] }
 0x221   :  { %v789_v21 = vadd.f32 %v788_v19, %v573_v12  ;;  %1344 = vmatprep.subr.mxu0 %v941_v16  ;;  %v2030_v27 = vadd.f32 %v857_v15, %v787_v17  ;;  %v1012_v12 = vld [vmem:[#allocation10 + $0x490] sm:$0xff]  ;;  %v1437_v15 = vld [vmem:[#allocation11 + $0x28] sm:$0xff]  ;;  %v1452_v17 = vld [vmem:[#allocation11 + $0xa0] sm:$0xff] }
 0x222   :  { %1345 = vmatpush2.msra.mxu0 %v940_v18  ;;  %v1008_v16 = vld [vmem:[#allocation10 + $0x470] sm:$0xff]  ;;  %v1005_v18 = vld [vmem:[#allocation10 + $0x458] sm:$0xff]  ;;  %v1436_v19 = vld [vmem:[#allocation11 + $0x20] sm:$0xff] }
 0x223   :  { %v860_v34 = vadd.f32 %v859_v28, %v789_v21  ;;  %1346 = vmatprep.subr.mxu0 %v937_v20  ;;  %v864_v32 = vmax.f32 %v2030_v27, 0.0  ;;  %v1004_v20 = vld [vmem:[#allocation10 + $0x450] sm:$0xff]  ;;  %v1001_v21 = vld [vmem:[#allocation10 + $0x438] sm:$0xff] }
 0x224   :  { %1347 = vmatpush2.msra.mxu0 %v936_v24  ;;  %v1000_v24 = vld [vmem:[#allocation10 + $0x430] sm:$0xff]  ;;  %v997_v28 = vld [vmem:[#allocation10 + $0x418] sm:$0xff] }
 0x225   :  { %v865_v31 = vmax.f32 %v860_v34, 0.0  ;;  %1348 = vmatprep.subr.mxu0 %v933_v29  ;;  %v996_v29 = vld [vmem:[#allocation10 + $0x410] sm:$0xff]  ;;  %v1121_v34 = vld [vmem:[#allocation10 + $0x7f8] sm:$0xff] }
 0x226   :  { %1349 = vmatpush2.msra.mxu0 %v932_v30  ;;  %v1120_v30 = vld [vmem:[#allocation10 + $0x7f0] sm:$0xff] }
 0x227   :  { %1279 = vmatprep.mubr.f32.mxu1 %v865_v31  ;;  %1351 = vmatmul.mubr.f32.vlgmr.msra.gmra.mxu0 %v862_v11  ;;  %v1461_v11 = vld [vmem:[#allocation11 + $0xe8] sm:$0xff]  ;;  %v1494_v27 = vld [vmem:[#allocation11 + $0x1f0] sm:$0xff] }
 0x228   :  { %1280 = vmatmul.mubr.f32.vlgmr.msra.gmra.mxu1 %v864_v32  ;;  %1665 = vmatprep.subr.mxu0 %v1463_v41  ;;  %v1105_v41 = vld [vmem:[#allocation10 + $0x778] sm:$0xff] }
 0x229   :  { %1358 = vmatpush1.msra.mxu1 %v1056_v35  ;;  %1421 = vmatprep.mubr.f32.mxu1 %v865_v31  ;;  %v1117_v31 = vld [vmem:[#allocation10 + $0x7d8] sm:$0xff]  ;;  %v1116_v35 = vld [vmem:[#allocation10 + $0x7d0] sm:$0xff] }
 0x22a   :  { %1359 = vmatprep.subr.mxu1 %v1053_v36  ;;  %1666 = vmatpush3.msra.mxu0 %v1447_v43  ;;  %v1113_v36 = vld [vmem:[#allocation10 + $0x7b8] sm:$0xff]  ;;  %v1104_v43 = vld [vmem:[#allocation10 + $0x770] sm:$0xff] }
 0x22b   :  { %1360 = vmatpush1.msra.mxu1 %v1052_v37  ;;  %1667 = vmatprep.subr.mxu0 %v1462_v44  ;;  %v1112_v37 = vld [vmem:[#allocation10 + $0x7b0] sm:$0xff]  ;;  %v1101_v44 = vld [vmem:[#allocation10 + $0x758] sm:$0xff] }
 0x22c   :  { %1361 = vmatprep.subr.mxu1 %v1049_v38  ;;  %1668 = vmatpush3.msra.mxu0 %v1446_v46  ;;  %v1109_v38 = vld [vmem:[#allocation10 + $0x798] sm:$0xff] }
 0x22d   :  { %1362 = vmatpush1.msra.mxu1 %v1048_v40  ;;  %1669 = vmatprep.subr.mxu0 %v1461_v11  ;;  %v1108_v40 = vld [vmem:[#allocation10 + $0x790] sm:$0xff]  ;;  %v1097_v46 = vld [vmem:[#allocation10 + $0x738] sm:$0xff] }
 0x22e   :  { %1363 = vmatprep.subr.mxu1 %v1045_v45  ;;  %1670 = vmatpush3.msra.mxu0 %v1445_v48  ;;  %v1100_v45 = vld [vmem:[#allocation10 + $0x750] sm:$0xff]  ;;  %v1093_v11 = vld [vmem:[#allocation10 + $0x718] sm:$0xff] }
 0x22f   :  { %1364 = vmatpush1.msra.mxu1 %v1044_v7  ;;  %1671 = vmatprep.subr.mxu0 %v1460_v50  ;;  %v1096_v7 = vld [vmem:[#allocation10 + $0x730] sm:$0xff]  ;;  %v1089_v48 = vld [vmem:[#allocation10 + $0x6f8] sm:$0xff] }
 0x230   :  { %1365 = vmatprep.subr.mxu1 %v1041_v47  ;;  %1672 = vmatpush3.msra.mxu0 %v1444_v52  ;;  %v1092_v47 = vld [vmem:[#allocation10 + $0x710] sm:$0xff]  ;;  %v1085_v50 = vld [vmem:[#allocation10 + $0x6d8] sm:$0xff] }
 0x231   :  { %1366 = vmatpush1.msra.mxu1 %v1040_v49  ;;  %1673 = vmatprep.subr.mxu0 %v1459_v54  ;;  %v1088_v49 = vld [vmem:[#allocation10 + $0x6f0] sm:$0xff]  ;;  %v1081_v52 = vld [vmem:[#allocation10 + $0x6b8] sm:$0xff] }
 0x232   :  { %1367 = vmatprep.subr.mxu1 %v1037_v51  ;;  %1674 = vmatpush3.msra.mxu0 %v1443_v56  ;;  %v1084_v51 = vld [vmem:[#allocation10 + $0x6d0] sm:$0xff]  ;;  %v1077_v54 = vld [vmem:[#allocation10 + $0x698] sm:$0xff] }
 0x233   :  { %1368 = vmatpush1.msra.mxu1 %v1036_v53  ;;  %1675 = vmatprep.subr.mxu0 %v1458_v58  ;;  %v1080_v53 = vld [vmem:[#allocation10 + $0x6b0] sm:$0xff]  ;;  %v1073_v56 = vld [vmem:[#allocation10 + $0x678] sm:$0xff] }
 0x234   :  { %1369 = vmatprep.subr.mxu1 %v1033_v55  ;;  %1676 = vmatpush3.msra.mxu0 %v1442_v60  ;;  %v1076_v55 = vld [vmem:[#allocation10 + $0x690] sm:$0xff]  ;;  %v1069_v58 = vld [vmem:[#allocation10 + $0x658] sm:$0xff] }
 0x235   :  { %1370 = vmatpush1.msra.mxu1 %v1032_v57  ;;  %1677 = vmatprep.subr.mxu0 %v1457_v62  ;;  %v1072_v57 = vld [vmem:[#allocation10 + $0x670] sm:$0xff]  ;;  %v1065_v60 = vld [vmem:[#allocation10 + $0x638] sm:$0xff] }
 0x236   :  { %1371 = vmatprep.subr.mxu1 %v1029_v59  ;;  %1678 = vmatpush3.msra.mxu0 %v1441_v0  ;;  %v1068_v59 = vld [vmem:[#allocation10 + $0x650] sm:$0xff]  ;;  %v1061_v62 = vld [vmem:[#allocation10 + $0x618] sm:$0xff] }
 0x237   :  { %1372 = vmatpush1.msra.mxu1 %v1028_v61  ;;  %1679 = vmatprep.subr.mxu0 %v1456_v2  ;;  %v1064_v61 = vld [vmem:[#allocation10 + $0x630] sm:$0xff]  ;;  %v1451_v0 = vld [vmem:[#allocation11 + $0x98] sm:$0xff] }
 0x238   :  { %1373 = vmatprep.subr.mxu1 %v1025_v63  ;;  %1680 = vmatpush3.msra.mxu0 %v1440_v33  ;;  %v1060_v63 = vld [vmem:[#allocation10 + $0x610] sm:$0xff]  ;;  %v1449_v33 = vld [vmem:[#allocation11 + $0x88] sm:$0xff] }
 0x239   :  { %1374 = vmatpush1.msra.mxu1 %v1024_v1  ;;  %1681 = vmatprep.subr.mxu0 %v1455_v3  ;;  %v1435_v1 = vld [vmem:[#allocation11 + $0x18] sm:$0xff]  ;;  %v1450_v2 = vld [vmem:[#allocation11 + $0x90] sm:$0xff]  ;;  %v1448_v3 = vld [vmem:[#allocation11 + $0x80] sm:$0xff] }
 0x23a   :  { %1375 = vmatprep.subr.mxu1 %v1021_v42  ;;  %1682 = vmatpush3.msra.mxu0 %v1439_v5  ;;  %v1434_v42 = vld [vmem:[#allocation11 + $0x10] sm:$0xff]  ;;  %v1495_v5 = vld [vmem:[#allocation11 + $0x1f8] sm:$0xff] }
 0x23b   :  { %1376 = vmatpush1.msra.mxu1 %v1020_v39  ;;  %1683 = vmatprep.subr.mxu0 %v1454_v8  ;;  %v1433_v39 = vld [vmem:[#allocation11 + $0x8] sm:$0xff] }
 0x23c   :  { %1377 = vmatprep.subr.mxu1 %v1017_v4  ;;  %1684 = vmatpush3.msra.mxu0 %v1438_v10  ;;  %v1432_v4 = vld [vmem:[#allocation11] sm:$0xff]  ;;  %v1493_v8 = vld [vmem:[#allocation11 + $0x1e8] sm:$0xff] }
 0x23d   :  { %1378 = vmatpush1.msra.mxu1 %v1016_v6  ;;  %1685 = vmatprep.subr.mxu0 %v1453_v13  ;;  %v1479_v6 = vld [vmem:[#allocation11 + $0x178] sm:$0xff]  ;;  %v1492_v10 = vld [vmem:[#allocation11 + $0x1e0] sm:$0xff] }
 0x23e   :  { %1379 = vmatprep.subr.mxu1 %v1013_v9  ;;  %1686 = vmatpush3.msra.mxu0 %v1437_v15  ;;  %v1477_v9 = vld [vmem:[#allocation11 + $0x168] sm:$0xff]  ;;  %v1491_v13 = vld [vmem:[#allocation11 + $0x1d8] sm:$0xff]  ;;  %v1490_v15 = vld [vmem:[#allocation11 + $0x1d0] sm:$0xff] }
 0x23f   :  { %1380 = vmatpush1.msra.mxu1 %v1012_v12  ;;  %1687 = vmatprep.subr.mxu0 %v1452_v17  ;;  %v1476_v12 = vld [vmem:[#allocation11 + $0x160] sm:$0xff]  ;;  %v1489_v17 = vld [vmem:[#allocation11 + $0x1c8] sm:$0xff] }
 0x240   :  { %1381 = vmatprep.subr.mxu1 %v1009_v14  ;;  %1688 = vmatpush3.msra.mxu0 %v1436_v19  ;;  %v1475_v14 = vld [vmem:[#allocation11 + $0x158] sm:$0xff]  ;;  %v1488_v19 = vld [vmem:[#allocation11 + $0x1c0] sm:$0xff] }
 0x241   :  { %1382 = vmatpush1.msra.mxu1 %v1008_v16  ;;  %1689 = vmatprep.subr.mxu0 %v1451_v0  ;;  %v1474_v16 = vld [vmem:[#allocation11 + $0x150] sm:$0xff] }
 0x242   :  { %1383 = vmatprep.subr.mxu1 %v1005_v18  ;;  %1690 = vmatpush3.msra.mxu0 %v1435_v1  ;;  %v1473_v18 = vld [vmem:[#allocation11 + $0x148] sm:$0xff] }
 0x243   :  { %1384 = vmatpush1.msra.mxu1 %v1004_v20  ;;  %1691 = vmatprep.subr.mxu0 %v1450_v2  ;;  %v1472_v20 = vld [vmem:[#allocation11 + $0x140] sm:$0xff] }
 0x244   :  { %1385 = vmatprep.subr.mxu1 %v1001_v21  ;;  %1692 = vmatpush3.msra.mxu0 %v1434_v42  ;;  %v1487_v21 = vld [vmem:[#allocation11 + $0x1b8] sm:$0xff] }
 0x245   :  { %1386 = vmatpush1.msra.mxu1 %v1000_v24  ;;  %1693 = vmatprep.subr.mxu0 %v1449_v33  ;;  %v1471_v24 = vld [vmem:[#allocation11 + $0x138] sm:$0xff] }
 0x246   :  { %1387 = vmatprep.subr.mxu1 %v997_v28  ;;  %1694 = vmatpush3.msra.mxu0 %v1433_v39  ;;  %v1486_v28 = vld [vmem:[#allocation11 + $0x1b0] sm:$0xff] }
 0x247   :  { %1388 = vmatpush1.msra.mxu1 %v996_v29  ;;  %1695 = vmatprep.subr.mxu0 %v1448_v3  ;;  %v1470_v29 = vld [vmem:[#allocation11 + $0x130] sm:$0xff] }
 0x248   :  { %1389 = vmatprep.subr.mxu1 %v1121_v34  ;;  %1696 = vmatpush3.msra.mxu0 %v1432_v4  ;;  %v1485_v34 = vld [vmem:[#allocation11 + $0x1a8] sm:$0xff] }
 0x249   :  { %1390 = vmatpush2.msra.mxu1 %v1120_v30  ;;  %v1469_v30 = vld [vmem:[#allocation11 + $0x128] sm:$0xff] }
 0x24a   :  { %1391 = vmatprep.subr.mxu1 %v1117_v31  ;;  %v1484_v31 = vld [vmem:[#allocation11 + $0x1a0] sm:$0xff] }
 0x24b   :  { %1392 = vmatpush2.msra.mxu1 %v1116_v35  ;;  %v1468_v35 = vld [vmem:[#allocation11 + $0x120] sm:$0xff] }
 0x24c   :  { %1393 = vmatprep.subr.mxu1 %v1113_v36  ;;  %v1483_v36 = vld [vmem:[#allocation11 + $0x198] sm:$0xff] }
 0x24d   :  { %1394 = vmatpush2.msra.mxu1 %v1112_v37  ;;  %v1467_v37 = vld [vmem:[#allocation11 + $0x118] sm:$0xff] }
 0x24e   :  { %1395 = vmatprep.subr.mxu1 %v1109_v38  ;;  %v1482_v38 = vld [vmem:[#allocation11 + $0x190] sm:$0xff] }
 0x24f   :  { %1396 = vmatpush2.msra.mxu1 %v1108_v40  ;;  %v1466_v40 = vld [vmem:[#allocation11 + $0x110] sm:$0xff] }
 0x250   :  { %1397 = vmatprep.subr.mxu1 %v1105_v41  ;;  %v1481_v41 = vld [vmem:[#allocation11 + $0x188] sm:$0xff] }
 0x251   :  { %1398 = vmatpush2.msra.mxu1 %v1104_v43  ;;  %v1465_v43 = vld [vmem:[#allocation11 + $0x108] sm:$0xff] }
 0x252   :  { %1399 = vmatprep.subr.mxu1 %v1101_v44  ;;  %v1480_v44 = vld [vmem:[#allocation11 + $0x180] sm:$0xff] }
 0x253   :  { %1400 = vmatpush2.msra.mxu1 %v1100_v45  ;;  %v1464_v45 = vld [vmem:[#allocation11 + $0x100] sm:$0xff] }
 0x254   :  { %1401 = vmatprep.subr.mxu1 %v1097_v46  ;;  %v1122_v46 = vld [vmem:[%s2058_s6] sm:$0xf] }
 0x255   :  { %1402 = vmatpush2.msra.mxu1 %v1096_v7 }
 0x256   :  { %1403 = vmatprep.subr.mxu1 %v1093_v11  ;;  %v1127_v11 = vrot.slane %v1122_v46, %v1988_v23 }
 0x257   :  { %1404 = vmatpush2.msra.mxu1 %v1092_v47  ;;  %v1131_v47 = vrot.slane %v1122_v46, %v1990_v25 }
 0x258   :  { %1405 = vmatprep.subr.mxu1 %v1089_v48 }
 0x259   :  { %1406 = vmatpush2.msra.mxu1 %v1088_v49 }
 0x25a   :  { %1407 = vmatprep.subr.mxu1 %v1085_v50 }
 0x25b   :  { %1408 = vmatpush2.msra.mxu1 %v1084_v51 }
 0x25c   :  { %1409 = vmatprep.subr.mxu1 %v1081_v52 }
 0x25d   :  { %1410 = vmatpush2.msra.mxu1 %v1080_v53 }
 0x25e   :  { %1411 = vmatprep.subr.mxu1 %v1077_v54 }
 0x25f   :  { %1412 = vmatpush2.msra.mxu1 %v1076_v55 }
 0x260   :  { %1413 = vmatprep.subr.mxu1 %v1073_v56 }
 0x261   :  { %1414 = vmatpush2.msra.mxu1 %v1072_v57 }
 0x262   :  { %1415 = vmatprep.subr.mxu1 %v1069_v58  ;;  %v1135_v58 = vrot.slane %v1122_v46, %v1986_v22  ;;  %v1664_v22 = vld [vmem:[%s2060_s8] ss:$0 sm:$0xff] }
 0x263   :  { %1416 = vmatpush2.msra.mxu1 %v1068_v59  ;;  %v1139_v59 = vrot.slane %v1122_v46, %v1992_v26 }
 0x264   :  { %1417 = vmatprep.subr.mxu1 %v1065_v60 }
 0x265   :  { %1418 = vmatpush2.msra.mxu1 %v1064_v61 }
 0x266   :  { %1419 = vmatprep.subr.mxu1 %v1061_v62 }
 0x267   :  { %1420 = vmatpush2.msra.mxu1 %v1060_v63 }
 0x268   :  { %1422 = vmatmul.mubr.f32.vlgmr.msra.gmra.mxu1 %v864_v32  ;;  %1700 = vmatprep.subr.mxu1 %v1495_v5  ;;  %v1478_v32 = vld [vmem:[#allocation11 + $0x170] sm:$0xff] }
 0x269   :  { %1701 = vmatpush3.msra.mxu1 %v1479_v6 }
 0x26a   :  { %1702 = vmatprep.subr.mxu1 %v1494_v27 }
 0x26b   :  { %1703 = vmatpush3.msra.mxu1 %v1478_v32 }
 0x26c   :  { %1704 = vmatprep.subr.mxu1 %v1493_v8 }
 0x26d   :  { %1705 = vmatpush3.msra.mxu1 %v1477_v9 }
 0x26e   :  { %1706 = vmatprep.subr.mxu1 %v1492_v10 }
 0x26f   :  { %1707 = vmatpush3.msra.mxu1 %v1476_v12 }
 0x270   :  { %1708 = vmatprep.subr.mxu1 %v1491_v13 }
 0x271   :  { %1709 = vmatpush3.msra.mxu1 %v1475_v14 }
 0x272   :  { %1710 = vmatprep.subr.mxu1 %v1490_v15 }
 0x273   :  { %1711 = vmatpush3.msra.mxu1 %v1474_v16 }
 0x274   :  { %1712 = vmatprep.subr.mxu1 %v1489_v17 }
 0x275   :  { %1713 = vmatpush3.msra.mxu1 %v1473_v18 }
 0x276   :  { %1714 = vmatprep.subr.mxu1 %v1488_v19 }
 0x277   :  { %1715 = vmatpush3.msra.mxu1 %v1472_v20 }
 0x278   :  { %1716 = vmatprep.subr.mxu1 %v1487_v21 }
 0x279   :  { %1717 = vmatpush3.msra.mxu1 %v1471_v24 }
 0x27a   :  { %1718 = vmatprep.subr.mxu1 %v1486_v28 }
 0x27b   :  { %1719 = vmatpush3.msra.mxu1 %v1470_v29 }
 0x27c   :  { %1720 = vmatprep.subr.mxu1 %v1485_v34 }
 0x27d   :  { %1721 = vmatpush3.msra.mxu1 %v1469_v30 }
 0x27e   :  { %1722 = vmatprep.subr.mxu1 %v1484_v31 }
 0x27f   :  { %1723 = vmatpush3.msra.mxu1 %v1468_v35 }
 0x280   :  { %1724 = vmatprep.subr.mxu1 %v1483_v36 }
 0x281   :  { %1725 = vmatpush3.msra.mxu1 %v1467_v37 }
 0x282   :  { %1726 = vmatprep.subr.mxu1 %v1482_v38 }
 0x283   :  { %1727 = vmatpush3.msra.mxu1 %v1466_v40 }
 0x284   :  { %1728 = vmatprep.subr.mxu1 %v1481_v41 }
 0x285   :  { %1729 = vmatpush3.msra.mxu1 %v1465_v43 }
 0x286   :  { %1730 = vmatprep.subr.mxu1 %v1480_v44 }
 0x287   :  { %1731 = vmatpush3.msra.mxu1 %v1464_v45 }
 0x2a7   :  { %v1210_v7 = vpop.f32.mrf.mxu0 }
 0x2a8   :  { %v1211_v49 = vadd.f32 %v1210_v7, %v1127_v11 }
 0x2a9   :  { %v1212_v48 = vpop.f32.mrf.mxu0 }
 0x2aa   :  { %v1213_v51 = vadd.f32 %v1212_v48, %v1131_v47 }
 0x2e7   :  { %v1352_v57 = vpop.f32.mrf.mxu0 }
 0x2e8   :  { %v1281_v50 = vpop.f32.mrf.mxu1  ;;  %v1353_v23 = vadd.f32 %v1352_v57, %v1135_v58 }
 0x2e9   :  { %v1282_v52 = vadd.f32 %v1281_v50, %v1211_v49  ;;  %v1354_v60 = vpop.f32.mrf.mxu0 }
 0x2ea   :  { %v1283_v53 = vpop.f32.mrf.mxu1  ;;  %v1355_v25 = vadd.f32 %v1354_v60, %v1139_v59 }
 0x2eb   :  { %v1284_v54 = vadd.f32 %v1283_v53, %v1213_v51  ;;  %v1428_v56 = vmax.f32 %v1282_v52, 0.0 }
 0x2ed   :  { %v1429_v55 = vmax.f32 %v1284_v54, 0.0 }
 0x2ef   :  { %1567 = vmatprep.mubr.f32.mxu0 %v1429_v55 }
 0x2f0   :  { %1568 = vmatmul.mubr.f32.vlgmr.msra.gmra.mxu0 %v1428_v56 }
 0x328   :  { %v1423_v61 = vpop.f32.mrf.mxu1 }
 0x329   :  { %v1424_v62 = vadd.f32 %v1423_v61, %v1353_v23 }
 0x32a   :  { %v1425_v63 = vpop.f32.mrf.mxu1 }
 0x32b   :  { %v1426_v0 = vadd.f32 %v1425_v63, %v1355_v25  ;;  %v1430_v2 = vmax.f32 %v1424_v62, 0.0 }
 0x32d   :  { %v1431_v1 = vmax.f32 %v1426_v0, 0.0 }
 0x32f   :  { %1637 = vmatprep.mubr.f32.mxu1 %v1431_v1 }
 0x330   :  { %1638 = vmatmul.mubr.f32.vlgmr.msra.gmra.mxu1 %v1430_v2 }
 0x3b0   :  { %v1697_v42 = vpop.f32.mrf.mxu0 }
 0x3b2   :  { %v1698_v33 = vpop.f32.mrf.mxu0 }
 0x3b3   :  { %v1699_v39 = vadd.f32 %v1698_v33, %v1697_v42 }
 0x3b5   :  { %v1570_v4 = vadd.f32 %v1699_v39, %v1664_v22 }
 0x3f0   :  { %v1732_v3 = vpop.f32.mrf.mxu1 }
 0x3f2   :  { %v1733_v26 = vpop.f32.mrf.mxu1 }
 0x3f3   :  { %v1734_v5 = vadd.f32 %v1733_v26, %v1732_v3 }
 0x3f5   :  { %v1640_v6 = vadd.f32 %v1734_v5, %v1570_v4 }
 0x3f7   :  { %1643 = vst [vmem:[#allocation13] sm:$0xff] %v1640_v6 }
 0x3f8   :  { %1878 = shalt.err (!%p1875_p6)
}
 0x3f9   :  { %1653 = dma.vmem_to_hbm [thread:$0]  %s1651_s21, 128, %s2061_s9, [#allocation4]  }
 0x3fa   :  { %1895 = dma.done.wait [#allocation4], 128  }
 0x3fb   :  { %1896 = vsyncadd [#allocation4], 4294967168 }
 0x3fc   :  { %1657 = vsyncpa [#allocation3], 1 }
 0x3fd   :  { %1658 = vsyncpa [#allocation6], 1 }
 0x3fe   :  { %1659 = vsyncpa [#allocation9], 1 }
 0x3ff   :  { %1660 = vsyncpa [#allocation12], 1 }
 0x400   :  { %1661 = vsyncpa [#allocation4], 1 }

// kernel: tpu_custom_call.1
= control target key start
LH: loop header
LB: loop body
LE: loop exit
PB: predicated region body
PF: predicated region fallthrough
CT: control target
= control target key end

     0   :  { %14 = vsyncpa [#allocation3], 0  ;;  %s2052_s0 = inlined_call_operand.hbm [shape: f32[8,32], index: 0, kind: input, shape index: {}]   ;;  %s2053_s1 = inlined_call_operand.hbm [shape: f32[32,512], index: 1, kind: input, shape index: {}]   ;;  %s2054_s2 = inlined_call_operand.hbm [shape: f32[1,512], index: 2, kind: input, shape index: {}]   ;;  %s2055_s3 = inlined_call_operand.hbm [shape: f32[512,512], index: 3, kind: input, shape index: {}]   ;;  %s2056_s4 = inlined_call_operand.vmem [shape: f32[1,512], index: 4, kind: input, shape index: {}]   ;;  %s2057_s5 = inlined_call_operand.hbm [shape: f32[512,512], index: 5, kind: input, shape index: {}]   ;;  %s2058_s6 = inlined_call_operand.vmem [shape: f32[1,512], index: 6, kind: input, shape index: {}]   ;;  %s2059_s7 = inlined_call_operand.hbm [shape: f32[512,128], index: 7, kind: input, shape index: {}]   ;;  %s2060_s8 = inlined_call_operand.vmem [shape: f32[1,128], index: 8, kind: input, shape index: {}]   ;;  %s2061_s9 = inlined_call_operand.hbm [shape: f32[8,128], index: 9, kind: output, shape index: {}]  }
   0x1   :  { %15 = vsyncpa [#allocation6], 0 }
   0x2   :  { %16 = vsyncpa [#allocation9], 0 }
   0x3   :  { %17 = vsyncpa [#allocation12], 0 }
   0x4   :  { %18 = vsyncpa [#allocation4], 0  ;;  %s1897_s30 = smov [#allocation5]  }
   0x5   :  { %s34_s10 = sshll.u32 %s1897_s30, 4  ;;  %s35_s10 = int_to_ptr.vmem [resolvable:$true] %s34_s10 }
   0x6   :  { %s1755_s11 = scalar_lea.vmem %s35_s10, 2048  ;;  %p1760_p1 = scmp.lt.s32.totalorder %s35_s10, %s35_s10 }
   0x7   :  { %p1756_p0 = scmp.ne.s32.totalorder %s35_s10, %s1755_s11  ;;  %p1761_p2 = scmp.lt.s32.totalorder %s1755_s11, %s1755_s11 }
   0x9   :  { %p1762_p3 = por %p1761_p2, %p1760_p1 }
   0xb   :  { %p1763_p4 = pnand %p1762_p3, %p1756_p0 }
   0xd   :  { %1766 = shalt.err (!%p1763_p4)
}
   0xe   :  { %s1898_s12 = smov 512   ;;  %s1899_s13 = smov 32  }
   0xf   :  { %40 = dma.hbm_to_vmem [thread:$0]  %s2053_s1, 2048, %s35_s10, [#allocation6], %s1898_s12, %s1898_s12, %s1899_s13  }
  0x10   :  { %s1900_s16 = smov [#allocation8]   ;;  %s1901_s18 = smov [#allocation2]  }
  0x11   :  { %s56_s17 = sshll.u32 %s1900_s16, 4  ;;  %s25_s19 = sshll.u32 %s1901_s18, 4  ;;  %s57_s17 = int_to_ptr.vmem [resolvable:$true] %s56_s17  ;;  %s26_s19 = int_to_ptr.vmem [resolvable:$true] %s25_s19 }
  0x12   :  { %s1775_s20 = scalar_lea.vmem %s57_s17, 32768  ;;  %p1780_p6 = scmp.lt.s32.totalorder %s57_s17, %s57_s17 }
  0x13   :  { %p1776_p5 = scmp.ne.s32.totalorder %s57_s17, %s1775_s20  ;;  %p1781_p7 = scmp.lt.s32.totalorder %s1775_s20, %s1775_s20 }
  0x15   :  { %p1782_p8 = por %p1781_p7, %p1780_p6 }
  0x17   :  { %p1783_p9 = pnand %p1782_p8, %p1776_p5 }
  0x19   :  { %1786 = shalt.err (!%p1783_p9)
}
  0x1a   :  { %62 = dma.hbm_to_vmem [thread:$0]  %s2055_s3, 32768, %s57_s17, [#allocation9], %s1898_s12, %s1898_s12, %s1899_s13  }
  0x1b   :  { %s1795_s1 = scalar_lea.vmem %s26_s19, 128  ;;  %p1800_p11 = scmp.lt.s32.totalorder %s26_s19, %s26_s19 }
  0x1c   :  { %p1796_p10 = scmp.ne.s32.totalorder %s26_s19, %s1795_s1  ;;  %p1801_p12 = scmp.lt.s32.totalorder %s1795_s1, %s1795_s1 }
  0x1e   :  { %p1802_p13 = por %p1801_p12, %p1800_p11 }
  0x20   :  { %p1803_p0 = pnand %p1802_p13, %p1796_p10 }
  0x22   :  { %1806 = shalt.err (!%p1803_p0)
}
  0x23   :  { %28 = dma.hbm_to_vmem [thread:$0]  %s2052_s0, 128, %s26_s19, [#allocation3]  }
  0x24   :  { %s1902_s25 = smov [#allocation7]   ;;  %s1903_s27 = smov [#allocation10]  }
  0x25   :  { %s47_s26 = sshll.u32 %s1902_s25, 4  ;;  %s70_s28 = sshll.u32 %s1903_s27, 4  ;;  %s48_s26 = int_to_ptr.vmem [resolvable:$true] %s47_s26  ;;  %s71_s28 = int_to_ptr.vmem [resolvable:$true] %s70_s28 }
  0x26   :  { %s1815_s29 = scalar_lea.vmem %s48_s26, 64  ;;  %p1820_p2 = scmp.lt.s32.totalorder %s48_s26, %s48_s26 }
  0x27   :  { %p1816_p1 = scmp.ne.s32.totalorder %s48_s26, %s1815_s29  ;;  %p1821_p3 = scmp.lt.s32.totalorder %s1815_s29, %s1815_s29 }
  0x29   :  { %p1822_p4 = por %p1821_p3, %p1820_p2 }
  0x2b   :  { %p1823_p5 = pnand %p1822_p4, %p1816_p1 }
  0x2d   :  { %1826 = shalt.err (!%p1823_p5)
}
  0x2e   :  { %50 = dma.hbm_to_vmem [thread:$0]  %s2054_s2, 64, %s48_s26, [#allocation6]  }
  0x2f   :  { %s1835_s10 = scalar_lea.vmem %s71_s28, 32768  ;;  %p1840_p7 = scmp.lt.s32.totalorder %s71_s28, %s71_s28 }
  0x30   :  { %p1836_p6 = scmp.ne.s32.totalorder %s71_s28, %s1835_s10  ;;  %p1841_p8 = scmp.lt.s32.totalorder %s1835_s10, %s1835_s10 }
  0x32   :  { %p1842_p9 = por %p1841_p8, %p1840_p7 }
  0x34   :  { %p1843_p10 = pnand %p1842_p9, %p1836_p6 }
  0x36   :  { %1846 = shalt.err (!%p1843_p10)
}
  0x37   :  { %76 = dma.hbm_to_vmem [thread:$0]  %s2057_s5, 32768, %s71_s28, [#allocation9], %s1898_s12, %s1898_s12, %s1899_s13  }
  0x38   :  { %s1904_s14 = smov [#allocation11]  }
  0x39   :  { %s84_s15 = sshll.u32 %s1904_s14, 4  ;;  %s85_s15 = int_to_ptr.vmem [resolvable:$true] %s84_s15 }
  0x3a   :  { %s1855_s16 = scalar_lea.vmem %s85_s15, 8192  ;;  %p1860_p12 = scmp.lt.s32.totalorder %s85_s15, %s85_s15 }
  0x3b   :  { %p1856_p11 = scmp.ne.s32.totalorder %s85_s15, %s1855_s16  ;;  %p1861_p13 = scmp.lt.s32.totalorder %s1855_s16, %s1855_s16 }
  0x3d   :  { %p1862_p0 = por %p1861_p13, %p1860_p12 }
  0x3f   :  { %p1863_p1 = pnand %p1862_p0, %p1856_p11 }
  0x41   :  { %1866 = shalt.err (!%p1863_p1)
}
  0x42   :  { %s1905_s2 = smov 128   ;;  %s1906_s17 = smov 8  }
  0x43   :  { %90 = dma.hbm_to_vmem [thread:$0]  %s2059_s7, 8192, %s85_s15, [#allocation12], %s1905_s2, %s1905_s2, %s1906_s17  }
  0x44   :  { %1887 = dma.done.wait [#allocation3], 128  }
  0x45   :  { %1888 = vsyncadd [#allocation3], 4294967168 }
  0x46   :  { %1889 = dma.done.wait [#allocation6], 2112  }
  0x47   :  { %1890 = vsyncadd [#allocation6], 4294965184 }
  0x48   :  { %1891 = dma.done.wait [#allocation9], 65536  }
  0x49   :  { %1892 = vsyncadd [#allocation9], 4294901760 }
  0x4a   :  { %1893 = dma.done.wait [#allocation12], 8192  }
  0x4b   :  { %1894 = vsyncadd [#allocation12], 4294959104  ;;  %v1907_v0 = vmov 0.0   ;;  %v125_v1 = vld [vmem:[#allocation5 + $0x68] sm:$0xff]  ;;  %v127_v2 = vld [vmem:[#allocation5 + $0x78] sm:$0xff]  ;;  %vm150_vm0 = vcmask 261120  }
  0x4c   :  { %218 = vmatprep.mubr.f32.mxu0 %v1907_v0  ;;  %289 = vmatprep.mubr.f32.mxu1 %v1907_v0  ;;  %v124_v3 = vld [vmem:[#allocation5 + $0x60] sm:$0xff]  ;;  %v126_v4 = vld [vmem:[#allocation5 + $0x70] sm:$0xff]  ;;  %v121_v5 = vld [vmem:[#allocation5 + $0x48] sm:$0xff]  ;;  %s1908_s20 = smov [#allocation13]  }
  0x4d   :  { %178 = vmatprep.subr.mxu0 %v125_v1  ;;  %249 = vmatprep.subr.mxu1 %v127_v2  ;;  %v123_v6 = vld [vmem:[#allocation5 + $0x58] sm:$0xff]  ;;  %v120_v7 = vld [vmem:[#allocation5 + $0x40] sm:$0xff]  ;;  %v122_v8 = vld [vmem:[#allocation5 + $0x50] sm:$0xff]  ;;  %s1650_s21 = sshll.u32 %s1908_s20, 4  ;;  %s1651_s21 = int_to_ptr.vmem [resolvable:$true] %s1650_s21 }
  0x4e   :  { %179 = vmatpush1.msra.mxu0 %v124_v3  ;;  %250 = vmatpush1.msra.mxu1 %v126_v4  ;;  %v117_v9 = vld [vmem:[#allocation5 + $0x28] sm:$0xff]  ;;  %v119_v10 = vld [vmem:[#allocation5 + $0x38] sm:$0xff]  ;;  %v116_v11 = vld [vmem:[#allocation5 + $0x20] sm:$0xff]  ;;  %s1867_s22 = scalar_lea.vmem %s1651_s21, 128  ;;  %p1872_p3 = scmp.lt.s32.totalorder %s1651_s21, %s1651_s21 }
  0x4f   :  { %180 = vmatprep.subr.mxu0 %v121_v5  ;;  %251 = vmatprep.subr.mxu1 %v123_v6  ;;  %v118_v12 = vld [vmem:[#allocation5 + $0x30] sm:$0xff]  ;;  %v113_v13 = vld [vmem:[#allocation5 + $0x8] sm:$0xff]  ;;  %v115_v14 = vld [vmem:[#allocation5 + $0x18] sm:$0xff]  ;;  %p1868_p2 = scmp.ne.s32.totalorder %s1651_s21, %s1867_s22  ;;  %p1873_p4 = scmp.lt.s32.totalorder %s1867_s22, %s1867_s22 }
  0x50   :  { %181 = vmatpush1.msra.mxu0 %v120_v7  ;;  %252 = vmatpush1.msra.mxu1 %v122_v8  ;;  %v112_v15 = vld [vmem:[#allocation5] sm:$0xff]  ;;  %v114_v16 = vld [vmem:[#allocation5 + $0x10] sm:$0xff]  ;;  %v111_v17 = vld [vmem:[#allocation2] sm:$0xff] }
  0x51   :  { %182 = vmatprep.subr.mxu0 %v117_v9  ;;  %253 = vmatprep.subr.mxu1 %v119_v10  ;;  %v361_v18 = vld [vmem:[#allocation8 + $0x1e8] sm:$0xff]  ;;  %v360_v20 = vld [vmem:[#allocation8 + $0x1e0] sm:$0xff]  ;;  %p1874_p5 = por %p1873_p4, %p1872_p3 }
  0x52   :  { %183 = vmatpush1.msra.mxu0 %v116_v11  ;;  %254 = vmatpush1.msra.mxu1 %v118_v12  ;;  %v489_v19 = vld [vmem:[#allocation8 + $0x5e8] sm:$0xff]  ;;  %v488_v21 = vld [vmem:[#allocation8 + $0x5e0] sm:$0xff] }
  0x53   :  { %184 = vmatprep.subr.mxu0 %v113_v13  ;;  %255 = vmatprep.subr.mxu1 %v115_v14  ;;  %v357_v22 = vld [vmem:[#allocation8 + $0x1c8] sm:$0xff]  ;;  %v356_v24 = vld [vmem:[#allocation8 + $0x1c0] sm:$0xff]  ;;  %p1875_p6 = pnand %p1874_p5, %p1868_p2 }
  0x54   :  { %185 = vmatpush1.msra.mxu0 %v112_v15  ;;  %256 = vmatpush1.msra.mxu1 %v114_v16  ;;  %v485_v23 = vld [vmem:[#allocation8 + $0x5c8] sm:$0xff]  ;;  %v484_v25 = vld [vmem:[#allocation8 + $0x5c0] sm:$0xff] }
  0x55   :  { %1662 = vmatmul.mubr.msk.f32.vlgmr.msra.gmra.mxu0 %vm150_vm0, %v111_v17  ;;  %1663 = vmatmul.mubr.msk.f32.vlgmr.msra.gmra.mxu1 %vm150_vm0, %v111_v17  ;;  %v353_v26 = vld [vmem:[#allocation8 + $0x1a8] sm:$0xff]  ;;  %v352_v28 = vld [vmem:[#allocation8 + $0x1a0] sm:$0xff] }
  0x56   :  { %578 = vmatprep.subr.mxu0 %v361_v18  ;;  %649 = vmatprep.subr.mxu1 %v489_v19  ;;  %v481_v27 = vld [vmem:[#allocation8 + $0x5a8] sm:$0xff]  ;;  %v480_v29 = vld [vmem:[#allocation8 + $0x5a0] sm:$0xff] }
  0x57   :  { %579 = vmatpush1.msra.mxu0 %v360_v20  ;;  %650 = vmatpush1.msra.mxu1 %v488_v21  ;;  %v349_v30 = vld [vmem:[#allocation8 + $0x188] sm:$0xff]  ;;  %v348_v32 = vld [vmem:[#allocation8 + $0x180] sm:$0xff] }
  0x58   :  { %580 = vmatprep.subr.mxu0 %v357_v22  ;;  %651 = vmatprep.subr.mxu1 %v485_v23  ;;  %v477_v31 = vld [vmem:[#allocation8 + $0x588] sm:$0xff]  ;;  %v476_v33 = vld [vmem:[#allocation8 + $0x580] sm:$0xff] }
  0x59   :  { %581 = vmatpush1.msra.mxu0 %v356_v24  ;;  %652 = vmatpush1.msra.mxu1 %v484_v25  ;;  %v345_v34 = vld [vmem:[#allocation8 + $0x168] sm:$0xff]  ;;  %v344_v36 = vld [vmem:[#allocation8 + $0x160] sm:$0xff] }
  0x5a   :  { %582 = vmatprep.subr.mxu0 %v353_v26  ;;  %653 = vmatprep.subr.mxu1 %v481_v27  ;;  %v473_v35 = vld [vmem:[#allocation8 + $0x568] sm:$0xff]  ;;  %v472_v37 = vld [vmem:[#allocation8 + $0x560] sm:$0xff] }
  0x5b   :  { %583 = vmatpush1.msra.mxu0 %v352_v28  ;;  %654 = vmatpush1.msra.mxu1 %v480_v29  ;;  %v341_v38 = vld [vmem:[#allocation8 + $0x148] sm:$0xff]  ;;  %v340_v40 = vld [vmem:[#allocation8 + $0x140] sm:$0xff] }
  0x5c   :  { %584 = vmatprep.subr.mxu0 %v349_v30  ;;  %655 = vmatprep.subr.mxu1 %v477_v31  ;;  %v469_v39 = vld [vmem:[#allocation8 + $0x548] sm:$0xff]  ;;  %v468_v41 = vld [vmem:[#allocation8 + $0x540] sm:$0xff] }
  0x5d   :  { %585 = vmatpush1.msra.mxu0 %v348_v32  ;;  %656 = vmatpush1.msra.mxu1 %v476_v33  ;;  %v337_v42 = vld [vmem:[#allocation8 + $0x128] sm:$0xff]  ;;  %v336_v44 = vld [vmem:[#allocation8 + $0x120] sm:$0xff] }
  0x5e   :  { %586 = vmatprep.subr.mxu0 %v345_v34  ;;  %657 = vmatprep.subr.mxu1 %v473_v35  ;;  %v465_v43 = vld [vmem:[#allocation8 + $0x528] sm:$0xff]  ;;  %v464_v45 = vld [vmem:[#allocation8 + $0x520] sm:$0xff] }
  0x5f   :  { %587 = vmatpush1.msra.mxu0 %v344_v36  ;;  %658 = vmatpush1.msra.mxu1 %v472_v37  ;;  %v333_v46 = vld [vmem:[#allocation8 + $0x108] sm:$0xff]  ;;  %v332_v48 = vld [vmem:[#allocation8 + $0x100] sm:$0xff] }
  0x60   :  { %588 = vmatprep.subr.mxu0 %v341_v38  ;;  %659 = vmatprep.subr.mxu1 %v469_v39  ;;  %v461_v47 = vld [vmem:[#allocation8 + $0x508] sm:$0xff]  ;;  %v460_v49 = vld [vmem:[#allocation8 + $0x500] sm:$0xff] }
  0x61   :  { %589 = vmatpush1.msra.mxu0 %v340_v40  ;;  %660 = vmatpush1.msra.mxu1 %v468_v41  ;;  %v329_v50 = vld [vmem:[#allocation8 + $0xe8] sm:$0xff]  ;;  %v328_v52 = vld [vmem:[#allocation8 + $0xe0] sm:$0xff] }
  0x62   :  { %590 = vmatprep.subr.mxu0 %v337_v42  ;;  %661 = vmatprep.subr.mxu1 %v465_v43  ;;  %v457_v51 = vld [vmem:[#allocation8 + $0x4e8] sm:$0xff]  ;;  %v456_v53 = vld [vmem:[#allocation8 + $0x4e0] sm:$0xff] }
  0x63   :  { %591 = vmatpush1.msra.mxu0 %v336_v44  ;;  %662 = vmatpush1.msra.mxu1 %v464_v45  ;;  %v325_v54 = vld [vmem:[#allocation8 + $0xc8] sm:$0xff]  ;;  %v324_v56 = vld [vmem:[#allocation8 + $0xc0] sm:$0xff] }
  0x64   :  { %592 = vmatprep.subr.mxu0 %v333_v46  ;;  %663 = vmatprep.subr.mxu1 %v461_v47  ;;  %v453_v55 = vld [vmem:[#allocation8 + $0x4c8] sm:$0xff]  ;;  %v452_v57 = vld [vmem:[#allocation8 + $0x4c0] sm:$0xff] }
  0x65   :  { %593 = vmatpush1.msra.mxu0 %v332_v48  ;;  %664 = vmatpush1.msra.mxu1 %v460_v49  ;;  %v321_v58 = vld [vmem:[#allocation8 + $0xa8] sm:$0xff]  ;;  %v320_v60 = vld [vmem:[#allocation8 + $0xa0] sm:$0xff] }
  0x66   :  { %594 = vmatprep.subr.mxu0 %v329_v50  ;;  %665 = vmatprep.subr.mxu1 %v457_v51  ;;  %v449_v59 = vld [vmem:[#allocation8 + $0x4a8] sm:$0xff]  ;;  %v448_v61 = vld [vmem:[#allocation8 + $0x4a0] sm:$0xff] }
  0x67   :  { %595 = vmatpush1.msra.mxu0 %v328_v52  ;;  %666 = vmatpush1.msra.mxu1 %v456_v53  ;;  %v317_v62 = vld [vmem:[#allocation8 + $0x88] sm:$0xff]  ;;  %v316_v0 = vld [vmem:[#allocation8 + $0x80] sm:$0xff] }
  0x68   :  { %596 = vmatprep.subr.mxu0 %v325_v54  ;;  %667 = vmatprep.subr.mxu1 %v453_v55  ;;  %v445_v63 = vld [vmem:[#allocation8 + $0x488] sm:$0xff]  ;;  %v444_v1 = vld [vmem:[#allocation8 + $0x480] sm:$0xff] }
  0x69   :  { %597 = vmatpush1.msra.mxu0 %v324_v56  ;;  %668 = vmatpush1.msra.mxu1 %v452_v57  ;;  %v313_v2 = vld [vmem:[#allocation8 + $0x68] sm:$0xff]  ;;  %v312_v4 = vld [vmem:[#allocation8 + $0x60] sm:$0xff] }
  0x6a   :  { %598 = vmatprep.subr.mxu0 %v321_v58  ;;  %669 = vmatprep.subr.mxu1 %v449_v59  ;;  %v441_v3 = vld [vmem:[#allocation8 + $0x468] sm:$0xff]  ;;  %v440_v5 = vld [vmem:[#allocation8 + $0x460] sm:$0xff] }
  0x6b   :  { %599 = vmatpush1.msra.mxu0 %v320_v60  ;;  %670 = vmatpush1.msra.mxu1 %v448_v61  ;;  %v309_v6 = vld [vmem:[#allocation8 + $0x48] sm:$0xff]  ;;  %v308_v8 = vld [vmem:[#allocation8 + $0x40] sm:$0xff] }
  0x6c   :  { %600 = vmatprep.subr.mxu0 %v317_v62  ;;  %671 = vmatprep.subr.mxu1 %v445_v63  ;;  %v437_v7 = vld [vmem:[#allocation8 + $0x448] sm:$0xff]  ;;  %v436_v9 = vld [vmem:[#allocation8 + $0x440] sm:$0xff] }
  0x6d   :  { %601 = vmatpush1.msra.mxu0 %v316_v0  ;;  %672 = vmatpush1.msra.mxu1 %v444_v1  ;;  %v305_v10 = vld [vmem:[#allocation8 + $0x28] sm:$0xff]  ;;  %v304_v12 = vld [vmem:[#allocation8 + $0x20] sm:$0xff] }
  0x6e   :  { %602 = vmatprep.subr.mxu0 %v313_v2  ;;  %673 = vmatprep.subr.mxu1 %v441_v3  ;;  %v433_v11 = vld [vmem:[#allocation8 + $0x428] sm:$0xff]  ;;  %v432_v13 = vld [vmem:[#allocation8 + $0x420] sm:$0xff] }
  0x6f   :  { %603 = vmatpush1.msra.mxu0 %v312_v4  ;;  %674 = vmatpush1.msra.mxu1 %v440_v5  ;;  %v301_v14 = vld [vmem:[#allocation8 + $0x8] sm:$0xff]  ;;  %v300_v16 = vld [vmem:[#allocation8] sm:$0xff] }
  0x70   :  { %604 = vmatprep.subr.mxu0 %v309_v6  ;;  %675 = vmatprep.subr.mxu1 %v437_v7  ;;  %v429_v15 = vld [vmem:[#allocation8 + $0x408] sm:$0xff]  ;;  %v428_v17 = vld [vmem:[#allocation8 + $0x400] sm:$0xff] }
  0x71   :  { %605 = vmatpush1.msra.mxu0 %v308_v8  ;;  %676 = vmatpush1.msra.mxu1 %v436_v9  ;;  %v425_v18 = vld [vmem:[#allocation8 + $0x3e8] sm:$0xff]  ;;  %v424_v20 = vld [vmem:[#allocation8 + $0x3e0] sm:$0xff] }
  0x72   :  { %606 = vmatprep.subr.mxu0 %v305_v10  ;;  %677 = vmatprep.subr.mxu1 %v433_v11  ;;  %v553_v19 = vld [vmem:[#allocation8 + $0x7e8] sm:$0xff]  ;;  %v552_v21 = vld [vmem:[#allocation8 + $0x7e0] sm:$0xff] }
  0x73   :  { %607 = vmatpush1.msra.mxu0 %v304_v12  ;;  %678 = vmatpush1.msra.mxu1 %v432_v13  ;;  %v421_v22 = vld [vmem:[#allocation8 + $0x3c8] sm:$0xff]  ;;  %v420_v24 = vld [vmem:[#allocation8 + $0x3c0] sm:$0xff] }
  0x74   :  { %608 = vmatprep.subr.mxu0 %v301_v14  ;;  %679 = vmatprep.subr.mxu1 %v429_v15  ;;  %v549_v23 = vld [vmem:[#allocation8 + $0x7c8] sm:$0xff]  ;;  %v548_v25 = vld [vmem:[#allocation8 + $0x7c0] sm:$0xff] }
  0x75   :  { %609 = vmatpush1.msra.mxu0 %v300_v16  ;;  %680 = vmatpush1.msra.mxu1 %v428_v17  ;;  %v417_v26 = vld [vmem:[#allocation8 + $0x3a8] sm:$0xff]  ;;  %v416_v28 = vld [vmem:[#allocation8 + $0x3a0] sm:$0xff] }
  0x76   :  { %610 = vmatprep.subr.mxu0 %v425_v18  ;;  %681 = vmatprep.subr.mxu1 %v553_v19  ;;  %v545_v27 = vld [vmem:[#allocation8 + $0x7a8] sm:$0xff]  ;;  %v544_v29 = vld [vmem:[#allocation8 + $0x7a0] sm:$0xff]  ;;  %v363_v18 = vld [vmem:[#allocation8 + $0x1f8] sm:$0xff] }
  0x77   :  { %611 = vmatpush2.msra.mxu0 %v424_v20  ;;  %682 = vmatpush2.msra.mxu1 %v552_v21  ;;  %v413_v30 = vld [vmem:[#allocation8 + $0x388] sm:$0xff]  ;;  %v412_v32 = vld [vmem:[#allocation8 + $0x380] sm:$0xff]  ;;  %v491_v19 = vld [vmem:[#allocation8 + $0x5f8] sm:$0xff]  ;;  %v130_v20 = vlaneseq }
  0x78   :  { %612 = vmatprep.subr.mxu0 %v421_v22  ;;  %683 = vmatprep.subr.mxu1 %v549_v23  ;;  %v541_v31 = vld [vmem:[#allocation8 + $0x788] sm:$0xff]  ;;  %v540_v33 = vld [vmem:[#allocation8 + $0x780] sm:$0xff] }
  0x79   :  { %613 = vmatpush2.msra.mxu0 %v420_v24  ;;  %684 = vmatpush2.msra.mxu1 %v548_v25  ;;  %v409_v34 = vld [vmem:[#allocation8 + $0x368] sm:$0xff]  ;;  %v408_v36 = vld [vmem:[#allocation8 + $0x360] sm:$0xff]  ;;  %v131_v21 = vshrl.u32 %v130_v20, 7  ;;  %v128_v24 = vld [vmem:[#allocation7] sm:$0xf] }
  0x7a   :  { %614 = vmatprep.subr.mxu0 %v417_v26  ;;  %685 = vmatprep.subr.mxu1 %v545_v27  ;;  %v537_v35 = vld [vmem:[#allocation8 + $0x768] sm:$0xff]  ;;  %v536_v37 = vld [vmem:[#allocation8 + $0x760] sm:$0xff]  ;;  %v450_v20 = vld [vmem:[#allocation8 + $0x4b0] sm:$0xff] }
  0x7b   :  { %615 = vmatpush2.msra.mxu0 %v416_v28  ;;  %686 = vmatpush2.msra.mxu1 %v544_v29  ;;  %v405_v38 = vld [vmem:[#allocation8 + $0x348] sm:$0xff]  ;;  %v404_v40 = vld [vmem:[#allocation8 + $0x340] sm:$0xff]  ;;  %v1986_v22 = vsub.s32 2, %v131_v21  ;;  %v1988_v23 = vsub.s32 0, %v131_v21  ;;  %v1990_v25 = vsub.s32 1, %v131_v21  ;;  %v1992_v26 = vsub.s32 3, %v131_v21 }
  0x7c   :  { %616 = vmatprep.subr.mxu0 %v413_v30  ;;  %687 = vmatprep.subr.mxu1 %v541_v31  ;;  %v533_v39 = vld [vmem:[#allocation8 + $0x748] sm:$0xff]  ;;  %v532_v41 = vld [vmem:[#allocation8 + $0x740] sm:$0xff]  ;;  %v319_v21 = vld [vmem:[#allocation8 + $0x98] sm:$0xff] }
  0x7d   :  { %617 = vmatpush2.msra.mxu0 %v412_v32  ;;  %688 = vmatpush2.msra.mxu1 %v540_v33  ;;  %v401_v42 = vld [vmem:[#allocation8 + $0x328] sm:$0xff]  ;;  %v400_v44 = vld [vmem:[#allocation8 + $0x320] sm:$0xff]  ;;  %v141_v27 = vrot.slane %v128_v24, %v1986_v22  ;;  %v133_v28 = vrot.slane %v128_v24, %v1988_v23  ;;  %v137_v29 = vrot.slane %v128_v24, %v1990_v25 }
  0x7e   :  { %618 = vmatprep.subr.mxu0 %v409_v34  ;;  %689 = vmatprep.subr.mxu1 %v537_v35  ;;  %v529_v43 = vld [vmem:[#allocation8 + $0x728] sm:$0xff]  ;;  %v528_v45 = vld [vmem:[#allocation8 + $0x720] sm:$0xff]  ;;  %v145_v30 = vrot.slane %v128_v24, %v1992_v26  ;;  %v447_v24 = vld [vmem:[#allocation8 + $0x498] sm:$0xff] }
  0x7f   :  { %619 = vmatpush2.msra.mxu0 %v408_v36  ;;  %690 = vmatpush2.msra.mxu1 %v536_v37  ;;  %v397_v46 = vld [vmem:[#allocation8 + $0x308] sm:$0xff]  ;;  %v396_v48 = vld [vmem:[#allocation8 + $0x300] sm:$0xff] }
  0x80   :  { %620 = vmatprep.subr.mxu0 %v405_v38  ;;  %691 = vmatprep.subr.mxu1 %v533_v39  ;;  %v525_v47 = vld [vmem:[#allocation8 + $0x708] sm:$0xff]  ;;  %v524_v49 = vld [vmem:[#allocation8 + $0x700] sm:$0xff] }
  0x81   :  { %621 = vmatpush2.msra.mxu0 %v404_v40  ;;  %692 = vmatpush2.msra.mxu1 %v532_v41  ;;  %v393_v50 = vld [vmem:[#allocation8 + $0x2e8] sm:$0xff]  ;;  %v392_v52 = vld [vmem:[#allocation8 + $0x2e0] sm:$0xff] }
  0x82   :  { %622 = vmatprep.subr.mxu0 %v401_v42  ;;  %693 = vmatprep.subr.mxu1 %v529_v43  ;;  %v521_v51 = vld [vmem:[#allocation8 + $0x6e8] sm:$0xff]  ;;  %v520_v53 = vld [vmem:[#allocation8 + $0x6e0] sm:$0xff]  ;;  %v362_v43 = vld [vmem:[#allocation8 + $0x1f0] sm:$0xff] }
  0x83   :  { %623 = vmatpush2.msra.mxu0 %v400_v44  ;;  %694 = vmatpush2.msra.mxu1 %v528_v45  ;;  %v389_v54 = vld [vmem:[#allocation8 + $0x2c8] sm:$0xff]  ;;  %v388_v56 = vld [vmem:[#allocation8 + $0x2c0] sm:$0xff]  ;;  %v490_v44 = vld [vmem:[#allocation8 + $0x5f0] sm:$0xff] }
  0x84   :  { %624 = vmatprep.subr.mxu0 %v397_v46  ;;  %695 = vmatprep.subr.mxu1 %v525_v47  ;;  %v517_v55 = vld [vmem:[#allocation8 + $0x6c8] sm:$0xff]  ;;  %v516_v57 = vld [vmem:[#allocation8 + $0x6c0] sm:$0xff]  ;;  %v359_v45 = vld [vmem:[#allocation8 + $0x1d8] sm:$0xff] }
  0x85   :  { %625 = vmatpush2.msra.mxu0 %v396_v48  ;;  %696 = vmatpush2.msra.mxu1 %v524_v49  ;;  %v385_v58 = vld [vmem:[#allocation8 + $0x2a8] sm:$0xff]  ;;  %v384_v60 = vld [vmem:[#allocation8 + $0x2a0] sm:$0xff]  ;;  %v487_v46 = vld [vmem:[#allocation8 + $0x5d8] sm:$0xff] }
  0x86   :  { %626 = vmatprep.subr.mxu0 %v393_v50  ;;  %697 = vmatprep.subr.mxu1 %v521_v51  ;;  %v513_v59 = vld [vmem:[#allocation8 + $0x6a8] sm:$0xff]  ;;  %v512_v61 = vld [vmem:[#allocation8 + $0x6a0] sm:$0xff]  ;;  %v358_v47 = vld [vmem:[#allocation8 + $0x1d0] sm:$0xff] }
  0x87   :  { %627 = vmatpush2.msra.mxu0 %v392_v52  ;;  %698 = vmatpush2.msra.mxu1 %v520_v53  ;;  %v381_v62 = vld [vmem:[#allocation8 + $0x288] sm:$0xff]  ;;  %v380_v0 = vld [vmem:[#allocation8 + $0x280] sm:$0xff]  ;;  %v486_v48 = vld [vmem:[#allocation8 + $0x5d0] sm:$0xff] }
  0x88   :  { %628 = vmatprep.subr.mxu0 %v389_v54  ;;  %699 = vmatprep.subr.mxu1 %v517_v55  ;;  %v509_v63 = vld [vmem:[#allocation8 + $0x688] sm:$0xff]  ;;  %v508_v1 = vld [vmem:[#allocation8 + $0x680] sm:$0xff]  ;;  %v355_v49 = vld [vmem:[#allocation8 + $0x1b8] sm:$0xff] }
  0x89   :  { %629 = vmatpush2.msra.mxu0 %v388_v56  ;;  %700 = vmatpush2.msra.mxu1 %v516_v57  ;;  %v377_v2 = vld [vmem:[#allocation8 + $0x268] sm:$0xff]  ;;  %v376_v4 = vld [vmem:[#allocation8 + $0x260] sm:$0xff]  ;;  %v483_v50 = vld [vmem:[#allocation8 + $0x5b8] sm:$0xff] }
  0x8a   :  { %630 = vmatprep.subr.mxu0 %v385_v58  ;;  %701 = vmatprep.subr.mxu1 %v513_v59  ;;  %v505_v3 = vld [vmem:[#allocation8 + $0x668] sm:$0xff]  ;;  %v504_v5 = vld [vmem:[#allocation8 + $0x660] sm:$0xff]  ;;  %v354_v51 = vld [vmem:[#allocation8 + $0x1b0] sm:$0xff] }
  0x8b   :  { %631 = vmatpush2.msra.mxu0 %v384_v60  ;;  %702 = vmatpush2.msra.mxu1 %v512_v61  ;;  %v373_v6 = vld [vmem:[#allocation8 + $0x248] sm:$0xff]  ;;  %v372_v8 = vld [vmem:[#allocation8 + $0x240] sm:$0xff]  ;;  %v482_v52 = vld [vmem:[#allocation8 + $0x5b0] sm:$0xff] }
  0x8c   :  { %632 = vmatprep.subr.mxu0 %v381_v62  ;;  %703 = vmatprep.subr.mxu1 %v509_v63  ;;  %v501_v7 = vld [vmem:[#allocation8 + $0x648] sm:$0xff]  ;;  %v500_v9 = vld [vmem:[#allocation8 + $0x640] sm:$0xff]  ;;  %v351_v53 = vld [vmem:[#allocation8 + $0x198] sm:$0xff] }
  0x8d   :  { %633 = vmatpush2.msra.mxu0 %v380_v0  ;;  %704 = vmatpush2.msra.mxu1 %v508_v1  ;;  %v369_v10 = vld [vmem:[#allocation8 + $0x228] sm:$0xff]  ;;  %v368_v12 = vld [vmem:[#allocation8 + $0x220] sm:$0xff]  ;;  %v479_v54 = vld [vmem:[#allocation8 + $0x598] sm:$0xff] }
  0x8e   :  { %634 = vmatprep.subr.mxu0 %v377_v2  ;;  %705 = vmatprep.subr.mxu1 %v505_v3  ;;  %v497_v11 = vld [vmem:[#allocation8 + $0x628] sm:$0xff]  ;;  %v496_v13 = vld [vmem:[#allocation8 + $0x620] sm:$0xff]  ;;  %v350_v55 = vld [vmem:[#allocation8 + $0x190] sm:$0xff] }
  0x8f   :  { %635 = vmatpush2.msra.mxu0 %v376_v4  ;;  %706 = vmatpush2.msra.mxu1 %v504_v5  ;;  %v365_v14 = vld [vmem:[#allocation8 + $0x208] sm:$0xff]  ;;  %v364_v16 = vld [vmem:[#allocation8 + $0x200] sm:$0xff]  ;;  %v478_v56 = vld [vmem:[#allocation8 + $0x590] sm:$0xff] }
  0x90   :  { %636 = vmatprep.subr.mxu0 %v373_v6  ;;  %707 = vmatprep.subr.mxu1 %v501_v7  ;;  %v493_v15 = vld [vmem:[#allocation8 + $0x608] sm:$0xff]  ;;  %v492_v17 = vld [vmem:[#allocation8 + $0x600] sm:$0xff]  ;;  %v347_v57 = vld [vmem:[#allocation8 + $0x178] sm:$0xff] }
  0x91   :  { %637 = vmatpush2.msra.mxu0 %v372_v8  ;;  %708 = vmatpush2.msra.mxu1 %v500_v9  ;;  %v475_v58 = vld [vmem:[#allocation8 + $0x578] sm:$0xff]  ;;  %v346_v59 = vld [vmem:[#allocation8 + $0x170] sm:$0xff] }
  0x92   :  { %638 = vmatprep.subr.mxu0 %v369_v10  ;;  %709 = vmatprep.subr.mxu1 %v497_v11  ;;  %v474_v60 = vld [vmem:[#allocation8 + $0x570] sm:$0xff]  ;;  %v343_v61 = vld [vmem:[#allocation8 + $0x158] sm:$0xff] }
  0x93   :  { %639 = vmatpush2.msra.mxu0 %v368_v12  ;;  %710 = vmatpush2.msra.mxu1 %v496_v13  ;;  %v471_v62 = vld [vmem:[#allocation8 + $0x558] sm:$0xff]  ;;  %v342_v63 = vld [vmem:[#allocation8 + $0x150] sm:$0xff] }
  0x94   :  { %640 = vmatprep.subr.mxu0 %v365_v14  ;;  %711 = vmatprep.subr.mxu1 %v493_v15  ;;  %v470_v0 = vld [vmem:[#allocation8 + $0x550] sm:$0xff]  ;;  %v339_v1 = vld [vmem:[#allocation8 + $0x138] sm:$0xff] }
  0x95   :  { %641 = vmatpush2.msra.mxu0 %v364_v16  ;;  %712 = vmatpush2.msra.mxu1 %v492_v17  ;;  %v467_v2 = vld [vmem:[#allocation8 + $0x538] sm:$0xff]  ;;  %v338_v3 = vld [vmem:[#allocation8 + $0x130] sm:$0xff] }
  0x96   :  { %720 = vmatprep.subr.mxu0 %v363_v18  ;;  %791 = vmatprep.subr.mxu1 %v491_v19  ;;  %v466_v4 = vld [vmem:[#allocation8 + $0x530] sm:$0xff]  ;;  %v335_v5 = vld [vmem:[#allocation8 + $0x118] sm:$0xff] }
  0x97   :  { %v463_v6 = vld [vmem:[#allocation8 + $0x518] sm:$0xff]  ;;  %v334_v7 = vld [vmem:[#allocation8 + $0x110] sm:$0xff] }
  0x98   :  { %v462_v8 = vld [vmem:[#allocation8 + $0x510] sm:$0xff]  ;;  %v331_v9 = vld [vmem:[#allocation8 + $0xf8] sm:$0xff] }
  0x99   :  { %v459_v10 = vld [vmem:[#allocation8 + $0x4f8] sm:$0xff]  ;;  %v330_v11 = vld [vmem:[#allocation8 + $0xf0] sm:$0xff] }
  0x9a   :  { %v458_v12 = vld [vmem:[#allocation8 + $0x4f0] sm:$0xff]  ;;  %v327_v13 = vld [vmem:[#allocation8 + $0xd8] sm:$0xff] }
  0x9b   :  { %v455_v14 = vld [vmem:[#allocation8 + $0x4d8] sm:$0xff]  ;;  %v326_v15 = vld [vmem:[#allocation8 + $0xd0] sm:$0xff] }
  0x9c   :  { %v454_v16 = vld [vmem:[#allocation8 + $0x4d0] sm:$0xff]  ;;  %v323_v17 = vld [vmem:[#allocation8 + $0xb8] sm:$0xff] }
  0x9d   :  { %v451_v18 = vld [vmem:[#allocation8 + $0x4b8] sm:$0xff]  ;;  %v322_v19 = vld [vmem:[#allocation8 + $0xb0] sm:$0xff] }
 0x115   :  { %v220_v31 = vpop.f32.mrf.mxu0  ;;  %v291_v32 = vpop.f32.mrf.mxu1 }
 0x116   :  { %v1998_v33 = vadd.f32 %v291_v32, %v141_v27  ;;  %v2000_v34 = vadd.f32 %v220_v31, %v133_v28  ;;  %v318_v27 = vld [vmem:[#allocation8 + $0x90] sm:$0xff] }
 0x117   :  { %v222_v35 = vpop.f32.mrf.mxu0  ;;  %v293_v36 = vpop.f32.mrf.mxu1  ;;  %v446_v28 = vld [vmem:[#allocation8 + $0x490] sm:$0xff] }
 0x118   :  { %v223_v37 = vadd.f32 %v222_v35, %v137_v29  ;;  %v294_v38 = vadd.f32 %v293_v36, %v145_v30  ;;  %v298_v39 = vmax.f32 %v1998_v33, 0.0  ;;  %v296_v42 = vmax.f32 %v2000_v34, 0.0  ;;  %v315_v29 = vld [vmem:[#allocation8 + $0x78] sm:$0xff]  ;;  %v314_v31 = vld [vmem:[#allocation8 + $0x70] sm:$0xff]  ;;  %v1055_v34 = vld [vmem:[#allocation10 + $0x5e8] sm:$0xff] }
 0x119   :  { %v443_v30 = vld [vmem:[#allocation8 + $0x478] sm:$0xff]  ;;  %v442_v32 = vld [vmem:[#allocation8 + $0x470] sm:$0xff]  ;;  %v1054_v33 = vld [vmem:[#allocation10 + $0x5e0] sm:$0xff] }
 0x11a   :  { %v297_v40 = vmax.f32 %v223_v37, 0.0  ;;  %v299_v41 = vmax.f32 %v294_v38, 0.0  ;;  %v311_v35 = vld [vmem:[#allocation8 + $0x58] sm:$0xff]  ;;  %v310_v37 = vld [vmem:[#allocation8 + $0x50] sm:$0xff] }
 0x11b   :  { %v439_v36 = vld [vmem:[#allocation8 + $0x458] sm:$0xff]  ;;  %v438_v38 = vld [vmem:[#allocation8 + $0x450] sm:$0xff] }
 0x11c   :  { %642 = vmatprep.mubr.f32.mxu0 %v297_v40  ;;  %713 = vmatprep.mubr.f32.mxu1 %v299_v41 }
 0x11d   :  { %643 = vmatmul.mubr.f32.vlgmr.msra.gmra.mxu0 %v296_v42  ;;  %714 = vmatmul.mubr.f32.vlgmr.msra.gmra.mxu1 %v298_v39 }
 0x11e   :  { %721 = vmatpush1.msra.mxu0 %v362_v43  ;;  %792 = vmatpush1.msra.mxu1 %v490_v44  ;;  %v306_v43 = vld [vmem:[#allocation8 + $0x30] sm:$0xff] }
 0x11f   :  { %722 = vmatprep.subr.mxu0 %v359_v45  ;;  %784 = vmatprep.mubr.f32.mxu0 %v297_v40  ;;  %v307_v40 = vld [vmem:[#allocation8 + $0x38] sm:$0xff]  ;;  %v434_v44 = vld [vmem:[#allocation8 + $0x430] sm:$0xff] }
 0x120   :  { %793 = vmatprep.subr.mxu1 %v487_v46  ;;  %855 = vmatprep.mubr.f32.mxu1 %v299_v41  ;;  %v435_v41 = vld [vmem:[#allocation8 + $0x438] sm:$0xff] }
 0x121   :  { %723 = vmatpush1.msra.mxu0 %v358_v47  ;;  %794 = vmatpush1.msra.mxu1 %v486_v48  ;;  %v303_v45 = vld [vmem:[#allocation8 + $0x18] sm:$0xff]  ;;  %v302_v47 = vld [vmem:[#allocation8 + $0x10] sm:$0xff] }
 0x122   :  { %724 = vmatprep.subr.mxu0 %v355_v49  ;;  %795 = vmatprep.subr.mxu1 %v483_v50  ;;  %v431_v46 = vld [vmem:[#allocation8 + $0x418] sm:$0xff]  ;;  %v430_v48 = vld [vmem:[#allocation8 + $0x410] sm:$0xff] }
 0x123   :  { %725 = vmatpush1.msra.mxu0 %v354_v51  ;;  %796 = vmatpush1.msra.mxu1 %v482_v52  ;;  %v427_v49 = vld [vmem:[#allocation8 + $0x3f8] sm:$0xff]  ;;  %v426_v51 = vld [vmem:[#allocation8 + $0x3f0] sm:$0xff] }
 0x124   :  { %726 = vmatprep.subr.mxu0 %v351_v53  ;;  %797 = vmatprep.subr.mxu1 %v479_v54  ;;  %v555_v50 = vld [vmem:[#allocation8 + $0x7f8] sm:$0xff]  ;;  %v554_v52 = vld [vmem:[#allocation8 + $0x7f0] sm:$0xff] }
 0x125   :  { %727 = vmatpush1.msra.mxu0 %v350_v55  ;;  %798 = vmatpush1.msra.mxu1 %v478_v56  ;;  %v423_v53 = vld [vmem:[#allocation8 + $0x3d8] sm:$0xff]  ;;  %v422_v55 = vld [vmem:[#allocation8 + $0x3d0] sm:$0xff] }
 0x126   :  { %728 = vmatprep.subr.mxu0 %v347_v57  ;;  %799 = vmatprep.subr.mxu1 %v475_v58  ;;  %v551_v54 = vld [vmem:[#allocation8 + $0x7d8] sm:$0xff]  ;;  %v550_v56 = vld [vmem:[#allocation8 + $0x7d0] sm:$0xff] }
 0x127   :  { %729 = vmatpush1.msra.mxu0 %v346_v59  ;;  %800 = vmatpush1.msra.mxu1 %v474_v60  ;;  %v419_v57 = vld [vmem:[#allocation8 + $0x3b8] sm:$0xff]  ;;  %v418_v59 = vld [vmem:[#allocation8 + $0x3b0] sm:$0xff] }
 0x128   :  { %730 = vmatprep.subr.mxu0 %v343_v61  ;;  %801 = vmatprep.subr.mxu1 %v471_v62  ;;  %v547_v58 = vld [vmem:[#allocation8 + $0x7b8] sm:$0xff]  ;;  %v546_v60 = vld [vmem:[#allocation8 + $0x7b0] sm:$0xff] }
 0x129   :  { %731 = vmatpush1.msra.mxu0 %v342_v63  ;;  %802 = vmatpush1.msra.mxu1 %v470_v0  ;;  %v415_v61 = vld [vmem:[#allocation8 + $0x398] sm:$0xff]  ;;  %v414_v63 = vld [vmem:[#allocation8 + $0x390] sm:$0xff] }
 0x12a   :  { %732 = vmatprep.subr.mxu0 %v339_v1  ;;  %803 = vmatprep.subr.mxu1 %v467_v2  ;;  %v543_v62 = vld [vmem:[#allocation8 + $0x798] sm:$0xff]  ;;  %v542_v0 = vld [vmem:[#allocation8 + $0x790] sm:$0xff] }
 0x12b   :  { %733 = vmatpush1.msra.mxu0 %v338_v3  ;;  %804 = vmatpush1.msra.mxu1 %v466_v4  ;;  %v411_v1 = vld [vmem:[#allocation8 + $0x378] sm:$0xff]  ;;  %v410_v3 = vld [vmem:[#allocation8 + $0x370] sm:$0xff] }
 0x12c   :  { %734 = vmatprep.subr.mxu0 %v335_v5  ;;  %805 = vmatprep.subr.mxu1 %v463_v6  ;;  %v539_v2 = vld [vmem:[#allocation8 + $0x778] sm:$0xff]  ;;  %v538_v4 = vld [vmem:[#allocation8 + $0x770] sm:$0xff] }
 0x12d   :  { %735 = vmatpush1.msra.mxu0 %v334_v7  ;;  %806 = vmatpush1.msra.mxu1 %v462_v8  ;;  %v407_v5 = vld [vmem:[#allocation8 + $0x358] sm:$0xff]  ;;  %v406_v7 = vld [vmem:[#allocation8 + $0x350] sm:$0xff] }
 0x12e   :  { %736 = vmatprep.subr.mxu0 %v331_v9  ;;  %807 = vmatprep.subr.mxu1 %v459_v10  ;;  %v535_v6 = vld [vmem:[#allocation8 + $0x758] sm:$0xff]  ;;  %v534_v8 = vld [vmem:[#allocation8 + $0x750] sm:$0xff] }
 0x12f   :  { %737 = vmatpush1.msra.mxu0 %v330_v11  ;;  %808 = vmatpush1.msra.mxu1 %v458_v12  ;;  %v403_v9 = vld [vmem:[#allocation8 + $0x338] sm:$0xff]  ;;  %v402_v11 = vld [vmem:[#allocation8 + $0x330] sm:$0xff] }
 0x130   :  { %738 = vmatprep.subr.mxu0 %v327_v13  ;;  %809 = vmatprep.subr.mxu1 %v455_v14  ;;  %v531_v10 = vld [vmem:[#allocation8 + $0x738] sm:$0xff]  ;;  %v530_v12 = vld [vmem:[#allocation8 + $0x730] sm:$0xff] }
 0x131   :  { %739 = vmatpush1.msra.mxu0 %v326_v15  ;;  %810 = vmatpush1.msra.mxu1 %v454_v16  ;;  %v399_v13 = vld [vmem:[#allocation8 + $0x318] sm:$0xff]  ;;  %v398_v15 = vld [vmem:[#allocation8 + $0x310] sm:$0xff] }
 0x132   :  { %740 = vmatprep.subr.mxu0 %v323_v17  ;;  %811 = vmatprep.subr.mxu1 %v451_v18  ;;  %v527_v14 = vld [vmem:[#allocation8 + $0x718] sm:$0xff]  ;;  %v526_v16 = vld [vmem:[#allocation8 + $0x710] sm:$0xff] }
 0x133   :  { %741 = vmatpush1.msra.mxu0 %v322_v19  ;;  %812 = vmatpush1.msra.mxu1 %v450_v20  ;;  %v395_v17 = vld [vmem:[#allocation8 + $0x2f8] sm:$0xff]  ;;  %v394_v19 = vld [vmem:[#allocation8 + $0x2f0] sm:$0xff] }
 0x134   :  { %742 = vmatprep.subr.mxu0 %v319_v21  ;;  %813 = vmatprep.subr.mxu1 %v447_v24  ;;  %v523_v18 = vld [vmem:[#allocation8 + $0x6f8] sm:$0xff]  ;;  %v522_v20 = vld [vmem:[#allocation8 + $0x6f0] sm:$0xff] }
 0x135   :  { %743 = vmatpush1.msra.mxu0 %v318_v27  ;;  %814 = vmatpush1.msra.mxu1 %v446_v28  ;;  %v391_v21 = vld [vmem:[#allocation8 + $0x2d8] sm:$0xff]  ;;  %v390_v27 = vld [vmem:[#allocation8 + $0x2d0] sm:$0xff] }
 0x136   :  { %744 = vmatprep.subr.mxu0 %v315_v29  ;;  %815 = vmatprep.subr.mxu1 %v443_v30  ;;  %v519_v24 = vld [vmem:[#allocation8 + $0x6d8] sm:$0xff]  ;;  %v518_v28 = vld [vmem:[#allocation8 + $0x6d0] sm:$0xff] }
 0x137   :  { %745 = vmatpush1.msra.mxu0 %v314_v31  ;;  %816 = vmatpush1.msra.mxu1 %v442_v32  ;;  %v387_v29 = vld [vmem:[#allocation8 + $0x2b8] sm:$0xff]  ;;  %v386_v31 = vld [vmem:[#allocation8 + $0x2b0] sm:$0xff] }
 0x138   :  { %746 = vmatprep.subr.mxu0 %v311_v35  ;;  %817 = vmatprep.subr.mxu1 %v439_v36  ;;  %v515_v30 = vld [vmem:[#allocation8 + $0x6b8] sm:$0xff]  ;;  %v514_v32 = vld [vmem:[#allocation8 + $0x6b0] sm:$0xff] }
 0x139   :  { %747 = vmatpush1.msra.mxu0 %v310_v37  ;;  %818 = vmatpush1.msra.mxu1 %v438_v38  ;;  %v383_v35 = vld [vmem:[#allocation8 + $0x298] sm:$0xff]  ;;  %v382_v37 = vld [vmem:[#allocation8 + $0x290] sm:$0xff] }
 0x13a   :  { %748 = vmatprep.subr.mxu0 %v307_v40  ;;  %819 = vmatprep.subr.mxu1 %v435_v41  ;;  %v511_v36 = vld [vmem:[#allocation8 + $0x698] sm:$0xff]  ;;  %v510_v38 = vld [vmem:[#allocation8 + $0x690] sm:$0xff] }
 0x13b   :  { %749 = vmatpush1.msra.mxu0 %v306_v43  ;;  %820 = vmatpush1.msra.mxu1 %v434_v44  ;;  %v379_v40 = vld [vmem:[#allocation8 + $0x278] sm:$0xff]  ;;  %v378_v43 = vld [vmem:[#allocation8 + $0x270] sm:$0xff] }
 0x13c   :  { %750 = vmatprep.subr.mxu0 %v303_v45  ;;  %821 = vmatprep.subr.mxu1 %v431_v46  ;;  %v507_v41 = vld [vmem:[#allocation8 + $0x678] sm:$0xff]  ;;  %v506_v44 = vld [vmem:[#allocation8 + $0x670] sm:$0xff] }
 0x13d   :  { %751 = vmatpush1.msra.mxu0 %v302_v47  ;;  %822 = vmatpush1.msra.mxu1 %v430_v48  ;;  %v375_v45 = vld [vmem:[#allocation8 + $0x258] sm:$0xff]  ;;  %v374_v47 = vld [vmem:[#allocation8 + $0x250] sm:$0xff] }
 0x13e   :  { %752 = vmatprep.subr.mxu0 %v427_v49  ;;  %823 = vmatprep.subr.mxu1 %v555_v50  ;;  %v503_v46 = vld [vmem:[#allocation8 + $0x658] sm:$0xff]  ;;  %v502_v48 = vld [vmem:[#allocation8 + $0x650] sm:$0xff] }
 0x13f   :  { %753 = vmatpush2.msra.mxu0 %v426_v51  ;;  %824 = vmatpush2.msra.mxu1 %v554_v52  ;;  %v371_v49 = vld [vmem:[#allocation8 + $0x238] sm:$0xff]  ;;  %v370_v51 = vld [vmem:[#allocation8 + $0x230] sm:$0xff] }
 0x140   :  { %754 = vmatprep.subr.mxu0 %v423_v53  ;;  %825 = vmatprep.subr.mxu1 %v551_v54  ;;  %v499_v50 = vld [vmem:[#allocation8 + $0x638] sm:$0xff]  ;;  %v498_v52 = vld [vmem:[#allocation8 + $0x630] sm:$0xff] }
 0x141   :  { %755 = vmatpush2.msra.mxu0 %v422_v55  ;;  %826 = vmatpush2.msra.mxu1 %v550_v56  ;;  %v367_v53 = vld [vmem:[#allocation8 + $0x218] sm:$0xff]  ;;  %v366_v55 = vld [vmem:[#allocation8 + $0x210] sm:$0xff] }
 0x142   :  { %756 = vmatprep.subr.mxu0 %v419_v57  ;;  %827 = vmatprep.subr.mxu1 %v547_v58  ;;  %v495_v54 = vld [vmem:[#allocation8 + $0x618] sm:$0xff]  ;;  %v494_v56 = vld [vmem:[#allocation8 + $0x610] sm:$0xff]  ;;  %v927_v57 = vld [vmem:[#allocation10 + $0x1e8] sm:$0xff] }
 0x143   :  { %757 = vmatpush2.msra.mxu0 %v418_v59  ;;  %828 = vmatpush2.msra.mxu1 %v546_v60  ;;  %v926_v58 = vld [vmem:[#allocation10 + $0x1e0] sm:$0xff]  ;;  %v923_v59 = vld [vmem:[#allocation10 + $0x1c8] sm:$0xff] }
 0x144   :  { %758 = vmatprep.subr.mxu0 %v415_v61  ;;  %829 = vmatprep.subr.mxu1 %v543_v62  ;;  %v922_v60 = vld [vmem:[#allocation10 + $0x1c0] sm:$0xff]  ;;  %v919_v61 = vld [vmem:[#allocation10 + $0x1a8] sm:$0xff] }
 0x145   :  { %759 = vmatpush2.msra.mxu0 %v414_v63  ;;  %830 = vmatpush2.msra.mxu1 %v542_v0  ;;  %v918_v62 = vld [vmem:[#allocation10 + $0x1a0] sm:$0xff]  ;;  %v915_v63 = vld [vmem:[#allocation10 + $0x188] sm:$0xff] }
 0x146   :  { %760 = vmatprep.subr.mxu0 %v411_v1  ;;  %831 = vmatprep.subr.mxu1 %v539_v2  ;;  %v914_v0 = vld [vmem:[#allocation10 + $0x180] sm:$0xff]  ;;  %v911_v1 = vld [vmem:[#allocation10 + $0x168] sm:$0xff] }
 0x147   :  { %761 = vmatpush2.msra.mxu0 %v410_v3  ;;  %832 = vmatpush2.msra.mxu1 %v538_v4  ;;  %v910_v2 = vld [vmem:[#allocation10 + $0x160] sm:$0xff]  ;;  %v1051_v3 = vld [vmem:[#allocation10 + $0x5c8] sm:$0xff] }
 0x148   :  { %762 = vmatprep.subr.mxu0 %v407_v5  ;;  %833 = vmatprep.subr.mxu1 %v535_v6  ;;  %v903_v4 = vld [vmem:[#allocation10 + $0x128] sm:$0xff]  ;;  %v1050_v5 = vld [vmem:[#allocation10 + $0x5c0] sm:$0xff] }
 0x149   :  { %763 = vmatpush2.msra.mxu0 %v406_v7  ;;  %834 = vmatpush2.msra.mxu1 %v534_v8  ;;  %v902_v6 = vld [vmem:[#allocation10 + $0x120] sm:$0xff]  ;;  %v1047_v7 = vld [vmem:[#allocation10 + $0x5a8] sm:$0xff] }
 0x14a   :  { %764 = vmatprep.subr.mxu0 %v403_v9  ;;  %835 = vmatprep.subr.mxu1 %v531_v10  ;;  %v899_v8 = vld [vmem:[#allocation10 + $0x108] sm:$0xff]  ;;  %v1046_v9 = vld [vmem:[#allocation10 + $0x5a0] sm:$0xff] }
 0x14b   :  { %765 = vmatpush2.msra.mxu0 %v402_v11  ;;  %836 = vmatpush2.msra.mxu1 %v530_v12  ;;  %v898_v10 = vld [vmem:[#allocation10 + $0x100] sm:$0xff]  ;;  %v1043_v11 = vld [vmem:[#allocation10 + $0x588] sm:$0xff] }
 0x14c   :  { %766 = vmatprep.subr.mxu0 %v399_v13  ;;  %837 = vmatprep.subr.mxu1 %v527_v14  ;;  %v895_v12 = vld [vmem:[#allocation10 + $0xe8] sm:$0xff]  ;;  %v1042_v13 = vld [vmem:[#allocation10 + $0x580] sm:$0xff] }
 0x14d   :  { %767 = vmatpush2.msra.mxu0 %v398_v15  ;;  %838 = vmatpush2.msra.mxu1 %v526_v16  ;;  %v894_v14 = vld [vmem:[#allocation10 + $0xe0] sm:$0xff]  ;;  %v1039_v15 = vld [vmem:[#allocation10 + $0x568] sm:$0xff] }
 0x14e   :  { %768 = vmatprep.subr.mxu0 %v395_v17  ;;  %839 = vmatprep.subr.mxu1 %v523_v18  ;;  %v891_v16 = vld [vmem:[#allocation10 + $0xc8] sm:$0xff]  ;;  %v1038_v17 = vld [vmem:[#allocation10 + $0x560] sm:$0xff] }
 0x14f   :  { %769 = vmatpush2.msra.mxu0 %v394_v19  ;;  %840 = vmatpush2.msra.mxu1 %v522_v20  ;;  %v890_v18 = vld [vmem:[#allocation10 + $0xc0] sm:$0xff]  ;;  %v1035_v19 = vld [vmem:[#allocation10 + $0x548] sm:$0xff] }
 0x150   :  { %770 = vmatprep.subr.mxu0 %v391_v21  ;;  %841 = vmatprep.subr.mxu1 %v519_v24  ;;  %v887_v20 = vld [vmem:[#allocation10 + $0xa8] sm:$0xff]  ;;  %v1034_v21 = vld [vmem:[#allocation10 + $0x540] sm:$0xff] }
 0x151   :  { %771 = vmatpush2.msra.mxu0 %v390_v27  ;;  %842 = vmatpush2.msra.mxu1 %v518_v28  ;;  %v886_v24 = vld [vmem:[#allocation10 + $0xa0] sm:$0xff]  ;;  %v1031_v27 = vld [vmem:[#allocation10 + $0x528] sm:$0xff] }
 0x152   :  { %772 = vmatprep.subr.mxu0 %v387_v29  ;;  %843 = vmatprep.subr.mxu1 %v515_v30  ;;  %v883_v28 = vld [vmem:[#allocation10 + $0x88] sm:$0xff]  ;;  %v1030_v29 = vld [vmem:[#allocation10 + $0x520] sm:$0xff] }
 0x153   :  { %773 = vmatpush2.msra.mxu0 %v386_v31  ;;  %844 = vmatpush2.msra.mxu1 %v514_v32  ;;  %v882_v30 = vld [vmem:[#allocation10 + $0x80] sm:$0xff]  ;;  %v1027_v31 = vld [vmem:[#allocation10 + $0x508] sm:$0xff] }
 0x154   :  { %774 = vmatprep.subr.mxu0 %v383_v35  ;;  %845 = vmatprep.subr.mxu1 %v511_v36  ;;  %v879_v32 = vld [vmem:[#allocation10 + $0x68] sm:$0xff]  ;;  %v1026_v35 = vld [vmem:[#allocation10 + $0x500] sm:$0xff] }
 0x155   :  { %775 = vmatpush2.msra.mxu0 %v382_v37  ;;  %846 = vmatpush2.msra.mxu1 %v510_v38  ;;  %v878_v36 = vld [vmem:[#allocation10 + $0x60] sm:$0xff]  ;;  %v1023_v37 = vld [vmem:[#allocation10 + $0x4e8] sm:$0xff] }
 0x156   :  { %776 = vmatprep.subr.mxu0 %v379_v40  ;;  %847 = vmatprep.subr.mxu1 %v507_v41  ;;  %v875_v38 = vld [vmem:[#allocation10 + $0x48] sm:$0xff]  ;;  %v1022_v40 = vld [vmem:[#allocation10 + $0x4e0] sm:$0xff] }
 0x157   :  { %777 = vmatpush2.msra.mxu0 %v378_v43  ;;  %848 = vmatpush2.msra.mxu1 %v506_v44  ;;  %v874_v41 = vld [vmem:[#allocation10 + $0x40] sm:$0xff]  ;;  %v1019_v43 = vld [vmem:[#allocation10 + $0x4c8] sm:$0xff] }
 0x158   :  { %778 = vmatprep.subr.mxu0 %v375_v45  ;;  %849 = vmatprep.subr.mxu1 %v503_v46  ;;  %v871_v44 = vld [vmem:[#allocation10 + $0x28] sm:$0xff]  ;;  %v1018_v45 = vld [vmem:[#allocation10 + $0x4c0] sm:$0xff] }
 0x159   :  { %779 = vmatpush2.msra.mxu0 %v374_v47  ;;  %850 = vmatpush2.msra.mxu1 %v502_v48  ;;  %v870_v46 = vld [vmem:[#allocation10 + $0x20] sm:$0xff]  ;;  %v1015_v47 = vld [vmem:[#allocation10 + $0x4a8] sm:$0xff] }
 0x15a   :  { %780 = vmatprep.subr.mxu0 %v371_v49  ;;  %851 = vmatprep.subr.mxu1 %v499_v50  ;;  %v867_v48 = vld [vmem:[#allocation10 + $0x8] sm:$0xff]  ;;  %v1014_v49 = vld [vmem:[#allocation10 + $0x4a0] sm:$0xff] }
 0x15b   :  { %781 = vmatpush2.msra.mxu0 %v370_v51  ;;  %852 = vmatpush2.msra.mxu1 %v498_v52  ;;  %v866_v50 = vld [vmem:[#allocation10] sm:$0xff]  ;;  %v1011_v51 = vld [vmem:[#allocation10 + $0x488] sm:$0xff] }
 0x15c   :  { %782 = vmatprep.subr.mxu0 %v367_v53  ;;  %853 = vmatprep.subr.mxu1 %v495_v54  ;;  %v991_v52 = vld [vmem:[#allocation10 + $0x3e8] sm:$0xff]  ;;  %v1010_v53 = vld [vmem:[#allocation10 + $0x480] sm:$0xff] }
 0x15d   :  { %783 = vmatpush2.msra.mxu0 %v366_v55  ;;  %854 = vmatpush2.msra.mxu1 %v494_v56  ;;  %v990_v54 = vld [vmem:[#allocation10 + $0x3e0] sm:$0xff]  ;;  %v1007_v55 = vld [vmem:[#allocation10 + $0x468] sm:$0xff] }
 0x15e   :  { %785 = vmatmul.mubr.f32.vlgmr.msra.gmra.mxu0 %v296_v42  ;;  %856 = vmatmul.mubr.f32.vlgmr.msra.gmra.mxu1 %v298_v39  ;;  %v907_v42 = vld [vmem:[#allocation10 + $0x148] sm:$0xff]  ;;  %v906_v39 = vld [vmem:[#allocation10 + $0x140] sm:$0xff] }
 0x15f   :  { %1144 = vmatprep.subr.mxu0 %v927_v57  ;;  %1215 = vmatprep.subr.mxu1 %v1055_v34  ;;  %v987_v56 = vld [vmem:[#allocation10 + $0x3c8] sm:$0xff]  ;;  %v1006_v57 = vld [vmem:[#allocation10 + $0x460] sm:$0xff] }
 0x160   :  { %1145 = vmatpush1.msra.mxu0 %v926_v58  ;;  %1216 = vmatpush1.msra.mxu1 %v1054_v33  ;;  %v986_v58 = vld [vmem:[#allocation10 + $0x3c0] sm:$0xff]  ;;  %v995_v34 = vld [vmem:[#allocation10 + $0x408] sm:$0xff] }
 0x161   :  { %1146 = vmatprep.subr.mxu0 %v923_v59  ;;  %1217 = vmatprep.subr.mxu1 %v1051_v3  ;;  %v1003_v59 = vld [vmem:[#allocation10 + $0x448] sm:$0xff]  ;;  %v994_v33 = vld [vmem:[#allocation10 + $0x400] sm:$0xff] }
 0x162   :  { %1147 = vmatpush1.msra.mxu0 %v922_v60  ;;  %1218 = vmatpush1.msra.mxu1 %v1050_v5  ;;  %v983_v60 = vld [vmem:[#allocation10 + $0x3a8] sm:$0xff]  ;;  %v1118_v5 = vld [vmem:[#allocation10 + $0x7e0] sm:$0xff] }
 0x163   :  { %1148 = vmatprep.subr.mxu0 %v919_v61  ;;  %1219 = vmatprep.subr.mxu1 %v1047_v7  ;;  %v1002_v61 = vld [vmem:[#allocation10 + $0x440] sm:$0xff]  ;;  %v1119_v3 = vld [vmem:[#allocation10 + $0x7e8] sm:$0xff] }
 0x164   :  { %1149 = vmatpush1.msra.mxu0 %v918_v62  ;;  %1220 = vmatpush1.msra.mxu1 %v1046_v9  ;;  %v982_v62 = vld [vmem:[#allocation10 + $0x3a0] sm:$0xff]  ;;  %v1115_v7 = vld [vmem:[#allocation10 + $0x7c8] sm:$0xff] }
 0x165   :  { %1150 = vmatprep.subr.mxu0 %v915_v63  ;;  %1221 = vmatprep.subr.mxu1 %v1043_v11  ;;  %v999_v63 = vld [vmem:[#allocation10 + $0x428] sm:$0xff]  ;;  %v1114_v9 = vld [vmem:[#allocation10 + $0x7c0] sm:$0xff] }
 0x166   :  { %1151 = vmatpush1.msra.mxu0 %v914_v0  ;;  %1222 = vmatpush1.msra.mxu1 %v1042_v13  ;;  %v979_v0 = vld [vmem:[#allocation10 + $0x388] sm:$0xff]  ;;  %v1110_v13 = vld [vmem:[#allocation10 + $0x7a0] sm:$0xff] }
 0x167   :  { %1152 = vmatprep.subr.mxu0 %v911_v1  ;;  %1223 = vmatprep.subr.mxu1 %v1039_v15  ;;  %v998_v1 = vld [vmem:[#allocation10 + $0x420] sm:$0xff]  ;;  %v1111_v11 = vld [vmem:[#allocation10 + $0x7a8] sm:$0xff] }
 0x168   :  { %1153 = vmatpush1.msra.mxu0 %v910_v2  ;;  %1224 = vmatpush1.msra.mxu1 %v1038_v17  ;;  %v978_v2 = vld [vmem:[#allocation10 + $0x380] sm:$0xff]  ;;  %v1107_v15 = vld [vmem:[#allocation10 + $0x788] sm:$0xff] }
 0x169   :  { %1154 = vmatprep.subr.mxu0 %v907_v42  ;;  %1225 = vmatprep.subr.mxu1 %v1035_v19  ;;  %v975_v42 = vld [vmem:[#allocation10 + $0x368] sm:$0xff]  ;;  %v1106_v17 = vld [vmem:[#allocation10 + $0x780] sm:$0xff] }
 0x16a   :  { %1155 = vmatpush1.msra.mxu0 %v906_v39  ;;  %1226 = vmatpush1.msra.mxu1 %v1034_v21  ;;  %v974_v39 = vld [vmem:[#allocation10 + $0x360] sm:$0xff]  ;;  %v1103_v19 = vld [vmem:[#allocation10 + $0x768] sm:$0xff] }
 0x16b   :  { %1156 = vmatprep.subr.mxu0 %v903_v4  ;;  %1227 = vmatprep.subr.mxu1 %v1031_v27  ;;  %v971_v4 = vld [vmem:[#allocation10 + $0x348] sm:$0xff]  ;;  %v1102_v21 = vld [vmem:[#allocation10 + $0x760] sm:$0xff] }
 0x16c   :  { %1157 = vmatpush1.msra.mxu0 %v902_v6  ;;  %1228 = vmatpush1.msra.mxu1 %v1030_v29  ;;  %v970_v6 = vld [vmem:[#allocation10 + $0x340] sm:$0xff]  ;;  %v1099_v27 = vld [vmem:[#allocation10 + $0x748] sm:$0xff] }
 0x16d   :  { %1158 = vmatprep.subr.mxu0 %v899_v8  ;;  %1229 = vmatprep.subr.mxu1 %v1027_v31  ;;  %v967_v8 = vld [vmem:[#allocation10 + $0x328] sm:$0xff]  ;;  %v1098_v29 = vld [vmem:[#allocation10 + $0x740] sm:$0xff] }
 0x16e   :  { %1159 = vmatpush1.msra.mxu0 %v898_v10  ;;  %1230 = vmatpush1.msra.mxu1 %v1026_v35  ;;  %v966_v10 = vld [vmem:[#allocation10 + $0x320] sm:$0xff]  ;;  %v1095_v31 = vld [vmem:[#allocation10 + $0x728] sm:$0xff] }
 0x16f   :  { %1160 = vmatprep.subr.mxu0 %v895_v12  ;;  %1231 = vmatprep.subr.mxu1 %v1023_v37  ;;  %v963_v12 = vld [vmem:[#allocation10 + $0x308] sm:$0xff]  ;;  %v1094_v35 = vld [vmem:[#allocation10 + $0x720] sm:$0xff] }
 0x170   :  { %1161 = vmatpush1.msra.mxu0 %v894_v14  ;;  %1232 = vmatpush1.msra.mxu1 %v1022_v40  ;;  %v962_v14 = vld [vmem:[#allocation10 + $0x300] sm:$0xff]  ;;  %v1091_v37 = vld [vmem:[#allocation10 + $0x708] sm:$0xff] }
 0x171   :  { %1162 = vmatprep.subr.mxu0 %v891_v16  ;;  %1233 = vmatprep.subr.mxu1 %v1019_v43  ;;  %v959_v16 = vld [vmem:[#allocation10 + $0x2e8] sm:$0xff]  ;;  %v1090_v40 = vld [vmem:[#allocation10 + $0x700] sm:$0xff] }
 0x172   :  { %1163 = vmatpush1.msra.mxu0 %v890_v18  ;;  %1234 = vmatpush1.msra.mxu1 %v1018_v45  ;;  %v958_v18 = vld [vmem:[#allocation10 + $0x2e0] sm:$0xff]  ;;  %v1087_v43 = vld [vmem:[#allocation10 + $0x6e8] sm:$0xff] }
 0x173   :  { %1164 = vmatprep.subr.mxu0 %v887_v20  ;;  %1235 = vmatprep.subr.mxu1 %v1015_v47  ;;  %v955_v20 = vld [vmem:[#allocation10 + $0x2c8] sm:$0xff]  ;;  %v1086_v45 = vld [vmem:[#allocation10 + $0x6e0] sm:$0xff] }
 0x174   :  { %1165 = vmatpush1.msra.mxu0 %v886_v24  ;;  %1236 = vmatpush1.msra.mxu1 %v1014_v49  ;;  %v954_v24 = vld [vmem:[#allocation10 + $0x2c0] sm:$0xff]  ;;  %v1083_v47 = vld [vmem:[#allocation10 + $0x6c8] sm:$0xff] }
 0x175   :  { %1166 = vmatprep.subr.mxu0 %v883_v28  ;;  %1237 = vmatprep.subr.mxu1 %v1011_v51  ;;  %v951_v28 = vld [vmem:[#allocation10 + $0x2a8] sm:$0xff]  ;;  %v1082_v49 = vld [vmem:[#allocation10 + $0x6c0] sm:$0xff] }
 0x176   :  { %1167 = vmatpush1.msra.mxu0 %v882_v30  ;;  %1238 = vmatpush1.msra.mxu1 %v1010_v53  ;;  %v950_v30 = vld [vmem:[#allocation10 + $0x2a0] sm:$0xff]  ;;  %v1079_v51 = vld [vmem:[#allocation10 + $0x6a8] sm:$0xff] }
 0x177   :  { %1168 = vmatprep.subr.mxu0 %v879_v32  ;;  %1239 = vmatprep.subr.mxu1 %v1007_v55  ;;  %v947_v32 = vld [vmem:[#allocation10 + $0x288] sm:$0xff]  ;;  %v1078_v53 = vld [vmem:[#allocation10 + $0x6a0] sm:$0xff] }
 0x178   :  { %1169 = vmatpush1.msra.mxu0 %v878_v36  ;;  %1240 = vmatpush1.msra.mxu1 %v1006_v57  ;;  %v946_v36 = vld [vmem:[#allocation10 + $0x280] sm:$0xff]  ;;  %v1075_v55 = vld [vmem:[#allocation10 + $0x688] sm:$0xff] }
 0x179   :  { %1170 = vmatprep.subr.mxu0 %v875_v38  ;;  %1241 = vmatprep.subr.mxu1 %v1003_v59  ;;  %v943_v38 = vld [vmem:[#allocation10 + $0x268] sm:$0xff]  ;;  %v1074_v57 = vld [vmem:[#allocation10 + $0x680] sm:$0xff] }
 0x17a   :  { %1171 = vmatpush1.msra.mxu0 %v874_v41  ;;  %1242 = vmatpush1.msra.mxu1 %v1002_v61  ;;  %v942_v41 = vld [vmem:[#allocation10 + $0x260] sm:$0xff] }
 0x17b   :  { %1172 = vmatprep.subr.mxu0 %v871_v44  ;;  %1243 = vmatprep.subr.mxu1 %v999_v63  ;;  %v939_v44 = vld [vmem:[#allocation10 + $0x248] sm:$0xff]  ;;  %v1070_v59 = vld [vmem:[#allocation10 + $0x660] sm:$0xff] }
 0x17c   :  { %1173 = vmatpush1.msra.mxu0 %v870_v46  ;;  %1244 = vmatpush1.msra.mxu1 %v998_v1  ;;  %v938_v46 = vld [vmem:[#allocation10 + $0x240] sm:$0xff] }
 0x17d   :  { %1174 = vmatprep.subr.mxu0 %v867_v48  ;;  %1245 = vmatprep.subr.mxu1 %v995_v34  ;;  %v935_v48 = vld [vmem:[#allocation10 + $0x228] sm:$0xff]  ;;  %v1066_v61 = vld [vmem:[#allocation10 + $0x640] sm:$0xff]  ;;  %v2015_v34 = vld [vmem:[%s2056_s4] sm:$0xf] }
 0x17e   :  { %1175 = vmatpush1.msra.mxu0 %v866_v50  ;;  %1246 = vmatpush1.msra.mxu1 %v994_v33  ;;  %v934_v50 = vld [vmem:[#allocation10 + $0x220] sm:$0xff]  ;;  %v565_v33 = vrot.slane %v2015_v34, %v1990_v25 }
 0x17f   :  { %1176 = vmatprep.subr.mxu0 %v991_v52  ;;  %1247 = vmatprep.subr.mxu1 %v1119_v3  ;;  %v931_v52 = vld [vmem:[#allocation10 + $0x208] sm:$0xff]  ;;  %v1062_v63 = vld [vmem:[#allocation10 + $0x620] sm:$0xff] }
 0x180   :  { %1177 = vmatpush2.msra.mxu0 %v990_v54  ;;  %1248 = vmatpush2.msra.mxu1 %v1118_v5  ;;  %v930_v54 = vld [vmem:[#allocation10 + $0x200] sm:$0xff] }
 0x181   :  { %1178 = vmatprep.subr.mxu0 %v987_v56  ;;  %1249 = vmatprep.subr.mxu1 %v1115_v7  ;;  %v929_v56 = vld [vmem:[#allocation10 + $0x1f8] sm:$0xff]  ;;  %v1058_v1 = vld [vmem:[#allocation10 + $0x600] sm:$0xff] }
 0x182   :  { %1179 = vmatpush2.msra.mxu0 %v986_v58  ;;  %1250 = vmatpush2.msra.mxu1 %v1114_v9  ;;  %v1071_v58 = vld [vmem:[#allocation10 + $0x668] sm:$0xff] }
 0x183   :  { %1180 = vmatprep.subr.mxu0 %v983_v60  ;;  %1251 = vmatprep.subr.mxu1 %v1111_v11  ;;  %v1067_v60 = vld [vmem:[#allocation10 + $0x648] sm:$0xff] }
 0x184   :  { %1181 = vmatpush2.msra.mxu0 %v982_v62  ;;  %1252 = vmatpush2.msra.mxu1 %v1110_v13  ;;  %v1063_v62 = vld [vmem:[#allocation10 + $0x628] sm:$0xff]  ;;  %v925_v13 = vld [vmem:[#allocation10 + $0x1d8] sm:$0xff] }
 0x185   :  { %1182 = vmatprep.subr.mxu0 %v979_v0  ;;  %1253 = vmatprep.subr.mxu1 %v1107_v15  ;;  %v1059_v0 = vld [vmem:[#allocation10 + $0x608] sm:$0xff]  ;;  %v921_v15 = vld [vmem:[#allocation10 + $0x1b8] sm:$0xff] }
 0x186   :  { %1183 = vmatpush2.msra.mxu0 %v978_v2  ;;  %1254 = vmatpush2.msra.mxu1 %v1106_v17  ;;  %v1057_v2 = vld [vmem:[#allocation10 + $0x5f8] sm:$0xff] }
 0x187   :  { %1184 = vmatprep.subr.mxu0 %v975_v42  ;;  %1255 = vmatprep.subr.mxu1 %v1103_v19  ;;  %v561_v42 = vrot.slane %v2015_v34, %v1988_v23  ;;  %v917_v17 = vld [vmem:[#allocation10 + $0x198] sm:$0xff] }
 0x188   :  { %1185 = vmatpush2.msra.mxu0 %v974_v39  ;;  %1256 = vmatpush2.msra.mxu1 %v1102_v21  ;;  %v913_v19 = vld [vmem:[#allocation10 + $0x178] sm:$0xff] }
 0x189   :  { %1186 = vmatprep.subr.mxu0 %v971_v4  ;;  %1257 = vmatprep.subr.mxu1 %v1099_v27  ;;  %v909_v21 = vld [vmem:[#allocation10 + $0x158] sm:$0xff] }
 0x18a   :  { %1187 = vmatpush2.msra.mxu0 %v970_v6  ;;  %1258 = vmatpush2.msra.mxu1 %v1098_v29  ;;  %v905_v27 = vld [vmem:[#allocation10 + $0x138] sm:$0xff] }
 0x18b   :  { %1188 = vmatprep.subr.mxu0 %v967_v8  ;;  %1259 = vmatprep.subr.mxu1 %v1095_v31  ;;  %v901_v29 = vld [vmem:[#allocation10 + $0x118] sm:$0xff] }
 0x18c   :  { %1189 = vmatpush2.msra.mxu0 %v966_v10  ;;  %1260 = vmatpush2.msra.mxu1 %v1094_v35  ;;  %v897_v31 = vld [vmem:[#allocation10 + $0xf8] sm:$0xff] }
 0x18d   :  { %1190 = vmatprep.subr.mxu0 %v963_v12  ;;  %1261 = vmatprep.subr.mxu1 %v1091_v37  ;;  %v928_v12 = vld [vmem:[#allocation10 + $0x1f0] sm:$0xff]  ;;  %v893_v35 = vld [vmem:[#allocation10 + $0xd8] sm:$0xff] }
 0x18e   :  { %1191 = vmatpush2.msra.mxu0 %v962_v14  ;;  %1262 = vmatpush2.msra.mxu1 %v1090_v40  ;;  %v924_v14 = vld [vmem:[#allocation10 + $0x1d0] sm:$0xff]  ;;  %v889_v37 = vld [vmem:[#allocation10 + $0xb8] sm:$0xff] }
 0x18f   :  { %1192 = vmatprep.subr.mxu0 %v959_v16  ;;  %1263 = vmatprep.subr.mxu1 %v1087_v43  ;;  %v920_v16 = vld [vmem:[#allocation10 + $0x1b0] sm:$0xff]  ;;  %v885_v40 = vld [vmem:[#allocation10 + $0x98] sm:$0xff] }
 0x190   :  { %1193 = vmatpush2.msra.mxu0 %v958_v18  ;;  %1264 = vmatpush2.msra.mxu1 %v1086_v45  ;;  %v916_v18 = vld [vmem:[#allocation10 + $0x190] sm:$0xff]  ;;  %v881_v43 = vld [vmem:[#allocation10 + $0x78] sm:$0xff] }
 0x191   :  { %1194 = vmatprep.subr.mxu0 %v955_v20  ;;  %1265 = vmatprep.subr.mxu1 %v1083_v47  ;;  %v912_v20 = vld [vmem:[#allocation10 + $0x170] sm:$0xff]  ;;  %v877_v45 = vld [vmem:[#allocation10 + $0x58] sm:$0xff] }
 0x192   :  { %1195 = vmatpush2.msra.mxu0 %v954_v24  ;;  %1266 = vmatpush2.msra.mxu1 %v1082_v49  ;;  %v908_v24 = vld [vmem:[#allocation10 + $0x150] sm:$0xff]  ;;  %v873_v47 = vld [vmem:[#allocation10 + $0x38] sm:$0xff] }
 0x193   :  { %1196 = vmatprep.subr.mxu0 %v951_v28  ;;  %1267 = vmatprep.subr.mxu1 %v1079_v51  ;;  %v904_v28 = vld [vmem:[#allocation10 + $0x130] sm:$0xff]  ;;  %v869_v49 = vld [vmem:[#allocation10 + $0x18] sm:$0xff] }
 0x194   :  { %1197 = vmatpush2.msra.mxu0 %v950_v30  ;;  %1268 = vmatpush2.msra.mxu1 %v1078_v53  ;;  %v900_v30 = vld [vmem:[#allocation10 + $0x110] sm:$0xff]  ;;  %v993_v51 = vld [vmem:[#allocation10 + $0x3f8] sm:$0xff] }
 0x195   :  { %1198 = vmatprep.subr.mxu0 %v947_v32  ;;  %1269 = vmatprep.subr.mxu1 %v1075_v55  ;;  %v896_v32 = vld [vmem:[#allocation10 + $0xf0] sm:$0xff]  ;;  %v989_v53 = vld [vmem:[#allocation10 + $0x3d8] sm:$0xff] }
 0x196   :  { %1199 = vmatpush2.msra.mxu0 %v946_v36  ;;  %1270 = vmatpush2.msra.mxu1 %v1074_v57  ;;  %v892_v36 = vld [vmem:[#allocation10 + $0xd0] sm:$0xff]  ;;  %v985_v55 = vld [vmem:[#allocation10 + $0x3b8] sm:$0xff] }
 0x197   :  { %1200 = vmatprep.subr.mxu0 %v943_v38  ;;  %1271 = vmatprep.subr.mxu1 %v1071_v58  ;;  %v888_v38 = vld [vmem:[#allocation10 + $0xb0] sm:$0xff]  ;;  %v981_v57 = vld [vmem:[#allocation10 + $0x398] sm:$0xff] }
 0x198   :  { %1201 = vmatpush2.msra.mxu0 %v942_v41  ;;  %1272 = vmatpush2.msra.mxu1 %v1070_v59  ;;  %v884_v41 = vld [vmem:[#allocation10 + $0x90] sm:$0xff]  ;;  %v977_v59 = vld [vmem:[#allocation10 + $0x378] sm:$0xff] }
 0x199   :  { %1202 = vmatprep.subr.mxu0 %v939_v44  ;;  %1273 = vmatprep.subr.mxu1 %v1067_v60  ;;  %v880_v44 = vld [vmem:[#allocation10 + $0x70] sm:$0xff] }
 0x19a   :  { %1203 = vmatpush2.msra.mxu0 %v938_v46  ;;  %1274 = vmatpush2.msra.mxu1 %v1066_v61  ;;  %v876_v46 = vld [vmem:[#allocation10 + $0x50] sm:$0xff]  ;;  %v973_v61 = vld [vmem:[#allocation10 + $0x358] sm:$0xff] }
 0x19b   :  { %1204 = vmatprep.subr.mxu0 %v935_v48  ;;  %1275 = vmatprep.subr.mxu1 %v1063_v62  ;;  %v872_v48 = vld [vmem:[#allocation10 + $0x30] sm:$0xff] }
 0x19c   :  { %1205 = vmatpush2.msra.mxu0 %v934_v50  ;;  %1276 = vmatpush2.msra.mxu1 %v1062_v63  ;;  %v868_v50 = vld [vmem:[#allocation10 + $0x10] sm:$0xff]  ;;  %v969_v63 = vld [vmem:[#allocation10 + $0x338] sm:$0xff] }
 0x19d   :  { %1206 = vmatprep.subr.mxu0 %v931_v52  ;;  %1277 = vmatprep.subr.mxu1 %v1059_v0  ;;  %v992_v52 = vld [vmem:[#allocation10 + $0x3f0] sm:$0xff] }
 0x19e   :  { %1207 = vmatpush2.msra.mxu0 %v930_v54  ;;  %1278 = vmatpush2.msra.mxu1 %v1058_v1  ;;  %v988_v54 = vld [vmem:[#allocation10 + $0x3d0] sm:$0xff]  ;;  %v965_v1 = vld [vmem:[#allocation10 + $0x318] sm:$0xff] }
 0x19f   :  { %1286 = vmatprep.subr.mxu0 %v929_v56  ;;  %1357 = vmatprep.subr.mxu1 %v1057_v2  ;;  %v984_v56 = vld [vmem:[#allocation10 + $0x3b0] sm:$0xff] }
 0x1a0   :  { %v980_v58 = vld [vmem:[#allocation10 + $0x390] sm:$0xff] }
 0x1a1   :  { %v976_v60 = vld [vmem:[#allocation10 + $0x370] sm:$0xff] }
 0x1a2   :  { %v972_v62 = vld [vmem:[#allocation10 + $0x350] sm:$0xff] }
 0x1a3   :  { %v968_v0 = vld [vmem:[#allocation10 + $0x330] sm:$0xff] }
 0x1a4   :  { %v964_v2 = vld [vmem:[#allocation10 + $0x310] sm:$0xff] }
 0x1dd   :  { %v644_v39 = vpop.f32.mrf.mxu0  ;;  %v715_v3 = vpop.f32.mrf.mxu1 }
 0x1de   :  { %v645_v4 = vadd.f32 %v644_v39, %v561_v42  ;;  %v961_v42 = vld [vmem:[#allocation10 + $0x2f8] sm:$0xff] }
 0x1df   :  { %v646_v5 = vpop.f32.mrf.mxu0  ;;  %v717_v8 = vpop.f32.mrf.mxu1  ;;  %v957_v39 = vld [vmem:[#allocation10 + $0x2d8] sm:$0xff] }
 0x1e0   :  { %v647_v6 = vadd.f32 %v646_v5, %v565_v33  ;;  %v2021_v7 = vadd.f32 %v715_v3, %v645_v4  ;;  %v960_v33 = vld [vmem:[#allocation10 + $0x2f0] sm:$0xff]  ;;  %v953_v4 = vld [vmem:[#allocation10 + $0x2b8] sm:$0xff] }
 0x1e1   :  { %v956_v3 = vld [vmem:[#allocation10 + $0x2d0] sm:$0xff] }
 0x1e2   :  { %v718_v9 = vadd.f32 %v717_v8, %v647_v6  ;;  %v862_v11 = vmax.f32 %v2021_v7, 0.0  ;;  %v952_v5 = vld [vmem:[#allocation10 + $0x2b0] sm:$0xff]  ;;  %v949_v6 = vld [vmem:[#allocation10 + $0x298] sm:$0xff]  ;;  %v569_v8 = vrot.slane %v2015_v34, %v1986_v22 }
 0x1e3   :  { %v1044_v7 = vld [vmem:[#allocation10 + $0x590] sm:$0xff] }
 0x1e4   :  { %v863_v10 = vmax.f32 %v718_v9, 0.0  ;;  %v948_v9 = vld [vmem:[#allocation10 + $0x290] sm:$0xff] }
 0x1e6   :  { %1208 = vmatprep.mubr.f32.mxu0 %v863_v10 }
 0x1e7   :  { %1209 = vmatmul.mubr.f32.vlgmr.msra.gmra.mxu0 %v862_v11 }
 0x1e8   :  { %1287 = vmatpush1.msra.mxu0 %v928_v12  ;;  %1350 = vmatprep.mubr.f32.mxu0 %v863_v10  ;;  %v945_v10 = vld [vmem:[#allocation10 + $0x278] sm:$0xff]  ;;  %v573_v12 = vrot.slane %v2015_v34, %v1992_v26 }
 0x1e9   :  { %1288 = vmatprep.subr.mxu0 %v925_v13  ;;  %v944_v13 = vld [vmem:[#allocation10 + $0x270] sm:$0xff] }
 0x1ea   :  { %1289 = vmatpush1.msra.mxu0 %v924_v14 }
 0x1eb   :  { %1290 = vmatprep.subr.mxu0 %v921_v15 }
 0x1ec   :  { %1291 = vmatpush1.msra.mxu0 %v920_v16  ;;  %v941_v16 = vld [vmem:[#allocation10 + $0x258] sm:$0xff] }
 0x1ed   :  { %1292 = vmatprep.subr.mxu0 %v917_v17 }
 0x1ee   :  { %1293 = vmatpush1.msra.mxu0 %v916_v18  ;;  %v940_v18 = vld [vmem:[#allocation10 + $0x250] sm:$0xff] }
 0x1ef   :  { %1294 = vmatprep.subr.mxu0 %v913_v19 }
 0x1f0   :  { %1295 = vmatpush1.msra.mxu0 %v912_v20  ;;  %v937_v20 = vld [vmem:[#allocation10 + $0x238] sm:$0xff] }
 0x1f1   :  { %1296 = vmatprep.subr.mxu0 %v909_v21 }
 0x1f2   :  { %1297 = vmatpush1.msra.mxu0 %v908_v24  ;;  %v936_v24 = vld [vmem:[#allocation10 + $0x230] sm:$0xff] }
 0x1f3   :  { %1298 = vmatprep.subr.mxu0 %v905_v27 }
 0x1f4   :  { %1299 = vmatpush1.msra.mxu0 %v904_v28 }
 0x1f5   :  { %1300 = vmatprep.subr.mxu0 %v901_v29  ;;  %v933_v29 = vld [vmem:[#allocation10 + $0x218] sm:$0xff] }
 0x1f6   :  { %1301 = vmatpush1.msra.mxu0 %v900_v30  ;;  %v932_v30 = vld [vmem:[#allocation10 + $0x210] sm:$0xff] }
 0x1f7   :  { %1302 = vmatprep.subr.mxu0 %v897_v31 }
 0x1f8   :  { %1303 = vmatpush1.msra.mxu0 %v896_v32 }
 0x1f9   :  { %1304 = vmatprep.subr.mxu0 %v893_v35  ;;  %v1056_v35 = vld [vmem:[#allocation10 + $0x5f0] sm:$0xff] }
 0x1fa   :  { %1305 = vmatpush1.msra.mxu0 %v892_v36  ;;  %v1053_v36 = vld [vmem:[#allocation10 + $0x5d8] sm:$0xff] }
 0x1fb   :  { %1306 = vmatprep.subr.mxu0 %v889_v37  ;;  %v1052_v37 = vld [vmem:[#allocation10 + $0x5d0] sm:$0xff] }
 0x1fc   :  { %1307 = vmatpush1.msra.mxu0 %v888_v38  ;;  %v1049_v38 = vld [vmem:[#allocation10 + $0x5b8] sm:$0xff] }
 0x1fd   :  { %1308 = vmatprep.subr.mxu0 %v885_v40  ;;  %v1048_v40 = vld [vmem:[#allocation10 + $0x5b0] sm:$0xff] }
 0x1fe   :  { %1309 = vmatpush1.msra.mxu0 %v884_v41  ;;  %v1463_v41 = vld [vmem:[#allocation11 + $0xf8] sm:$0xff] }
 0x1ff   :  { %1310 = vmatprep.subr.mxu0 %v881_v43  ;;  %v1447_v43 = vld [vmem:[#allocation11 + $0x78] sm:$0xff] }
 0x200   :  { %1311 = vmatpush1.msra.mxu0 %v880_v44  ;;  %v1462_v44 = vld [vmem:[#allocation11 + $0xf0] sm:$0xff] }
 0x201   :  { %1312 = vmatprep.subr.mxu0 %v877_v45  ;;  %v1045_v45 = vld [vmem:[#allocation10 + $0x598] sm:$0xff] }
 0x202   :  { %1313 = vmatpush1.msra.mxu0 %v876_v46  ;;  %v1446_v46 = vld [vmem:[#allocation11 + $0x70] sm:$0xff] }
 0x203   :  { %1314 = vmatprep.subr.mxu0 %v873_v47  ;;  %v1041_v47 = vld [vmem:[#allocation10 + $0x578] sm:$0xff] }
 0x204   :  { %1315 = vmatpush1.msra.mxu0 %v872_v48  ;;  %v1445_v48 = vld [vmem:[#allocation11 + $0x68] sm:$0xff] }
 0x205   :  { %1316 = vmatprep.subr.mxu0 %v869_v49  ;;  %v1040_v49 = vld [vmem:[#allocation10 + $0x570] sm:$0xff] }
 0x206   :  { %1317 = vmatpush1.msra.mxu0 %v868_v50  ;;  %v1460_v50 = vld [vmem:[#allocation11 + $0xe0] sm:$0xff] }
 0x207   :  { %1318 = vmatprep.subr.mxu0 %v993_v51  ;;  %v1037_v51 = vld [vmem:[#allocation10 + $0x558] sm:$0xff] }
 0x208   :  { %1319 = vmatpush2.msra.mxu0 %v992_v52  ;;  %v1444_v52 = vld [vmem:[#allocation11 + $0x60] sm:$0xff] }
 0x209   :  { %1320 = vmatprep.subr.mxu0 %v989_v53  ;;  %v1036_v53 = vld [vmem:[#allocation10 + $0x550] sm:$0xff] }
 0x20a   :  { %1321 = vmatpush2.msra.mxu0 %v988_v54  ;;  %v1459_v54 = vld [vmem:[#allocation11 + $0xd8] sm:$0xff] }
 0x20b   :  { %1322 = vmatprep.subr.mxu0 %v985_v55  ;;  %v1033_v55 = vld [vmem:[#allocation10 + $0x538] sm:$0xff] }
 0x20c   :  { %1323 = vmatpush2.msra.mxu0 %v984_v56  ;;  %v1443_v56 = vld [vmem:[#allocation11 + $0x58] sm:$0xff] }
 0x20d   :  { %1324 = vmatprep.subr.mxu0 %v981_v57  ;;  %v1032_v57 = vld [vmem:[#allocation10 + $0x530] sm:$0xff] }
 0x20e   :  { %1325 = vmatpush2.msra.mxu0 %v980_v58  ;;  %v1458_v58 = vld [vmem:[#allocation11 + $0xd0] sm:$0xff] }
 0x20f   :  { %1326 = vmatprep.subr.mxu0 %v977_v59  ;;  %v1029_v59 = vld [vmem:[#allocation10 + $0x518] sm:$0xff] }
 0x210   :  { %1327 = vmatpush2.msra.mxu0 %v976_v60  ;;  %v1442_v60 = vld [vmem:[#allocation11 + $0x50] sm:$0xff] }
 0x211   :  { %1328 = vmatprep.subr.mxu0 %v973_v61  ;;  %v1028_v61 = vld [vmem:[#allocation10 + $0x510] sm:$0xff] }
 0x212   :  { %1329 = vmatpush2.msra.mxu0 %v972_v62  ;;  %v1457_v62 = vld [vmem:[#allocation11 + $0xc8] sm:$0xff] }
 0x213   :  { %1330 = vmatprep.subr.mxu0 %v969_v63  ;;  %v1025_v63 = vld [vmem:[#allocation10 + $0x4f8] sm:$0xff] }
 0x214   :  { %1331 = vmatpush2.msra.mxu0 %v968_v0  ;;  %v1441_v0 = vld [vmem:[#allocation11 + $0x48] sm:$0xff] }
 0x215   :  { %1332 = vmatprep.subr.mxu0 %v965_v1  ;;  %v1024_v1 = vld [vmem:[#allocation10 + $0x4f0] sm:$0xff] }
 0x216   :  { %1333 = vmatpush2.msra.mxu0 %v964_v2  ;;  %v1456_v2 = vld [vmem:[#allocation11 + $0xc0] sm:$0xff] }
 0x217   :  { %1334 = vmatprep.subr.mxu0 %v961_v42  ;;  %v1021_v42 = vld [vmem:[#allocation10 + $0x4d8] sm:$0xff] }
 0x218   :  { %1335 = vmatpush2.msra.mxu0 %v960_v33  ;;  %v1440_v33 = vld [vmem:[#allocation11 + $0x40] sm:$0xff] }
 0x219   :  { %1336 = vmatprep.subr.mxu0 %v957_v39  ;;  %v1020_v39 = vld [vmem:[#allocation10 + $0x4d0] sm:$0xff] }
 0x21a   :  { %1337 = vmatpush2.msra.mxu0 %v956_v3  ;;  %v1455_v3 = vld [vmem:[#allocation11 + $0xb8] sm:$0xff] }
 0x21b   :  { %1338 = vmatprep.subr.mxu0 %v953_v4  ;;  %v1017_v4 = vld [vmem:[#allocation10 + $0x4b8] sm:$0xff] }
 0x21c   :  { %1339 = vmatpush2.msra.mxu0 %v952_v5  ;;  %v1439_v5 = vld [vmem:[#allocation11 + $0x38] sm:$0xff] }
 0x21d   :  { %1340 = vmatprep.subr.mxu0 %v949_v6  ;;  %v1016_v6 = vld [vmem:[#allocation10 + $0x4b0] sm:$0xff] }
 0x21e   :  { %v786_v14 = vpop.f32.mrf.mxu0  ;;  %v857_v15 = vpop.f32.mrf.mxu1  ;;  %1341 = vmatpush2.msra.mxu0 %v948_v9  ;;  %v1013_v9 = vld [vmem:[#allocation10 + $0x498] sm:$0xff] }
 0x21f   :  { %v787_v17 = vadd.f32 %v786_v14, %v569_v8  ;;  %1342 = vmatprep.subr.mxu0 %v945_v10  ;;  %v1454_v8 = vld [vmem:[#allocation11 + $0xb0] sm:$0xff]  ;;  %v1009_v14 = vld [vmem:[#allocation10 + $0x478] sm:$0xff] }
 0x220   :  { %v788_v19 = vpop.f32.mrf.mxu0  ;;  %1343 = vmatpush2.msra.mxu0 %v944_v13  ;;  %v859_v28 = vpop.f32.mrf.mxu1  ;;  %v1438_v10 = vld [vmem:[#allocation11 + $0x30] sm:$0xff]  ;;  %v1453_v13 = vld [vmem:[#allocation11 + $0xa8] sm:$0xff] }
 0x221   :  { %v789_v21 = vadd.f32 %v788_v19, %v573_v12  ;;  %1344 = vmatprep.subr.mxu0 %v941_v16  ;;  %v2030_v27 = vadd.f32 %v857_v15, %v787_v17  ;;  %v1012_v12 = vld [vmem:[#allocation10 + $0x490] sm:$0xff]  ;;  %v1437_v15 = vld [vmem:[#allocation11 + $0x28] sm:$0xff]  ;;  %v1452_v17 = vld [vmem:[#allocation11 + $0xa0] sm:$0xff] }
 0x222   :  { %1345 = vmatpush2.msra.mxu0 %v940_v18  ;;  %v1008_v16 = vld [vmem:[#allocation10 + $0x470] sm:$0xff]  ;;  %v1005_v18 = vld [vmem:[#allocation10 + $0x458] sm:$0xff]  ;;  %v1436_v19 = vld [vmem:[#allocation11 + $0x20] sm:$0xff] }
 0x223   :  { %v860_v34 = vadd.f32 %v859_v28, %v789_v21  ;;  %1346 = vmatprep.subr.mxu0 %v937_v20  ;;  %v864_v32 = vmax.f32 %v2030_v27, 0.0  ;;  %v1004_v20 = vld [vmem:[#allocation10 + $0x450] sm:$0xff]  ;;  %v1001_v21 = vld [vmem:[#allocation10 + $0x438] sm:$0xff] }
 0x224   :  { %1347 = vmatpush2.msra.mxu0 %v936_v24  ;;  %v1000_v24 = vld [vmem:[#allocation10 + $0x430] sm:$0xff]  ;;  %v997_v28 = vld [vmem:[#allocation10 + $0x418] sm:$0xff] }
 0x225   :  { %v865_v31 = vmax.f32 %v860_v34, 0.0  ;;  %1348 = vmatprep.subr.mxu0 %v933_v29  ;;  %v996_v29 = vld [vmem:[#allocation10 + $0x410] sm:$0xff]  ;;  %v1121_v34 = vld [vmem:[#allocation10 + $0x7f8] sm:$0xff] }
 0x226   :  { %1349 = vmatpush2.msra.mxu0 %v932_v30  ;;  %v1120_v30 = vld [vmem:[#allocation10 + $0x7f0] sm:$0xff] }
 0x227   :  { %1279 = vmatprep.mubr.f32.mxu1 %v865_v31  ;;  %1351 = vmatmul.mubr.f32.vlgmr.msra.gmra.mxu0 %v862_v11  ;;  %v1461_v11 = vld [vmem:[#allocation11 + $0xe8] sm:$0xff]  ;;  %v1494_v27 = vld [vmem:[#allocation11 + $0x1f0] sm:$0xff] }
 0x228   :  { %1280 = vmatmul.mubr.f32.vlgmr.msra.gmra.mxu1 %v864_v32  ;;  %1665 = vmatprep.subr.mxu0 %v1463_v41  ;;  %v1105_v41 = vld [vmem:[#allocation10 + $0x778] sm:$0xff] }
 0x229   :  { %1358 = vmatpush1.msra.mxu1 %v1056_v35  ;;  %1421 = vmatprep.mubr.f32.mxu1 %v865_v31  ;;  %v1117_v31 = vld [vmem:[#allocation10 + $0x7d8] sm:$0xff]  ;;  %v1116_v35 = vld [vmem:[#allocation10 + $0x7d0] sm:$0xff] }
 0x22a   :  { %1359 = vmatprep.subr.mxu1 %v1053_v36  ;;  %1666 = vmatpush3.msra.mxu0 %v1447_v43  ;;  %v1113_v36 = vld [vmem:[#allocation10 + $0x7b8] sm:$0xff]  ;;  %v1104_v43 = vld [vmem:[#allocation10 + $0x770] sm:$0xff] }
 0x22b   :  { %1360 = vmatpush1.msra.mxu1 %v1052_v37  ;;  %1667 = vmatprep.subr.mxu0 %v1462_v44  ;;  %v1112_v37 = vld [vmem:[#allocation10 + $0x7b0] sm:$0xff]  ;;  %v1101_v44 = vld [vmem:[#allocation10 + $0x758] sm:$0xff] }
 0x22c   :  { %1361 = vmatprep.subr.mxu1 %v1049_v38  ;;  %1668 = vmatpush3.msra.mxu0 %v1446_v46  ;;  %v1109_v38 = vld [vmem:[#allocation10 + $0x798] sm:$0xff] }
 0x22d   :  { %1362 = vmatpush1.msra.mxu1 %v1048_v40  ;;  %1669 = vmatprep.subr.mxu0 %v1461_v11  ;;  %v1108_v40 = vld [vmem:[#allocation10 + $0x790] sm:$0xff]  ;;  %v1097_v46 = vld [vmem:[#allocation10 + $0x738] sm:$0xff] }
 0x22e   :  { %1363 = vmatprep.subr.mxu1 %v1045_v45  ;;  %1670 = vmatpush3.msra.mxu0 %v1445_v48  ;;  %v1100_v45 = vld [vmem:[#allocation10 + $0x750] sm:$0xff]  ;;  %v1093_v11 = vld [vmem:[#allocation10 + $0x718] sm:$0xff] }
 0x22f   :  { %1364 = vmatpush1.msra.mxu1 %v1044_v7  ;;  %1671 = vmatprep.subr.mxu0 %v1460_v50  ;;  %v1096_v7 = vld [vmem:[#allocation10 + $0x730] sm:$0xff]  ;;  %v1089_v48 = vld [vmem:[#allocation10 + $0x6f8] sm:$0xff] }
 0x230   :  { %1365 = vmatprep.subr.mxu1 %v1041_v47  ;;  %1672 = vmatpush3.msra.mxu0 %v1444_v52  ;;  %v1092_v47 = vld [vmem:[#allocation10 + $0x710] sm:$0xff]  ;;  %v1085_v50 = vld [vmem:[#allocation10 + $0x6d8] sm:$0xff] }
 0x231   :  { %1366 = vmatpush1.msra.mxu1 %v1040_v49  ;;  %1673 = vmatprep.subr.mxu0 %v1459_v54  ;;  %v1088_v49 = vld [vmem:[#allocation10 + $0x6f0] sm:$0xff]  ;;  %v1081_v52 = vld [vmem:[#allocation10 + $0x6b8] sm:$0xff] }
 0x232   :  { %1367 = vmatprep.subr.mxu1 %v1037_v51  ;;  %1674 = vmatpush3.msra.mxu0 %v1443_v56  ;;  %v1084_v51 = vld [vmem:[#allocation10 + $0x6d0] sm:$0xff]  ;;  %v1077_v54 = vld [vmem:[#allocation10 + $0x698] sm:$0xff] }
 0x233   :  { %1368 = vmatpush1.msra.mxu1 %v1036_v53  ;;  %1675 = vmatprep.subr.mxu0 %v1458_v58  ;;  %v1080_v53 = vld [vmem:[#allocation10 + $0x6b0] sm:$0xff]  ;;  %v1073_v56 = vld [vmem:[#allocation10 + $0x678] sm:$0xff] }
 0x234   :  { %1369 = vmatprep.subr.mxu1 %v1033_v55  ;;  %1676 = vmatpush3.msra.mxu0 %v1442_v60  ;;  %v1076_v55 = vld [vmem:[#allocation10 + $0x690] sm:$0xff]  ;;  %v1069_v58 = vld [vmem:[#allocation10 + $0x658] sm:$0xff] }
 0x235   :  { %1370 = vmatpush1.msra.mxu1 %v1032_v57  ;;  %1677 = vmatprep.subr.mxu0 %v1457_v62  ;;  %v1072_v57 = vld [vmem:[#allocation10 + $0x670] sm:$0xff]  ;;  %v1065_v60 = vld [vmem:[#allocation10 + $0x638] sm:$0xff] }
 0x236   :  { %1371 = vmatprep.subr.mxu1 %v1029_v59  ;;  %1678 = vmatpush3.msra.mxu0 %v1441_v0  ;;  %v1068_v59 = vld [vmem:[#allocation10 + $0x650] sm:$0xff]  ;;  %v1061_v62 = vld [vmem:[#allocation10 + $0x618] sm:$0xff] }
 0x237   :  { %1372 = vmatpush1.msra.mxu1 %v1028_v61  ;;  %1679 = vmatprep.subr.mxu0 %v1456_v2  ;;  %v1064_v61 = vld [vmem:[#allocation10 + $0x630] sm:$0xff]  ;;  %v1451_v0 = vld [vmem:[#allocation11 + $0x98] sm:$0xff] }
 0x238   :  { %1373 = vmatprep.subr.mxu1 %v1025_v63  ;;  %1680 = vmatpush3.msra.mxu0 %v1440_v33  ;;  %v1060_v63 = vld [vmem:[#allocation10 + $0x610] sm:$0xff]  ;;  %v1449_v33 = vld [vmem:[#allocation11 + $0x88] sm:$0xff] }
 0x239   :  { %1374 = vmatpush1.msra.mxu1 %v1024_v1  ;;  %1681 = vmatprep.subr.mxu0 %v1455_v3  ;;  %v1435_v1 = vld [vmem:[#allocation11 + $0x18] sm:$0xff]  ;;  %v1450_v2 = vld [vmem:[#allocation11 + $0x90] sm:$0xff]  ;;  %v1448_v3 = vld [vmem:[#allocation11 + $0x80] sm:$0xff] }
 0x23a   :  { %1375 = vmatprep.subr.mxu1 %v1021_v42  ;;  %1682 = vmatpush3.msra.mxu0 %v1439_v5  ;;  %v1434_v42 = vld [vmem:[#allocation11 + $0x10] sm:$0xff]  ;;  %v1495_v5 = vld [vmem:[#allocation11 + $0x1f8] sm:$0xff] }
 0x23b   :  { %1376 = vmatpush1.msra.mxu1 %v1020_v39  ;;  %1683 = vmatprep.subr.mxu0 %v1454_v8  ;;  %v1433_v39 = vld [vmem:[#allocation11 + $0x8] sm:$0xff] }
 0x23c   :  { %1377 = vmatprep.subr.mxu1 %v1017_v4  ;;  %1684 = vmatpush3.msra.mxu0 %v1438_v10  ;;  %v1432_v4 = vld [vmem:[#allocation11] sm:$0xff]  ;;  %v1493_v8 = vld [vmem:[#allocation11 + $0x1e8] sm:$0xff] }
 0x23d   :  { %1378 = vmatpush1.msra.mxu1 %v1016_v6  ;;  %1685 = vmatprep.subr.mxu0 %v1453_v13  ;;  %v1479_v6 = vld [vmem:[#allocation11 + $0x178] sm:$0xff]  ;;  %v1492_v10 = vld [vmem:[#allocation11 + $0x1e0] sm:$0xff] }
 0x23e   :  { %1379 = vmatprep.subr.mxu1 %v1013_v9  ;;  %1686 = vmatpush3.msra.mxu0 %v1437_v15  ;;  %v1477_v9 = vld [vmem:[#allocation11 + $0x168] sm:$0xff]  ;;  %v1491_v13 = vld [vmem:[#allocation11 + $0x1d8] sm:$0xff]  ;;  %v1490_v15 = vld [vmem:[#allocation11 + $0x1d0] sm:$0xff] }
 0x23f   :  { %1380 = vmatpush1.msra.mxu1 %v1012_v12  ;;  %1687 = vmatprep.subr.mxu0 %v1452_v17  ;;  %v1476_v12 = vld [vmem:[#allocation11 + $0x160] sm:$0xff]  ;;  %v1489_v17 = vld [vmem:[#allocation11 + $0x1c8] sm:$0xff] }
 0x240   :  { %1381 = vmatprep.subr.mxu1 %v1009_v14  ;;  %1688 = vmatpush3.msra.mxu0 %v1436_v19  ;;  %v1475_v14 = vld [vmem:[#allocation11 + $0x158] sm:$0xff]  ;;  %v1488_v19 = vld [vmem:[#allocation11 + $0x1c0] sm:$0xff] }
 0x241   :  { %1382 = vmatpush1.msra.mxu1 %v1008_v16  ;;  %1689 = vmatprep.subr.mxu0 %v1451_v0  ;;  %v1474_v16 = vld [vmem:[#allocation11 + $0x150] sm:$0xff] }
 0x242   :  { %1383 = vmatprep.subr.mxu1 %v1005_v18  ;;  %1690 = vmatpush3.msra.mxu0 %v1435_v1  ;;  %v1473_v18 = vld [vmem:[#allocation11 + $0x148] sm:$0xff] }
 0x243   :  { %1384 = vmatpush1.msra.mxu1 %v1004_v20  ;;  %1691 = vmatprep.subr.mxu0 %v1450_v2  ;;  %v1472_v20 = vld [vmem:[#allocation11 + $0x140] sm:$0xff] }
 0x244   :  { %1385 = vmatprep.subr.mxu1 %v1001_v21  ;;  %1692 = vmatpush3.msra.mxu0 %v1434_v42  ;;  %v1487_v21 = vld [vmem:[#allocation11 + $0x1b8] sm:$0xff] }
 0x245   :  { %1386 = vmatpush1.msra.mxu1 %v1000_v24  ;;  %1693 = vmatprep.subr.mxu0 %v1449_v33  ;;  %v1471_v24 = vld [vmem:[#allocation11 + $0x138] sm:$0xff] }
 0x246   :  { %1387 = vmatprep.subr.mxu1 %v997_v28  ;;  %1694 = vmatpush3.msra.mxu0 %v1433_v39  ;;  %v1486_v28 = vld [vmem:[#allocation11 + $0x1b0] sm:$0xff] }
 0x247   :  { %1388 = vmatpush1.msra.mxu1 %v996_v29  ;;  %1695 = vmatprep.subr.mxu0 %v1448_v3  ;;  %v1470_v29 = vld [vmem:[#allocation11 + $0x130] sm:$0xff] }
 0x248   :  { %1389 = vmatprep.subr.mxu1 %v1121_v34  ;;  %1696 = vmatpush3.msra.mxu0 %v1432_v4  ;;  %v1485_v34 = vld [vmem:[#allocation11 + $0x1a8] sm:$0xff] }
 0x249   :  { %1390 = vmatpush2.msra.mxu1 %v1120_v30  ;;  %v1469_v30 = vld [vmem:[#allocation11 + $0x128] sm:$0xff] }
 0x24a   :  { %1391 = vmatprep.subr.mxu1 %v1117_v31  ;;  %v1484_v31 = vld [vmem:[#allocation11 + $0x1a0] sm:$0xff] }
 0x24b   :  { %1392 = vmatpush2.msra.mxu1 %v1116_v35  ;;  %v1468_v35 = vld [vmem:[#allocation11 + $0x120] sm:$0xff] }
 0x24c   :  { %1393 = vmatprep.subr.mxu1 %v1113_v36  ;;  %v1483_v36 = vld [vmem:[#allocation11 + $0x198] sm:$0xff] }
 0x24d   :  { %1394 = vmatpush2.msra.mxu1 %v1112_v37  ;;  %v1467_v37 = vld [vmem:[#allocation11 + $0x118] sm:$0xff] }
 0x24e   :  { %1395 = vmatprep.subr.mxu1 %v1109_v38  ;;  %v1482_v38 = vld [vmem:[#allocation11 + $0x190] sm:$0xff] }
 0x24f   :  { %1396 = vmatpush2.msra.mxu1 %v1108_v40  ;;  %v1466_v40 = vld [vmem:[#allocation11 + $0x110] sm:$0xff] }
 0x250   :  { %1397 = vmatprep.subr.mxu1 %v1105_v41  ;;  %v1481_v41 = vld [vmem:[#allocation11 + $0x188] sm:$0xff] }
 0x251   :  { %1398 = vmatpush2.msra.mxu1 %v1104_v43  ;;  %v1465_v43 = vld [vmem:[#allocation11 + $0x108] sm:$0xff] }
 0x252   :  { %1399 = vmatprep.subr.mxu1 %v1101_v44  ;;  %v1480_v44 = vld [vmem:[#allocation11 + $0x180] sm:$0xff] }
 0x253   :  { %1400 = vmatpush2.msra.mxu1 %v1100_v45  ;;  %v1464_v45 = vld [vmem:[#allocation11 + $0x100] sm:$0xff] }
 0x254   :  { %1401 = vmatprep.subr.mxu1 %v1097_v46  ;;  %v1122_v46 = vld [vmem:[%s2058_s6] sm:$0xf] }
 0x255   :  { %1402 = vmatpush2.msra.mxu1 %v1096_v7 }
 0x256   :  { %1403 = vmatprep.subr.mxu1 %v1093_v11  ;;  %v1127_v11 = vrot.slane %v1122_v46, %v1988_v23 }
 0x257   :  { %1404 = vmatpush2.msra.mxu1 %v1092_v47  ;;  %v1131_v47 = vrot.slane %v1122_v46, %v1990_v25 }
 0x258   :  { %1405 = vmatprep.subr.mxu1 %v1089_v48 }
 0x259   :  { %1406 = vmatpush2.msra.mxu1 %v1088_v49 }
 0x25a   :  { %1407 = vmatprep.subr.mxu1 %v1085_v50 }
 0x25b   :  { %1408 = vmatpush2.msra.mxu1 %v1084_v51 }
 0x25c   :  { %1409 = vmatprep.subr.mxu1 %v1081_v52 }
 0x25d   :  { %1410 = vmatpush2.msra.mxu1 %v1080_v53 }
 0x25e   :  { %1411 = vmatprep.subr.mxu1 %v1077_v54 }
 0x25f   :  { %1412 = vmatpush2.msra.mxu1 %v1076_v55 }
 0x260   :  { %1413 = vmatprep.subr.mxu1 %v1073_v56 }
 0x261   :  { %1414 = vmatpush2.msra.mxu1 %v1072_v57 }
 0x262   :  { %1415 = vmatprep.subr.mxu1 %v1069_v58  ;;  %v1135_v58 = vrot.slane %v1122_v46, %v1986_v22  ;;  %v1664_v22 = vld [vmem:[%s2060_s8] ss:$0 sm:$0xff] }
 0x263   :  { %1416 = vmatpush2.msra.mxu1 %v1068_v59  ;;  %v1139_v59 = vrot.slane %v1122_v46, %v1992_v26 }
 0x264   :  { %1417 = vmatprep.subr.mxu1 %v1065_v60 }
 0x265   :  { %1418 = vmatpush2.msra.mxu1 %v1064_v61 }
 0x266   :  { %1419 = vmatprep.subr.mxu1 %v1061_v62 }
 0x267   :  { %1420 = vmatpush2.msra.mxu1 %v1060_v63 }
 0x268   :  { %1422 = vmatmul.mubr.f32.vlgmr.msra.gmra.mxu1 %v864_v32  ;;  %1700 = vmatprep.subr.mxu1 %v1495_v5  ;;  %v1478_v32 = vld [vmem:[#allocation11 + $0x170] sm:$0xff] }
 0x269   :  { %1701 = vmatpush3.msra.mxu1 %v1479_v6 }
 0x26a   :  { %1702 = vmatprep.subr.mxu1 %v1494_v27 }
 0x26b   :  { %1703 = vmatpush3.msra.mxu1 %v1478_v32 }
 0x26c   :  { %1704 = vmatprep.subr.mxu1 %v1493_v8 }
 0x26d   :  { %1705 = vmatpush3.msra.mxu1 %v1477_v9 }
 0x26e   :  { %1706 = vmatprep.subr.mxu1 %v1492_v10 }
 0x26f   :  { %1707 = vmatpush3.msra.mxu1 %v1476_v12 }
 0x270   :  { %1708 = vmatprep.subr.mxu1 %v1491_v13 }
 0x271   :  { %1709 = vmatpush3.msra.mxu1 %v1475_v14 }
 0x272   :  { %1710 = vmatprep.subr.mxu1 %v1490_v15 }
 0x273   :  { %1711 = vmatpush3.msra.mxu1 %v1474_v16 }
 0x274   :  { %1712 = vmatprep.subr.mxu1 %v1489_v17 }
 0x275   :  { %1713 = vmatpush3.msra.mxu1 %v1473_v18 }
 0x276   :  { %1714 = vmatprep.subr.mxu1 %v1488_v19 }
 0x277   :  { %1715 = vmatpush3.msra.mxu1 %v1472_v20 }
 0x278   :  { %1716 = vmatprep.subr.mxu1 %v1487_v21 }
 0x279   :  { %1717 = vmatpush3.msra.mxu1 %v1471_v24 }
 0x27a   :  { %1718 = vmatprep.subr.mxu1 %v1486_v28 }
 0x27b   :  { %1719 = vmatpush3.msra.mxu1 %v1470_v29 }
 0x27c   :  { %1720 = vmatprep.subr.mxu1 %v1485_v34 }
 0x27d   :  { %1721 = vmatpush3.msra.mxu1 %v1469_v30 }
 0x27e   :  { %1722 = vmatprep.subr.mxu1 %v1484_v31 }
 0x27f   :  { %1723 = vmatpush3.msra.mxu1 %v1468_v35 }
 0x280   :  { %1724 = vmatprep.subr.mxu1 %v1483_v36 }
 0x281   :  { %1725 = vmatpush3.msra.mxu1 %v1467_v37 }
 0x282   :  { %1726 = vmatprep.subr.mxu1 %v1482_v38 }
 0x283   :  { %1727 = vmatpush3.msra.mxu1 %v1466_v40 }
 0x284   :  { %1728 = vmatprep.subr.mxu1 %v1481_v41 }
 0x285   :  { %1729 = vmatpush3.msra.mxu1 %v1465_v43 }
 0x286   :  { %1730 = vmatprep.subr.mxu1 %v1480_v44 }
 0x287   :  { %1731 = vmatpush3.msra.mxu1 %v1464_v45 }
 0x2a7   :  { %v1210_v7 = vpop.f32.mrf.mxu0 }
 0x2a8   :  { %v1211_v49 = vadd.f32 %v1210_v7, %v1127_v11 }
 0x2a9   :  { %v1212_v48 = vpop.f32.mrf.mxu0 }
 0x2aa   :  { %v1213_v51 = vadd.f32 %v1212_v48, %v1131_v47 }
 0x2e7   :  { %v1352_v57 = vpop.f32.mrf.mxu0 }
 0x2e8   :  { %v1281_v50 = vpop.f32.mrf.mxu1  ;;  %v1353_v23 = vadd.f32 %v1352_v57, %v1135_v58 }
 0x2e9   :  { %v1282_v52 = vadd.f32 %v1281_v50, %v1211_v49  ;;  %v1354_v60 = vpop.f32.mrf.mxu0 }
 0x2ea   :  { %v1283_v53 = vpop.f32.mrf.mxu1  ;;  %v1355_v25 = vadd.f32 %v1354_v60, %v1139_v59 }
 0x2eb   :  { %v1284_v54 = vadd.f32 %v1283_v53, %v1213_v51  ;;  %v1428_v56 = vmax.f32 %v1282_v52, 0.0 }
 0x2ed   :  { %v1429_v55 = vmax.f32 %v1284_v54, 0.0 }
 0x2ef   :  { %1567 = vmatprep.mubr.f32.mxu0 %v1429_v55 }
 0x2f0   :  { %1568 = vmatmul.mubr.f32.vlgmr.msra.gmra.mxu0 %v1428_v56 }
 0x328   :  { %v1423_v61 = vpop.f32.mrf.mxu1 }
 0x329   :  { %v1424_v62 = vadd.f32 %v1423_v61, %v1353_v23 }
 0x32a   :  { %v1425_v63 = vpop.f32.mrf.mxu1 }
 0x32b   :  { %v1426_v0 = vadd.f32 %v1425_v63, %v1355_v25  ;;  %v1430_v2 = vmax.f32 %v1424_v62, 0.0 }
 0x32d   :  { %v1431_v1 = vmax.f32 %v1426_v0, 0.0 }
 0x32f   :  { %1637 = vmatprep.mubr.f32.mxu1 %v1431_v1 }
 0x330   :  { %1638 = vmatmul.mubr.f32.vlgmr.msra.gmra.mxu1 %v1430_v2 }
 0x3b0   :  { %v1697_v42 = vpop.f32.mrf.mxu0 }
 0x3b2   :  { %v1698_v33 = vpop.f32.mrf.mxu0 }
 0x3b3   :  { %v1699_v39 = vadd.f32 %v1698_v33, %v1697_v42 }
 0x3b5   :  { %v1570_v4 = vadd.f32 %v1699_v39, %v1664_v22 }
 0x3f0   :  { %v1732_v3 = vpop.f32.mrf.mxu1 }
 0x3f2   :  { %v1733_v26 = vpop.f32.mrf.mxu1 }
 0x3f3   :  { %v1734_v5 = vadd.f32 %v1733_v26, %v1732_v3 }
 0x3f5   :  { %v1640_v6 = vadd.f32 %v1734_v5, %v1570_v4 }
 0x3f7   :  { %1643 = vst [vmem:[#allocation13] sm:$0xff] %v1640_v6 }
 0x3f8   :  { %1878 = shalt.err (!%p1875_p6)
}
 0x3f9   :  { %1653 = dma.vmem_to_hbm [thread:$0]  %s1651_s21, 128, %s2061_s9, [#allocation4]  }
 0x3fa   :  { %1895 = dma.done.wait [#allocation4], 128  }
 0x3fb   :  { %1896 = vsyncadd [#allocation4], 4294967168 }
 0x3fc   :  { %1657 = vsyncpa [#allocation3], 1 }
 0x3fd   :  { %1658 = vsyncpa [#allocation6], 1 }
 0x3fe   :  { %1659 = vsyncpa [#allocation9], 1 }
 0x3ff   :  { %1660 = vsyncpa [#allocation12], 1 }
 0x400   :  { %1661 = vsyncpa [#allocation4], 1 }

</bundles_post_ra>
